<compile_context>
chip_gen: v7x
topology: tpu7x:2x2x1
jax: 0.10.0
libtpu: 0.0.40
codegen_flags: <defaults>
</compile_context>

<pallas_src>
import jax
import jax.numpy as jnp
from jax.experimental import pallas as pl
from jax.experimental.pallas import tpu as pltpu

EPS = 1e-5  # PyTorch InstanceNorm2d default eps (affine=False, no running stats)


def _make_kernel(C, H, W):
    HW = H * W
    M = W + 1            # flat-scratch margin so every tap slice is in-bounds
    OFF = (-1, 0, 1)     # kernel offsets; kh/kw = 0,1,2 <-> dh/dw = -1,0,+1

    def conv3x3(xe_ref, w_ref, b_ref, top, bot, left, right):
        """Reflect-padded 3x3 conv on the flat (C, HW) activation in xe_ref[:, M:M+HW].

        w_ref: (C, C*9) f32 with w_ref[co, ci*9 + kh*3 + kw];  b_ref: (C, 1) f32.
        Returns (C, HW) f32.
        """
        def raw(off):                                   # activation shifted by `off`
            return xe_ref[:, M + off: M + off + HW]     # static lane slice, (C, HW)

        acc = jnp.zeros((C, HW), jnp.float32)
        for kh, dh in enumerate(OFF):
            # Row-reflected slabs for this kernel row (all three column offsets).
            if dh == 0:
                rf = [raw(dw) for dw in OFF]
            elif dh == -1:   # row -1 reflects to row +1 at the top edge
                rf = [jnp.where(top, raw(W + dw), raw(-W + dw)) for dw in OFF]
            else:            # row H reflects to row H-2 at the bottom edge
                rf = [jnp.where(bot, raw(-W + dw), raw(W + dw)) for dw in OFF]
            # Column reflection (after the row fix, so corners come out right).
            taps = (jnp.where(left, rf[2], rf[0]),      # dw = -1
                    rf[1],                              # dw =  0
                    jnp.where(right, rf[0], rf[2]))     # dw = +1
            for kw in range(3):
                t = taps[kw]
                for ci in range(C):
                    idx = ci * 9 + kh * 3 + kw
                    w_col = w_ref[:, idx:idx + 1]           # (C, 1): all out-channels
                    acc = acc + w_col * t[ci:ci + 1, :]     # (C,1)*(1,HW) -> (C,HW)
        return acc + b_ref[...]                             # broadcast bias add

    def instance_norm(y):
        # Fused single-sweep statistics (sum + sum-of-squares), f32 throughout.
        inv_n = 1.0 / HW
        mean = jnp.sum(y, axis=1, keepdims=True) * inv_n
        ex2 = jnp.sum(y * y, axis=1, keepdims=True) * inv_n
        var = ex2 - mean * mean
        return (y - mean) * jax.lax.rsqrt(var + EPS)         # rsqrt -> EUP

    def kernel(x_ref, pos_ref, w1_ref, b1_ref, w2_ref, b2_ref, o_ref, xe_ref):
        x = x_ref[0].astype(jnp.float32)                 # (C, HW) lane-dense
        hh = pos_ref[0:1, :]                             # (1, HW) row index
        ww = pos_ref[1:2, :]                             # (1, HW) col index
        top, bot = hh == 0, hh == H - 1
        left, right = ww == 0, ww == W - 1

        # Margins are never selected by the reflection masks; zero them for hygiene.
        zeros_m = jnp.zeros((C, M), jnp.float32)
        xe_ref[:, 0:M] = zeros_m
        xe_ref[:, M + HW:M + HW + M] = zeros_m

        # conv1 -> InstanceNorm -> ReLU
        xe_ref[:, M:M + HW] = x
        y = conv3x3(xe_ref, w1_ref, b1_ref, top, bot, left, right)
        y = jnp.maximum(instance_norm(y), 0.0)

        # conv2 -> InstanceNorm  (interior overwritten; same-ref program order holds)
        xe_ref[:, M:M + HW] = y
        y2 = instance_norm(conv3x3(xe_ref, w2_ref, b2_ref, top, bot, left, right))

        # residual add + lane-dense (C, 256) store
        o_ref[0] = (y2 + x).astype(o_ref.dtype)

    return kernel, HW, M


def resnet_block(x_nchw, w1_oihw, b1, w2_oihw, b2):
    """x_nchw: (N, C, H, W) f32; weights in PyTorch OIHW layout.  Returns NCHW."""
    N, C, H, W = x_nchw.shape
    kernel, HW, M = _make_kernel(C, H, W)

    x_flat = x_nchw.reshape(N, C, HW)                         # free HBM-level reshape
    wv1 = w1_oihw.reshape(C, C * 9).astype(jnp.float32)       # [co, ci*9+kh*3+kw]
    wv2 = w2_oihw.reshape(C, C * 9).astype(jnp.float32)
    b1c = b1.reshape(C, 1).astype(jnp.float32)
    b2c = b2.reshape(C, 1).astype(jnp.float32)
    p = jnp.arange(HW, dtype=jnp.int32)
    pos = jnp.stack([p // W, p % W], axis=0)                  # (2, HW) row/col indices

    macs = 2 * 9 * C * C * HW                                 # both convs, per image
    cost = pl.CostEstimate(
        flops=int(N * (2 * macs + 12 * C * HW)),
        transcendentals=int(N * 2 * C),
        bytes_accessed=int(2 * N * C * HW * 4
                           + (2 * C * 9 * C + 2 * C + 2 * HW) * 4),
    )

    const = lambda n: (0, 0)
    out_flat = pl.pallas_call(
        kernel,
        out_shape=jax.ShapeDtypeStruct((N, C, HW), x_nchw.dtype),
        grid_spec=pltpu.PrefetchScalarGridSpec(
            num_scalar_prefetch=0,
            grid=(N,),
            in_specs=[
                pl.BlockSpec((1, C, HW), lambda n: (n, 0, 0)),   # x (lane-dense)
                pl.BlockSpec((2, HW), const),                    # row/col indices
                pl.BlockSpec((C, C * 9), const),                 # w1
                pl.BlockSpec((C, 1), const),                     # b1
                pl.BlockSpec((C, C * 9), const),                 # w2
                pl.BlockSpec((C, 1), const),                     # b2
            ],
            out_specs=pl.BlockSpec((1, C, HW), lambda n: (n, 0, 0)),
            scratch_shapes=[pltpu.VMEM((C, HW + 2 * M), jnp.float32)],
        ),
        compiler_params=pltpu.CompilerParams(
            dimension_semantics=("parallel",)),   # feeds both v7x TCs at N=2
        cost_estimate=cost,
    )(x_flat, pos, wv1, b1c, wv2, b2c)
    return out_flat.reshape(N, C, H, W)


# ---------------- pure-JAX reference (for correctness check) ----------------

def resnet_block_ref(x, w1_oihw, b1, w2_oihw, b2):
    def rpad(t):
        return jnp.pad(t, ((0, 0), (0, 0), (1, 1), (1, 1)), mode="reflect")

    def conv(t, w, b):
        y = jax.lax.conv_general_dilated(
            t, w, (1, 1), "VALID",
            dimension_numbers=("NCHW", "OIHW", "NCHW"))
        return y + b[None, :, None, None]

    def inorm(y):
        m = y.mean(axis=(2, 3), keepdims=True)
        v = ((y - m) ** 2).mean(axis=(2, 3), keepdims=True)
        return (y - m) / jnp.sqrt(v + EPS)

    h = jax.nn.relu(inorm(conv(rpad(x), w1_oihw, b1)))
    h = inorm(conv(rpad(h), w2_oihw, b2))
    return h + x


if __name__ == "__main__":
    key = jax.random.PRNGKey(0)
    N, C, H, W = 2, 4, 16, 16
    k_x, k_w1, k_b1, k_w2, k_b2 = jax.random.split(key, 5)

    x = jax.random.normal(k_x, (N, C, H, W), jnp.float32)

    # Deterministic parameter init (Conv2d weight shape is (out, in, 3, 3)).
    scale = 1.0 / (C * 3 * 3) ** 0.5
    w1_oihw = jax.random.uniform(k_w1, (C, C, 3, 3), jnp.float32, -scale, scale)
    b1 = jax.random.uniform(k_b1, (C,), jnp.float32, -scale, scale)
    w2_oihw = jax.random.uniform(k_w2, (C, C, 3, 3), jnp.float32, -scale, scale)
    b2 = jax.random.uniform(k_b2, (C,), jnp.float32, -scale, scale)

    out = jax.block_until_ready(resnet_block(x, w1_oihw, b1, w2_oihw, b2))
    ref = jax.block_until_ready(resnet_block_ref(x, w1_oihw, b1, w2_oihw, b2))

    assert out.shape == (N, C, H, W)
    assert jnp.allclose(out, ref, atol=1e-4, rtol=1e-4), float(
        jnp.max(jnp.abs(out - ref)))
    print("KERNEL_OK")
</pallas_src>

<mosaic_0001>
module attributes {stable_mosaic.version = 11 : i64} {
  func.func @kernel(%arg0: i32, %arg1: memref<1x4x256xf32, #tpu.memory_space<vmem>>, %arg2: memref<2x256xi32, #tpu.memory_space<vmem>>, %arg3: memref<4x36xf32, #tpu.memory_space<vmem>>, %arg4: memref<4x1xf32, #tpu.memory_space<vmem>>, %arg5: memref<4x36xf32, #tpu.memory_space<vmem>>, %arg6: memref<4x1xf32, #tpu.memory_space<vmem>>, %arg7: memref<1x4x256xf32, #tpu.memory_space<vmem>>, %arg8: memref<4x290xf32, #tpu.memory_space<vmem>>) attributes {dimension_semantics = [#tpu.dimension_semantics<parallel>], iteration_bounds = array<i64: 2>, scalar_prefetch = 0 : i64, scratch_operands = 1 : i64, tpu.core_type = #tpu.core_type<tc>, window_params = [{transform_indices = @transform_0, window_bounds = array<i64: 1, 4, 256>}, {pipeline_mode = #tpu.pipeline_mode<synchronous>, transform_indices = @transform_1, window_bounds = array<i64: 2, 256>}, {pipeline_mode = #tpu.pipeline_mode<synchronous>, transform_indices = @transform_2, window_bounds = array<i64: 4, 36>}, {pipeline_mode = #tpu.pipeline_mode<synchronous>, transform_indices = @transform_3, window_bounds = array<i64: 4, 1>}, {pipeline_mode = #tpu.pipeline_mode<synchronous>, transform_indices = @transform_4, window_bounds = array<i64: 4, 36>}, {pipeline_mode = #tpu.pipeline_mode<synchronous>, transform_indices = @transform_5, window_bounds = array<i64: 4, 1>}, {transform_indices = @transform_6, window_bounds = array<i64: 1, 4, 256>}]} {
    %c0 = arith.constant 0 : index
    %c0_0 = arith.constant 0 : index
    %c0_1 = arith.constant 0 : index
    %0 = vector.load %arg1[%c0, %c0_0, %c0_1] : memref<1x4x256xf32, #tpu.memory_space<vmem>>, vector<1x4x256xf32>
    %1 = vector.shape_cast %0 : vector<1x4x256xf32> to vector<4x256xf32>
    %c0_2 = arith.constant 0 : index
    %c0_3 = arith.constant 0 : index
    %2 = vector.load %arg2[%c0_2, %c0_3] : memref<2x256xi32, #tpu.memory_space<vmem>>, vector<1x256xi32>
    %c1 = arith.constant 1 : index
    %c0_4 = arith.constant 0 : index
    %3 = vector.load %arg2[%c1, %c0_4] : memref<2x256xi32, #tpu.memory_space<vmem>>, vector<1x256xi32>
    %c0_i32 = arith.constant 0 : i32
    %4 = vector.broadcast %c0_i32 : i32 to vector<1x256xi32>
    %5 = arith.cmpi eq, %2, %4 : vector<1x256xi32>
    %c15_i32 = arith.constant 15 : i32
    %6 = vector.broadcast %c15_i32 : i32 to vector<1x256xi32>
    %7 = arith.cmpi eq, %2, %6 : vector<1x256xi32>
    %c0_i32_5 = arith.constant 0 : i32
    %8 = vector.broadcast %c0_i32_5 : i32 to vector<1x256xi32>
    %9 = arith.cmpi eq, %3, %8 : vector<1x256xi32>
    %c15_i32_6 = arith.constant 15 : i32
    %10 = vector.broadcast %c15_i32_6 : i32 to vector<1x256xi32>
    %11 = arith.cmpi eq, %3, %10 : vector<1x256xi32>
    %cst = arith.constant 0.000000e+00 : f32
    %12 = vector.broadcast %cst : f32 to vector<4x17xf32>
    %c0_7 = arith.constant 0 : index
    %c0_8 = arith.constant 0 : index
    %13 = vector.load %arg8[%c0_7, %c0_8] : memref<4x290xf32, #tpu.memory_space<vmem>>, vector<4x17xf32>
    tpu.vector_store %arg8[%c0_7, %c0_8], %12 {strides = array<i32>} : memref<4x290xf32, #tpu.memory_space<vmem>>, vector<4x17xf32>,
    %c0_9 = arith.constant 0 : index
    %c273 = arith.constant 273 : index
    %14 = vector.load %arg8[%c0_9, %c273] : memref<4x290xf32, #tpu.memory_space<vmem>>, vector<4x17xf32>
    tpu.vector_store %arg8[%c0_9, %c273], %12 {strides = array<i32>} : memref<4x290xf32, #tpu.memory_space<vmem>>, vector<4x17xf32>,
    %c0_10 = arith.constant 0 : index
    %c17 = arith.constant 17 : index
    %15 = vector.load %arg8[%c0_10, %c17] : memref<4x290xf32, #tpu.memory_space<vmem>>, vector<4x256xf32>
    tpu.vector_store %arg8[%c0_10, %c17], %1 {strides = array<i32>} : memref<4x290xf32, #tpu.memory_space<vmem>>, vector<4x256xf32>,
    %cst_11 = arith.constant 0.000000e+00 : f32
    %16 = vector.broadcast %cst_11 : f32 to vector<4x256xf32>
    %c0_12 = arith.constant 0 : index
    %c32 = arith.constant 32 : index
    %17 = vector.load %arg8[%c0_12, %c32] : memref<4x290xf32, #tpu.memory_space<vmem>>, vector<4x256xf32>
    %c0_13 = arith.constant 0 : index
    %c0_14 = arith.constant 0 : index
    %18 = vector.load %arg8[%c0_13, %c0_14] : memref<4x290xf32, #tpu.memory_space<vmem>>, vector<4x256xf32>
    %19 = vector.shape_cast %5 : vector<1x256xi1> to vector<1x256xi1>
    %20 = vector.broadcast %19 : vector<1x256xi1> to vector<4x256xi1>
    %21 = arith.select %20, %17, %18 : vector<4x256xi1>, vector<4x256xf32>
    %c0_15 = arith.constant 0 : index
    %c33 = arith.constant 33 : index
    %22 = vector.load %arg8[%c0_15, %c33] : memref<4x290xf32, #tpu.memory_space<vmem>>, vector<4x256xf32>
    %c0_16 = arith.constant 0 : index
    %c1_17 = arith.constant 1 : index
    %23 = vector.load %arg8[%c0_16, %c1_17] : memref<4x290xf32, #tpu.memory_space<vmem>>, vector<4x256xf32>
    %24 = vector.shape_cast %5 : vector<1x256xi1> to vector<1x256xi1>
    %25 = vector.broadcast %24 : vector<1x256xi1> to vector<4x256xi1>
    %26 = arith.select %25, %22, %23 : vector<4x256xi1>, vector<4x256xf32>
    %c0_18 = arith.constant 0 : index
    %c34 = arith.constant 34 : index
    %27 = vector.load %arg8[%c0_18, %c34] : memref<4x290xf32, #tpu.memory_space<vmem>>, vector<4x256xf32>
    %c0_19 = arith.constant 0 : index
    %c2 = arith.constant 2 : index
    %28 = vector.load %arg8[%c0_19, %c2] : memref<4x290xf32, #tpu.memory_space<vmem>>, vector<4x256xf32>
    %29 = vector.shape_cast %5 : vector<1x256xi1> to vector<1x256xi1>
    %30 = vector.broadcast %29 : vector<1x256xi1> to vector<4x256xi1>
    %31 = arith.select %30, %27, %28 : vector<4x256xi1>, vector<4x256xf32>
    %32 = vector.shape_cast %9 : vector<1x256xi1> to vector<1x256xi1>
    %33 = vector.broadcast %32 : vector<1x256xi1> to vector<4x256xi1>
    %34 = arith.select %33, %31, %21 : vector<4x256xi1>, vector<4x256xf32>
    %35 = vector.shape_cast %11 : vector<1x256xi1> to vector<1x256xi1>
    %36 = vector.broadcast %35 : vector<1x256xi1> to vector<4x256xi1>
    %37 = arith.select %36, %21, %31 : vector<4x256xi1>, vector<4x256xf32>
    %c0_20 = arith.constant 0 : index
    %c0_21 = arith.constant 0 : index
    %38 = vector.load %arg3[%c0_20, %c0_21] : memref<4x36xf32, #tpu.memory_space<vmem>>, vector<4x1xf32>
    %39 = vector.extract_strided_slice %34 {offsets = [0, 0], sizes = [1, 256], strides = [1, 1]} : vector<4x256xf32> to vector<1x256xf32>
    %40 = vector.broadcast %38 : vector<4x1xf32> to vector<4x256xf32>
    %41 = vector.broadcast %39 : vector<1x256xf32> to vector<4x256xf32>
    %42 = arith.mulf %40, %41 : vector<4x256xf32>
    %43 = arith.addf %16, %42 : vector<4x256xf32>
    %c0_22 = arith.constant 0 : index
    %c9 = arith.constant 9 : index
    %44 = vector.load %arg3[%c0_22, %c9] : memref<4x36xf32, #tpu.memory_space<vmem>>, vector<4x1xf32>
    %45 = vector.extract_strided_slice %34 {offsets = [1, 0], sizes = [1, 256], strides = [1, 1]} : vector<4x256xf32> to vector<1x256xf32>
    %46 = vector.broadcast %44 : vector<4x1xf32> to vector<4x256xf32>
    %47 = vector.broadcast %45 : vector<1x256xf32> to vector<4x256xf32>
    %48 = arith.mulf %46, %47 : vector<4x256xf32>
    %49 = arith.addf %43, %48 : vector<4x256xf32>
    %c0_23 = arith.constant 0 : index
    %c18 = arith.constant 18 : index
    %50 = vector.load %arg3[%c0_23, %c18] : memref<4x36xf32, #tpu.memory_space<vmem>>, vector<4x1xf32>
    %51 = vector.extract_strided_slice %34 {offsets = [2, 0], sizes = [1, 256], strides = [1, 1]} : vector<4x256xf32> to vector<1x256xf32>
    %52 = vector.broadcast %50 : vector<4x1xf32> to vector<4x256xf32>
    %53 = vector.broadcast %51 : vector<1x256xf32> to vector<4x256xf32>
    %54 = arith.mulf %52, %53 : vector<4x256xf32>
    %55 = arith.addf %49, %54 : vector<4x256xf32>
    %c0_24 = arith.constant 0 : index
    %c27 = arith.constant 27 : index
    %56 = vector.load %arg3[%c0_24, %c27] : memref<4x36xf32, #tpu.memory_space<vmem>>, vector<4x1xf32>
    %57 = vector.extract_strided_slice %34 {offsets = [3, 0], sizes = [1, 256], strides = [1, 1]} : vector<4x256xf32> to vector<1x256xf32>
    %58 = vector.broadcast %56 : vector<4x1xf32> to vector<4x256xf32>
    %59 = vector.broadcast %57 : vector<1x256xf32> to vector<4x256xf32>
    %60 = arith.mulf %58, %59 : vector<4x256xf32>
    %61 = arith.addf %55, %60 : vector<4x256xf32>
    %c0_25 = arith.constant 0 : index
    %c1_26 = arith.constant 1 : index
    %62 = vector.load %arg3[%c0_25, %c1_26] : memref<4x36xf32, #tpu.memory_space<vmem>>, vector<4x1xf32>
    %63 = vector.extract_strided_slice %26 {offsets = [0, 0], sizes = [1, 256], strides = [1, 1]} : vector<4x256xf32> to vector<1x256xf32>
    %64 = vector.broadcast %62 : vector<4x1xf32> to vector<4x256xf32>
    %65 = vector.broadcast %63 : vector<1x256xf32> to vector<4x256xf32>
    %66 = arith.mulf %64, %65 : vector<4x256xf32>
    %67 = arith.addf %61, %66 : vector<4x256xf32>
    %c0_27 = arith.constant 0 : index
    %c10 = arith.constant 10 : index
    %68 = vector.load %arg3[%c0_27, %c10] : memref<4x36xf32, #tpu.memory_space<vmem>>, vector<4x1xf32>
    %69 = vector.extract_strided_slice %26 {offsets = [1, 0], sizes = [1, 256], strides = [1, 1]} : vector<4x256xf32> to vector<1x256xf32>
    %70 = vector.broadcast %68 : vector<4x1xf32> to vector<4x256xf32>
    %71 = vector.broadcast %69 : vector<1x256xf32> to vector<4x256xf32>
    %72 = arith.mulf %70, %71 : vector<4x256xf32>
    %73 = arith.addf %67, %72 : vector<4x256xf32>
    %c0_28 = arith.constant 0 : index
    %c19 = arith.constant 19 : index
    %74 = vector.load %arg3[%c0_28, %c19] : memref<4x36xf32, #tpu.memory_space<vmem>>, vector<4x1xf32>
    %75 = vector.extract_strided_slice %26 {offsets = [2, 0], sizes = [1, 256], strides = [1, 1]} : vector<4x256xf32> to vector<1x256xf32>
    %76 = vector.broadcast %74 : vector<4x1xf32> to vector<4x256xf32>
    %77 = vector.broadcast %75 : vector<1x256xf32> to vector<4x256xf32>
    %78 = arith.mulf %76, %77 : vector<4x256xf32>
    %79 = arith.addf %73, %78 : vector<4x256xf32>
    %c0_29 = arith.constant 0 : index
    %c28 = arith.constant 28 : index
    %80 = vector.load %arg3[%c0_29, %c28] : memref<4x36xf32, #tpu.memory_space<vmem>>, vector<4x1xf32>
    %81 = vector.extract_strided_slice %26 {offsets = [3, 0], sizes = [1, 256], strides = [1, 1]} : vector<4x256xf32> to vector<1x256xf32>
    %82 = vector.broadcast %80 : vector<4x1xf32> to vector<4x256xf32>
    %83 = vector.broadcast %81 : vector<1x256xf32> to vector<4x256xf32>
    %84 = arith.mulf %82, %83 : vector<4x256xf32>
    %85 = arith.addf %79, %84 : vector<4x256xf32>
    %c0_30 = arith.constant 0 : index
    %c2_31 = arith.constant 2 : index
    %86 = vector.load %arg3[%c0_30, %c2_31] : memref<4x36xf32, #tpu.memory_space<vmem>>, vector<4x1xf32>
    %87 = vector.extract_strided_slice %37 {offsets = [0, 0], sizes = [1, 256], strides = [1, 1]} : vector<4x256xf32> to vector<1x256xf32>
    %88 = vector.broadcast %86 : vector<4x1xf32> to vector<4x256xf32>
    %89 = vector.broadcast %87 : vector<1x256xf32> to vector<4x256xf32>
    %90 = arith.mulf %88, %89 : vector<4x256xf32>
    %91 = arith.addf %85, %90 : vector<4x256xf32>
    %c0_32 = arith.constant 0 : index
    %c11 = arith.constant 11 : index
    %92 = vector.load %arg3[%c0_32, %c11] : memref<4x36xf32, #tpu.memory_space<vmem>>, vector<4x1xf32>
    %93 = vector.extract_strided_slice %37 {offsets = [1, 0], sizes = [1, 256], strides = [1, 1]} : vector<4x256xf32> to vector<1x256xf32>
    %94 = vector.broadcast %92 : vector<4x1xf32> to vector<4x256xf32>
    %95 = vector.broadcast %93 : vector<1x256xf32> to vector<4x256xf32>
    %96 = arith.mulf %94, %95 : vector<4x256xf32>
    %97 = arith.addf %91, %96 : vector<4x256xf32>
    %c0_33 = arith.constant 0 : index
    %c20 = arith.constant 20 : index
    %98 = vector.load %arg3[%c0_33, %c20] : memref<4x36xf32, #tpu.memory_space<vmem>>, vector<4x1xf32>
    %99 = vector.extract_strided_slice %37 {offsets = [2, 0], sizes = [1, 256], strides = [1, 1]} : vector<4x256xf32> to vector<1x256xf32>
    %100 = vector.broadcast %98 : vector<4x1xf32> to vector<4x256xf32>
    %101 = vector.broadcast %99 : vector<1x256xf32> to vector<4x256xf32>
    %102 = arith.mulf %100, %101 : vector<4x256xf32>
    %103 = arith.addf %97, %102 : vector<4x256xf32>
    %c0_34 = arith.constant 0 : index
    %c29 = arith.constant 29 : index
    %104 = vector.load %arg3[%c0_34, %c29] : memref<4x36xf32, #tpu.memory_space<vmem>>, vector<4x1xf32>
    %105 = vector.extract_strided_slice %37 {offsets = [3, 0], sizes = [1, 256], strides = [1, 1]} : vector<4x256xf32> to vector<1x256xf32>
    %106 = vector.broadcast %104 : vector<4x1xf32> to vector<4x256xf32>
    %107 = vector.broadcast %105 : vector<1x256xf32> to vector<4x256xf32>
    %108 = arith.mulf %106, %107 : vector<4x256xf32>
    %109 = arith.addf %103, %108 : vector<4x256xf32>
    %c0_35 = arith.constant 0 : index
    %c16 = arith.constant 16 : index
    %110 = vector.load %arg8[%c0_35, %c16] : memref<4x290xf32, #tpu.memory_space<vmem>>, vector<4x256xf32>
    %c0_36 = arith.constant 0 : index
    %c17_37 = arith.constant 17 : index
    %111 = vector.load %arg8[%c0_36, %c17_37] : memref<4x290xf32, #tpu.memory_space<vmem>>, vector<4x256xf32>
    %c0_38 = arith.constant 0 : index
    %c18_39 = arith.constant 18 : index
    %112 = vector.load %arg8[%c0_38, %c18_39] : memref<4x290xf32, #tpu.memory_space<vmem>>, vector<4x256xf32>
    %113 = vector.shape_cast %9 : vector<1x256xi1> to vector<1x256xi1>
    %114 = vector.broadcast %113 : vector<1x256xi1> to vector<4x256xi1>
    %115 = arith.select %114, %112, %110 : vector<4x256xi1>, vector<4x256xf32>
    %116 = vector.shape_cast %11 : vector<1x256xi1> to vector<1x256xi1>
    %117 = vector.broadcast %116 : vector<1x256xi1> to vector<4x256xi1>
    %118 = arith.select %117, %110, %112 : vector<4x256xi1>, vector<4x256xf32>
    %c0_40 = arith.constant 0 : index
    %c3 = arith.constant 3 : index
    %119 = vector.load %arg3[%c0_40, %c3] : memref<4x36xf32, #tpu.memory_space<vmem>>, vector<4x1xf32>
    %120 = vector.extract_strided_slice %115 {offsets = [0, 0], sizes = [1, 256], strides = [1, 1]} : vector<4x256xf32> to vector<1x256xf32>
    %121 = vector.broadcast %119 : vector<4x1xf32> to vector<4x256xf32>
    %122 = vector.broadcast %120 : vector<1x256xf32> to vector<4x256xf32>
    %123 = arith.mulf %121, %122 : vector<4x256xf32>
    %124 = arith.addf %109, %123 : vector<4x256xf32>
    %c0_41 = arith.constant 0 : index
    %c12 = arith.constant 12 : index
    %125 = vector.load %arg3[%c0_41, %c12] : memref<4x36xf32, #tpu.memory_space<vmem>>, vector<4x1xf32>
    %126 = vector.extract_strided_slice %115 {offsets = [1, 0], sizes = [1, 256], strides = [1, 1]} : vector<4x256xf32> to vector<1x256xf32>
    %127 = vector.broadcast %125 : vector<4x1xf32> to vector<4x256xf32>
    %128 = vector.broadcast %126 : vector<1x256xf32> to vector<4x256xf32>
    %129 = arith.mulf %127, %128 : vector<4x256xf32>
    %130 = arith.addf %124, %129 : vector<4x256xf32>
    %c0_42 = arith.constant 0 : index
    %c21 = arith.constant 21 : index
    %131 = vector.load %arg3[%c0_42, %c21] : memref<4x36xf32, #tpu.memory_space<vmem>>, vector<4x1xf32>
    %132 = vector.extract_strided_slice %115 {offsets = [2, 0], sizes = [1, 256], strides = [1, 1]} : vector<4x256xf32> to vector<1x256xf32>
    %133 = vector.broadcast %131 : vector<4x1xf32> to vector<4x256xf32>
    %134 = vector.broadcast %132 : vector<1x256xf32> to vector<4x256xf32>
    %135 = arith.mulf %133, %134 : vector<4x256xf32>
    %136 = arith.addf %130, %135 : vector<4x256xf32>
    %c0_43 = arith.constant 0 : index
    %c30 = arith.constant 30 : index
    %137 = vector.load %arg3[%c0_43, %c30] : memref<4x36xf32, #tpu.memory_space<vmem>>, vector<4x1xf32>
    %138 = vector.extract_strided_slice %115 {offsets = [3, 0], sizes = [1, 256], strides = [1, 1]} : vector<4x256xf32> to vector<1x256xf32>
    %139 = vector.broadcast %137 : vector<4x1xf32> to vector<4x256xf32>
    %140 = vector.broadcast %138 : vector<1x256xf32> to vector<4x256xf32>
    %141 = arith.mulf %139, %140 : vector<4x256xf32>
    %142 = arith.addf %136, %141 : vector<4x256xf32>
    %c0_44 = arith.constant 0 : index
    %c4 = arith.constant 4 : index
    %143 = vector.load %arg3[%c0_44, %c4] : memref<4x36xf32, #tpu.memory_space<vmem>>, vector<4x1xf32>
    %144 = vector.extract_strided_slice %111 {offsets = [0, 0], sizes = [1, 256], strides = [1, 1]} : vector<4x256xf32> to vector<1x256xf32>
    %145 = vector.broadcast %143 : vector<4x1xf32> to vector<4x256xf32>
    %146 = vector.broadcast %144 : vector<1x256xf32> to vector<4x256xf32>
    %147 = arith.mulf %145, %146 : vector<4x256xf32>
    %148 = arith.addf %142, %147 : vector<4x256xf32>
    %c0_45 = arith.constant 0 : index
    %c13 = arith.constant 13 : index
    %149 = vector.load %arg3[%c0_45, %c13] : memref<4x36xf32, #tpu.memory_space<vmem>>, vector<4x1xf32>
    %150 = vector.extract_strided_slice %111 {offsets = [1, 0], sizes = [1, 256], strides = [1, 1]} : vector<4x256xf32> to vector<1x256xf32>
    %151 = vector.broadcast %149 : vector<4x1xf32> to vector<4x256xf32>
    %152 = vector.broadcast %150 : vector<1x256xf32> to vector<4x256xf32>
    %153 = arith.mulf %151, %152 : vector<4x256xf32>
    %154 = arith.addf %148, %153 : vector<4x256xf32>
    %c0_46 = arith.constant 0 : index
    %c22 = arith.constant 22 : index
    %155 = vector.load %arg3[%c0_46, %c22] : memref<4x36xf32, #tpu.memory_space<vmem>>, vector<4x1xf32>
    %156 = vector.extract_strided_slice %111 {offsets = [2, 0], sizes = [1, 256], strides = [1, 1]} : vector<4x256xf32> to vector<1x256xf32>
    %157 = vector.broadcast %155 : vector<4x1xf32> to vector<4x256xf32>
    %158 = vector.broadcast %156 : vector<1x256xf32> to vector<4x256xf32>
    %159 = arith.mulf %157, %158 : vector<4x256xf32>
    %160 = arith.addf %154, %159 : vector<4x256xf32>
    %c0_47 = arith.constant 0 : index
    %c31 = arith.constant 31 : index
    %161 = vector.load %arg3[%c0_47, %c31] : memref<4x36xf32, #tpu.memory_space<vmem>>, vector<4x1xf32>
    %162 = vector.extract_strided_slice %111 {offsets = [3, 0], sizes = [1, 256], strides = [1, 1]} : vector<4x256xf32> to vector<1x256xf32>
    %163 = vector.broadcast %161 : vector<4x1xf32> to vector<4x256xf32>
    %164 = vector.broadcast %162 : vector<1x256xf32> to vector<4x256xf32>
    %165 = arith.mulf %163, %164 : vector<4x256xf32>
    %166 = arith.addf %160, %165 : vector<4x256xf32>
    %c0_48 = arith.constant 0 : index
    %c5 = arith.constant 5 : index
    %167 = vector.load %arg3[%c0_48, %c5] : memref<4x36xf32, #tpu.memory_space<vmem>>, vector<4x1xf32>
    %168 = vector.extract_strided_slice %118 {offsets = [0, 0], sizes = [1, 256], strides = [1, 1]} : vector<4x256xf32> to vector<1x256xf32>
    %169 = vector.broadcast %167 : vector<4x1xf32> to vector<4x256xf32>
    %170 = vector.broadcast %168 : vector<1x256xf32> to vector<4x256xf32>
    %171 = arith.mulf %169, %170 : vector<4x256xf32>
    %172 = arith.addf %166, %171 : vector<4x256xf32>
    %c0_49 = arith.constant 0 : index
    %c14 = arith.constant 14 : index
    %173 = vector.load %arg3[%c0_49, %c14] : memref<4x36xf32, #tpu.memory_space<vmem>>, vector<4x1xf32>
    %174 = vector.extract_strided_slice %118 {offsets = [1, 0], sizes = [1, 256], strides = [1, 1]} : vector<4x256xf32> to vector<1x256xf32>
    %175 = vector.broadcast %173 : vector<4x1xf32> to vector<4x256xf32>
    %176 = vector.broadcast %174 : vector<1x256xf32> to vector<4x256xf32>
    %177 = arith.mulf %175, %176 : vector<4x256xf32>
    %178 = arith.addf %172, %177 : vector<4x256xf32>
    %c0_50 = arith.constant 0 : index
    %c23 = arith.constant 23 : index
    %179 = vector.load %arg3[%c0_50, %c23] : memref<4x36xf32, #tpu.memory_space<vmem>>, vector<4x1xf32>
    %180 = vector.extract_strided_slice %118 {offsets = [2, 0], sizes = [1, 256], strides = [1, 1]} : vector<4x256xf32> to vector<1x256xf32>
    %181 = vector.broadcast %179 : vector<4x1xf32> to vector<4x256xf32>
    %182 = vector.broadcast %180 : vector<1x256xf32> to vector<4x256xf32>
    %183 = arith.mulf %181, %182 : vector<4x256xf32>
    %184 = arith.addf %178, %183 : vector<4x256xf32>
    %c0_51 = arith.constant 0 : index
    %c32_52 = arith.constant 32 : index
    %185 = vector.load %arg3[%c0_51, %c32_52] : memref<4x36xf32, #tpu.memory_space<vmem>>, vector<4x1xf32>
    %186 = vector.extract_strided_slice %118 {offsets = [3, 0], sizes = [1, 256], strides = [1, 1]} : vector<4x256xf32> to vector<1x256xf32>
    %187 = vector.broadcast %185 : vector<4x1xf32> to vector<4x256xf32>
    %188 = vector.broadcast %186 : vector<1x256xf32> to vector<4x256xf32>
    %189 = arith.mulf %187, %188 : vector<4x256xf32>
    %190 = arith.addf %184, %189 : vector<4x256xf32>
    %c0_53 = arith.constant 0 : index
    %c0_54 = arith.constant 0 : index
    %191 = vector.load %arg8[%c0_53, %c0_54] : memref<4x290xf32, #tpu.memory_space<vmem>>, vector<4x256xf32>
    %c0_55 = arith.constant 0 : index
    %c32_56 = arith.constant 32 : index
    %192 = vector.load %arg8[%c0_55, %c32_56] : memref<4x290xf32, #tpu.memory_space<vmem>>, vector<4x256xf32>
    %193 = vector.shape_cast %7 : vector<1x256xi1> to vector<1x256xi1>
    %194 = vector.broadcast %193 : vector<1x256xi1> to vector<4x256xi1>
    %195 = arith.select %194, %191, %192 : vector<4x256xi1>, vector<4x256xf32>
    %c0_57 = arith.constant 0 : index
    %c1_58 = arith.constant 1 : index
    %196 = vector.load %arg8[%c0_57, %c1_58] : memref<4x290xf32, #tpu.memory_space<vmem>>, vector<4x256xf32>
    %c0_59 = arith.constant 0 : index
    %c33_60 = arith.constant 33 : index
    %197 = vector.load %arg8[%c0_59, %c33_60] : memref<4x290xf32, #tpu.memory_space<vmem>>, vector<4x256xf32>
    %198 = vector.shape_cast %7 : vector<1x256xi1> to vector<1x256xi1>
    %199 = vector.broadcast %198 : vector<1x256xi1> to vector<4x256xi1>
    %200 = arith.select %199, %196, %197 : vector<4x256xi1>, vector<4x256xf32>
    %c0_61 = arith.constant 0 : index
    %c2_62 = arith.constant 2 : index
    %201 = vector.load %arg8[%c0_61, %c2_62] : memref<4x290xf32, #tpu.memory_space<vmem>>, vector<4x256xf32>
    %c0_63 = arith.constant 0 : index
    %c34_64 = arith.constant 34 : index
    %202 = vector.load %arg8[%c0_63, %c34_64] : memref<4x290xf32, #tpu.memory_space<vmem>>, vector<4x256xf32>
    %203 = vector.shape_cast %7 : vector<1x256xi1> to vector<1x256xi1>
    %204 = vector.broadcast %203 : vector<1x256xi1> to vector<4x256xi1>
    %205 = arith.select %204, %201, %202 : vector<4x256xi1>, vector<4x256xf32>
    %206 = vector.shape_cast %9 : vector<1x256xi1> to vector<1x256xi1>
    %207 = vector.broadcast %206 : vector<1x256xi1> to vector<4x256xi1>
    %208 = arith.select %207, %205, %195 : vector<4x256xi1>, vector<4x256xf32>
    %209 = vector.shape_cast %11 : vector<1x256xi1> to vector<1x256xi1>
    %210 = vector.broadcast %209 : vector<1x256xi1> to vector<4x256xi1>
    %211 = arith.select %210, %195, %205 : vector<4x256xi1>, vector<4x256xf32>
    %c0_65 = arith.constant 0 : index
    %c6 = arith.constant 6 : index
    %212 = vector.load %arg3[%c0_65, %c6] : memref<4x36xf32, #tpu.memory_space<vmem>>, vector<4x1xf32>
    %213 = vector.extract_strided_slice %208 {offsets = [0, 0], sizes = [1, 256], strides = [1, 1]} : vector<4x256xf32> to vector<1x256xf32>
    %214 = vector.broadcast %212 : vector<4x1xf32> to vector<4x256xf32>
    %215 = vector.broadcast %213 : vector<1x256xf32> to vector<4x256xf32>
    %216 = arith.mulf %214, %215 : vector<4x256xf32>
    %217 = arith.addf %190, %216 : vector<4x256xf32>
    %c0_66 = arith.constant 0 : index
    %c15 = arith.constant 15 : index
    %218 = vector.load %arg3[%c0_66, %c15] : memref<4x36xf32, #tpu.memory_space<vmem>>, vector<4x1xf32>
    %219 = vector.extract_strided_slice %208 {offsets = [1, 0], sizes = [1, 256], strides = [1, 1]} : vector<4x256xf32> to vector<1x256xf32>
    %220 = vector.broadcast %218 : vector<4x1xf32> to vector<4x256xf32>
    %221 = vector.broadcast %219 : vector<1x256xf32> to vector<4x256xf32>
    %222 = arith.mulf %220, %221 : vector<4x256xf32>
    %223 = arith.addf %217, %222 : vector<4x256xf32>
    %c0_67 = arith.constant 0 : index
    %c24 = arith.constant 24 : index
    %224 = vector.load %arg3[%c0_67, %c24] : memref<4x36xf32, #tpu.memory_space<vmem>>, vector<4x1xf32>
    %225 = vector.extract_strided_slice %208 {offsets = [2, 0], sizes = [1, 256], strides = [1, 1]} : vector<4x256xf32> to vector<1x256xf32>
    %226 = vector.broadcast %224 : vector<4x1xf32> to vector<4x256xf32>
    %227 = vector.broadcast %225 : vector<1x256xf32> to vector<4x256xf32>
    %228 = arith.mulf %226, %227 : vector<4x256xf32>
    %229 = arith.addf %223, %228 : vector<4x256xf32>
    %c0_68 = arith.constant 0 : index
    %c33_69 = arith.constant 33 : index
    %230 = vector.load %arg3[%c0_68, %c33_69] : memref<4x36xf32, #tpu.memory_space<vmem>>, vector<4x1xf32>
    %231 = vector.extract_strided_slice %208 {offsets = [3, 0], sizes = [1, 256], strides = [1, 1]} : vector<4x256xf32> to vector<1x256xf32>
    %232 = vector.broadcast %230 : vector<4x1xf32> to vector<4x256xf32>
    %233 = vector.broadcast %231 : vector<1x256xf32> to vector<4x256xf32>
    %234 = arith.mulf %232, %233 : vector<4x256xf32>
    %235 = arith.addf %229, %234 : vector<4x256xf32>
    %c0_70 = arith.constant 0 : index
    %c7 = arith.constant 7 : index
    %236 = vector.load %arg3[%c0_70, %c7] : memref<4x36xf32, #tpu.memory_space<vmem>>, vector<4x1xf32>
    %237 = vector.extract_strided_slice %200 {offsets = [0, 0], sizes = [1, 256], strides = [1, 1]} : vector<4x256xf32> to vector<1x256xf32>
    %238 = vector.broadcast %236 : vector<4x1xf32> to vector<4x256xf32>
    %239 = vector.broadcast %237 : vector<1x256xf32> to vector<4x256xf32>
    %240 = arith.mulf %238, %239 : vector<4x256xf32>
    %241 = arith.addf %235, %240 : vector<4x256xf32>
    %c0_71 = arith.constant 0 : index
    %c16_72 = arith.constant 16 : index
    %242 = vector.load %arg3[%c0_71, %c16_72] : memref<4x36xf32, #tpu.memory_space<vmem>>, vector<4x1xf32>
    %243 = vector.extract_strided_slice %200 {offsets = [1, 0], sizes = [1, 256], strides = [1, 1]} : vector<4x256xf32> to vector<1x256xf32>
    %244 = vector.broadcast %242 : vector<4x1xf32> to vector<4x256xf32>
    %245 = vector.broadcast %243 : vector<1x256xf32> to vector<4x256xf32>
    %246 = arith.mulf %244, %245 : vector<4x256xf32>
    %247 = arith.addf %241, %246 : vector<4x256xf32>
    %c0_73 = arith.constant 0 : index
    %c25 = arith.constant 25 : index
    %248 = vector.load %arg3[%c0_73, %c25] : memref<4x36xf32, #tpu.memory_space<vmem>>, vector<4x1xf32>
    %249 = vector.extract_strided_slice %200 {offsets = [2, 0], sizes = [1, 256], strides = [1, 1]} : vector<4x256xf32> to vector<1x256xf32>
    %250 = vector.broadcast %248 : vector<4x1xf32> to vector<4x256xf32>
    %251 = vector.broadcast %249 : vector<1x256xf32> to vector<4x256xf32>
    %252 = arith.mulf %250, %251 : vector<4x256xf32>
    %253 = arith.addf %247, %252 : vector<4x256xf32>
    %c0_74 = arith.constant 0 : index
    %c34_75 = arith.constant 34 : index
    %254 = vector.load %arg3[%c0_74, %c34_75] : memref<4x36xf32, #tpu.memory_space<vmem>>, vector<4x1xf32>
    %255 = vector.extract_strided_slice %200 {offsets = [3, 0], sizes = [1, 256], strides = [1, 1]} : vector<4x256xf32> to vector<1x256xf32>
    %256 = vector.broadcast %254 : vector<4x1xf32> to vector<4x256xf32>
    %257 = vector.broadcast %255 : vector<1x256xf32> to vector<4x256xf32>
    %258 = arith.mulf %256, %257 : vector<4x256xf32>
    %259 = arith.addf %253, %258 : vector<4x256xf32>
    %c0_76 = arith.constant 0 : index
    %c8 = arith.constant 8 : index
    %260 = vector.load %arg3[%c0_76, %c8] : memref<4x36xf32, #tpu.memory_space<vmem>>, vector<4x1xf32>
    %261 = vector.extract_strided_slice %211 {offsets = [0, 0], sizes = [1, 256], strides = [1, 1]} : vector<4x256xf32> to vector<1x256xf32>
    %262 = vector.broadcast %260 : vector<4x1xf32> to vector<4x256xf32>
    %263 = vector.broadcast %261 : vector<1x256xf32> to vector<4x256xf32>
    %264 = arith.mulf %262, %263 : vector<4x256xf32>
    %265 = arith.addf %259, %264 : vector<4x256xf32>
    %c0_77 = arith.constant 0 : index
    %c17_78 = arith.constant 17 : index
    %266 = vector.load %arg3[%c0_77, %c17_78] : memref<4x36xf32, #tpu.memory_space<vmem>>, vector<4x1xf32>
    %267 = vector.extract_strided_slice %211 {offsets = [1, 0], sizes = [1, 256], strides = [1, 1]} : vector<4x256xf32> to vector<1x256xf32>
    %268 = vector.broadcast %266 : vector<4x1xf32> to vector<4x256xf32>
    %269 = vector.broadcast %267 : vector<1x256xf32> to vector<4x256xf32>
    %270 = arith.mulf %268, %269 : vector<4x256xf32>
    %271 = arith.addf %265, %270 : vector<4x256xf32>
    %c0_79 = arith.constant 0 : index
    %c26 = arith.constant 26 : index
    %272 = vector.load %arg3[%c0_79, %c26] : memref<4x36xf32, #tpu.memory_space<vmem>>, vector<4x1xf32>
    %273 = vector.extract_strided_slice %211 {offsets = [2, 0], sizes = [1, 256], strides = [1, 1]} : vector<4x256xf32> to vector<1x256xf32>
    %274 = vector.broadcast %272 : vector<4x1xf32> to vector<4x256xf32>
    %275 = vector.broadcast %273 : vector<1x256xf32> to vector<4x256xf32>
    %276 = arith.mulf %274, %275 : vector<4x256xf32>
    %277 = arith.addf %271, %276 : vector<4x256xf32>
    %c0_80 = arith.constant 0 : index
    %c35 = arith.constant 35 : index
    %278 = vector.load %arg3[%c0_80, %c35] : memref<4x36xf32, #tpu.memory_space<vmem>>, vector<4x1xf32>
    %279 = vector.extract_strided_slice %211 {offsets = [3, 0], sizes = [1, 256], strides = [1, 1]} : vector<4x256xf32> to vector<1x256xf32>
    %280 = vector.broadcast %278 : vector<4x1xf32> to vector<4x256xf32>
    %281 = vector.broadcast %279 : vector<1x256xf32> to vector<4x256xf32>
    %282 = arith.mulf %280, %281 : vector<4x256xf32>
    %283 = arith.addf %277, %282 : vector<4x256xf32>
    %c0_81 = arith.constant 0 : index
    %c0_82 = arith.constant 0 : index
    %284 = vector.load %arg4[%c0_81, %c0_82] : memref<4x1xf32, #tpu.memory_space<vmem>>, vector<4x1xf32>
    %285 = vector.broadcast %284 : vector<4x1xf32> to vector<4x256xf32>
    %286 = arith.addf %283, %285 : vector<4x256xf32>
    %cst_83 = arith.constant dense<0.000000e+00> : vector<4xf32>
    %287 = vector.multi_reduction <add>, %286, %cst_83 [1] : vector<4x256xf32> to vector<4xf32>
    %288 = vector.shape_cast %287 : vector<4xf32> to vector<4x1xf32>
    %cst_84 = arith.constant 3.906250e-03 : f32
    %289 = vector.broadcast %cst_84 : f32 to vector<4x1xf32>
    %290 = arith.mulf %288, %289 : vector<4x1xf32>
    %291 = arith.mulf %286, %286 : vector<4x256xf32>
    %cst_85 = arith.constant dense<0.000000e+00> : vector<4xf32>
    %292 = vector.multi_reduction <add>, %291, %cst_85 [1] : vector<4x256xf32> to vector<4xf32>
    %293 = vector.shape_cast %292 : vector<4xf32> to vector<4x1xf32>
    %cst_86 = arith.constant 3.906250e-03 : f32
    %294 = vector.broadcast %cst_86 : f32 to vector<4x1xf32>
    %295 = arith.mulf %293, %294 : vector<4x1xf32>
    %296 = arith.mulf %290, %290 : vector<4x1xf32>
    %297 = arith.subf %295, %296 : vector<4x1xf32>
    %298 = vector.broadcast %290 : vector<4x1xf32> to vector<4x256xf32>
    %299 = arith.subf %286, %298 : vector<4x256xf32>
    %cst_87 = arith.constant 9.99999974E-6 : f32
    %300 = vector.broadcast %cst_87 : f32 to vector<4x1xf32>
    %301 = arith.addf %297, %300 : vector<4x1xf32>
    %302 = math.rsqrt %301 : vector<4x1xf32>
    %303 = vector.broadcast %302 : vector<4x1xf32> to vector<4x256xf32>
    %304 = arith.mulf %299, %303 : vector<4x256xf32>
    %cst_88 = arith.constant 0.000000e+00 : f32
    %305 = vector.broadcast %cst_88 : f32 to vector<4x256xf32>
    %306 = arith.maximumf %304, %305 : vector<4x256xf32>
    %c0_89 = arith.constant 0 : index
    %c17_90 = arith.constant 17 : index
    %307 = vector.load %arg8[%c0_89, %c17_90] : memref<4x290xf32, #tpu.memory_space<vmem>>, vector<4x256xf32>
    tpu.vector_store %arg8[%c0_89, %c17_90], %306 {strides = array<i32>} : memref<4x290xf32, #tpu.memory_space<vmem>>, vector<4x256xf32>,
    %cst_91 = arith.constant 0.000000e+00 : f32
    %308 = vector.broadcast %cst_91 : f32 to vector<4x256xf32>
    %c0_92 = arith.constant 0 : index
    %c32_93 = arith.constant 32 : index
    %309 = vector.load %arg8[%c0_92, %c32_93] : memref<4x290xf32, #tpu.memory_space<vmem>>, vector<4x256xf32>
    %c0_94 = arith.constant 0 : index
    %c0_95 = arith.constant 0 : index
    %310 = vector.load %arg8[%c0_94, %c0_95] : memref<4x290xf32, #tpu.memory_space<vmem>>, vector<4x256xf32>
    %311 = vector.shape_cast %5 : vector<1x256xi1> to vector<1x256xi1>
    %312 = vector.broadcast %311 : vector<1x256xi1> to vector<4x256xi1>
    %313 = arith.select %312, %309, %310 : vector<4x256xi1>, vector<4x256xf32>
    %c0_96 = arith.constant 0 : index
    %c33_97 = arith.constant 33 : index
    %314 = vector.load %arg8[%c0_96, %c33_97] : memref<4x290xf32, #tpu.memory_space<vmem>>, vector<4x256xf32>
    %c0_98 = arith.constant 0 : index
    %c1_99 = arith.constant 1 : index
    %315 = vector.load %arg8[%c0_98, %c1_99] : memref<4x290xf32, #tpu.memory_space<vmem>>, vector<4x256xf32>
    %316 = vector.shape_cast %5 : vector<1x256xi1> to vector<1x256xi1>
    %317 = vector.broadcast %316 : vector<1x256xi1> to vector<4x256xi1>
    %318 = arith.select %317, %314, %315 : vector<4x256xi1>, vector<4x256xf32>
    %c0_100 = arith.constant 0 : index
    %c34_101 = arith.constant 34 : index
    %319 = vector.load %arg8[%c0_100, %c34_101] : memref<4x290xf32, #tpu.memory_space<vmem>>, vector<4x256xf32>
    %c0_102 = arith.constant 0 : index
    %c2_103 = arith.constant 2 : index
    %320 = vector.load %arg8[%c0_102, %c2_103] : memref<4x290xf32, #tpu.memory_space<vmem>>, vector<4x256xf32>
    %321 = vector.shape_cast %5 : vector<1x256xi1> to vector<1x256xi1>
    %322 = vector.broadcast %321 : vector<1x256xi1> to vector<4x256xi1>
    %323 = arith.select %322, %319, %320 : vector<4x256xi1>, vector<4x256xf32>
    %324 = vector.shape_cast %9 : vector<1x256xi1> to vector<1x256xi1>
    %325 = vector.broadcast %324 : vector<1x256xi1> to vector<4x256xi1>
    %326 = arith.select %325, %323, %313 : vector<4x256xi1>, vector<4x256xf32>
    %327 = vector.shape_cast %11 : vector<1x256xi1> to vector<1x256xi1>
    %328 = vector.broadcast %327 : vector<1x256xi1> to vector<4x256xi1>
    %329 = arith.select %328, %313, %323 : vector<4x256xi1>, vector<4x256xf32>
    %c0_104 = arith.constant 0 : index
    %c0_105 = arith.constant 0 : index
    %330 = vector.load %arg5[%c0_104, %c0_105] : memref<4x36xf32, #tpu.memory_space<vmem>>, vector<4x1xf32>
    %331 = vector.extract_strided_slice %326 {offsets = [0, 0], sizes = [1, 256], strides = [1, 1]} : vector<4x256xf32> to vector<1x256xf32>
    %332 = vector.broadcast %330 : vector<4x1xf32> to vector<4x256xf32>
    %333 = vector.broadcast %331 : vector<1x256xf32> to vector<4x256xf32>
    %334 = arith.mulf %332, %333 : vector<4x256xf32>
    %335 = arith.addf %308, %334 : vector<4x256xf32>
    %c0_106 = arith.constant 0 : index
    %c9_107 = arith.constant 9 : index
    %336 = vector.load %arg5[%c0_106, %c9_107] : memref<4x36xf32, #tpu.memory_space<vmem>>, vector<4x1xf32>
    %337 = vector.extract_strided_slice %326 {offsets = [1, 0], sizes = [1, 256], strides = [1, 1]} : vector<4x256xf32> to vector<1x256xf32>
    %338 = vector.broadcast %336 : vector<4x1xf32> to vector<4x256xf32>
    %339 = vector.broadcast %337 : vector<1x256xf32> to vector<4x256xf32>
    %340 = arith.mulf %338, %339 : vector<4x256xf32>
    %341 = arith.addf %335, %340 : vector<4x256xf32>
    %c0_108 = arith.constant 0 : index
    %c18_109 = arith.constant 18 : index
    %342 = vector.load %arg5[%c0_108, %c18_109] : memref<4x36xf32, #tpu.memory_space<vmem>>, vector<4x1xf32>
    %343 = vector.extract_strided_slice %326 {offsets = [2, 0], sizes = [1, 256], strides = [1, 1]} : vector<4x256xf32> to vector<1x256xf32>
    %344 = vector.broadcast %342 : vector<4x1xf32> to vector<4x256xf32>
    %345 = vector.broadcast %343 : vector<1x256xf32> to vector<4x256xf32>
    %346 = arith.mulf %344, %345 : vector<4x256xf32>
    %347 = arith.addf %341, %346 : vector<4x256xf32>
    %c0_110 = arith.constant 0 : index
    %c27_111 = arith.constant 27 : index
    %348 = vector.load %arg5[%c0_110, %c27_111] : memref<4x36xf32, #tpu.memory_space<vmem>>, vector<4x1xf32>
    %349 = vector.extract_strided_slice %326 {offsets = [3, 0], sizes = [1, 256], strides = [1, 1]} : vector<4x256xf32> to vector<1x256xf32>
    %350 = vector.broadcast %348 : vector<4x1xf32> to vector<4x256xf32>
    %351 = vector.broadcast %349 : vector<1x256xf32> to vector<4x256xf32>
    %352 = arith.mulf %350, %351 : vector<4x256xf32>
    %353 = arith.addf %347, %352 : vector<4x256xf32>
    %c0_112 = arith.constant 0 : index
    %c1_113 = arith.constant 1 : index
    %354 = vector.load %arg5[%c0_112, %c1_113] : memref<4x36xf32, #tpu.memory_space<vmem>>, vector<4x1xf32>
    %355 = vector.extract_strided_slice %318 {offsets = [0, 0], sizes = [1, 256], strides = [1, 1]} : vector<4x256xf32> to vector<1x256xf32>
    %356 = vector.broadcast %354 : vector<4x1xf32> to vector<4x256xf32>
    %357 = vector.broadcast %355 : vector<1x256xf32> to vector<4x256xf32>
    %358 = arith.mulf %356, %357 : vector<4x256xf32>
    %359 = arith.addf %353, %358 : vector<4x256xf32>
    %c0_114 = arith.constant 0 : index
    %c10_115 = arith.constant 10 : index
    %360 = vector.load %arg5[%c0_114, %c10_115] : memref<4x36xf32, #tpu.memory_space<vmem>>, vector<4x1xf32>
    %361 = vector.extract_strided_slice %318 {offsets = [1, 0], sizes = [1, 256], strides = [1, 1]} : vector<4x256xf32> to vector<1x256xf32>
    %362 = vector.broadcast %360 : vector<4x1xf32> to vector<4x256xf32>
    %363 = vector.broadcast %361 : vector<1x256xf32> to vector<4x256xf32>
    %364 = arith.mulf %362, %363 : vector<4x256xf32>
    %365 = arith.addf %359, %364 : vector<4x256xf32>
    %c0_116 = arith.constant 0 : index
    %c19_117 = arith.constant 19 : index
    %366 = vector.load %arg5[%c0_116, %c19_117] : memref<4x36xf32, #tpu.memory_space<vmem>>, vector<4x1xf32>
    %367 = vector.extract_strided_slice %318 {offsets = [2, 0], sizes = [1, 256], strides = [1, 1]} : vector<4x256xf32> to vector<1x256xf32>
    %368 = vector.broadcast %366 : vector<4x1xf32> to vector<4x256xf32>
    %369 = vector.broadcast %367 : vector<1x256xf32> to vector<4x256xf32>
    %370 = arith.mulf %368, %369 : vector<4x256xf32>
    %371 = arith.addf %365, %370 : vector<4x256xf32>
    %c0_118 = arith.constant 0 : index
    %c28_119 = arith.constant 28 : index
    %372 = vector.load %arg5[%c0_118, %c28_119] : memref<4x36xf32, #tpu.memory_space<vmem>>, vector<4x1xf32>
    %373 = vector.extract_strided_slice %318 {offsets = [3, 0], sizes = [1, 256], strides = [1, 1]} : vector<4x256xf32> to vector<1x256xf32>
    %374 = vector.broadcast %372 : vector<4x1xf32> to vector<4x256xf32>
    %375 = vector.broadcast %373 : vector<1x256xf32> to vector<4x256xf32>
    %376 = arith.mulf %374, %375 : vector<4x256xf32>
    %377 = arith.addf %371, %376 : vector<4x256xf32>
    %c0_120 = arith.constant 0 : index
    %c2_121 = arith.constant 2 : index
    %378 = vector.load %arg5[%c0_120, %c2_121] : memref<4x36xf32, #tpu.memory_space<vmem>>, vector<4x1xf32>
    %379 = vector.extract_strided_slice %329 {offsets = [0, 0], sizes = [1, 256], strides = [1, 1]} : vector<4x256xf32> to vector<1x256xf32>
    %380 = vector.broadcast %378 : vector<4x1xf32> to vector<4x256xf32>
    %381 = vector.broadcast %379 : vector<1x256xf32> to vector<4x256xf32>
    %382 = arith.mulf %380, %381 : vector<4x256xf32>
    %383 = arith.addf %377, %382 : vector<4x256xf32>
    %c0_122 = arith.constant 0 : index
    %c11_123 = arith.constant 11 : index
    %384 = vector.load %arg5[%c0_122, %c11_123] : memref<4x36xf32, #tpu.memory_space<vmem>>, vector<4x1xf32>
    %385 = vector.extract_strided_slice %329 {offsets = [1, 0], sizes = [1, 256], strides = [1, 1]} : vector<4x256xf32> to vector<1x256xf32>
    %386 = vector.broadcast %384 : vector<4x1xf32> to vector<4x256xf32>
    %387 = vector.broadcast %385 : vector<1x256xf32> to vector<4x256xf32>
    %388 = arith.mulf %386, %387 : vector<4x256xf32>
    %389 = arith.addf %383, %388 : vector<4x256xf32>
    %c0_124 = arith.constant 0 : index
    %c20_125 = arith.constant 20 : index
    %390 = vector.load %arg5[%c0_124, %c20_125] : memref<4x36xf32, #tpu.memory_space<vmem>>, vector<4x1xf32>
    %391 = vector.extract_strided_slice %329 {offsets = [2, 0], sizes = [1, 256], strides = [1, 1]} : vector<4x256xf32> to vector<1x256xf32>
    %392 = vector.broadcast %390 : vector<4x1xf32> to vector<4x256xf32>
    %393 = vector.broadcast %391 : vector<1x256xf32> to vector<4x256xf32>
    %394 = arith.mulf %392, %393 : vector<4x256xf32>
    %395 = arith.addf %389, %394 : vector<4x256xf32>
    %c0_126 = arith.constant 0 : index
    %c29_127 = arith.constant 29 : index
    %396 = vector.load %arg5[%c0_126, %c29_127] : memref<4x36xf32, #tpu.memory_space<vmem>>, vector<4x1xf32>
    %397 = vector.extract_strided_slice %329 {offsets = [3, 0], sizes = [1, 256], strides = [1, 1]} : vector<4x256xf32> to vector<1x256xf32>
    %398 = vector.broadcast %396 : vector<4x1xf32> to vector<4x256xf32>
    %399 = vector.broadcast %397 : vector<1x256xf32> to vector<4x256xf32>
    %400 = arith.mulf %398, %399 : vector<4x256xf32>
    %401 = arith.addf %395, %400 : vector<4x256xf32>
    %c0_128 = arith.constant 0 : index
    %c16_129 = arith.constant 16 : index
    %402 = vector.load %arg8[%c0_128, %c16_129] : memref<4x290xf32, #tpu.memory_space<vmem>>, vector<4x256xf32>
    %c0_130 = arith.constant 0 : index
    %c17_131 = arith.constant 17 : index
    %403 = vector.load %arg8[%c0_130, %c17_131] : memref<4x290xf32, #tpu.memory_space<vmem>>, vector<4x256xf32>
    %c0_132 = arith.constant 0 : index
    %c18_133 = arith.constant 18 : index
    %404 = vector.load %arg8[%c0_132, %c18_133] : memref<4x290xf32, #tpu.memory_space<vmem>>, vector<4x256xf32>
    %405 = vector.shape_cast %9 : vector<1x256xi1> to vector<1x256xi1>
    %406 = vector.broadcast %405 : vector<1x256xi1> to vector<4x256xi1>
    %407 = arith.select %406, %404, %402 : vector<4x256xi1>, vector<4x256xf32>
    %408 = vector.shape_cast %11 : vector<1x256xi1> to vector<1x256xi1>
    %409 = vector.broadcast %408 : vector<1x256xi1> to vector<4x256xi1>
    %410 = arith.select %409, %402, %404 : vector<4x256xi1>, vector<4x256xf32>
    %c0_134 = arith.constant 0 : index
    %c3_135 = arith.constant 3 : index
    %411 = vector.load %arg5[%c0_134, %c3_135] : memref<4x36xf32, #tpu.memory_space<vmem>>, vector<4x1xf32>
    %412 = vector.extract_strided_slice %407 {offsets = [0, 0], sizes = [1, 256], strides = [1, 1]} : vector<4x256xf32> to vector<1x256xf32>
    %413 = vector.broadcast %411 : vector<4x1xf32> to vector<4x256xf32>
    %414 = vector.broadcast %412 : vector<1x256xf32> to vector<4x256xf32>
    %415 = arith.mulf %413, %414 : vector<4x256xf32>
    %416 = arith.addf %401, %415 : vector<4x256xf32>
    %c0_136 = arith.constant 0 : index
    %c12_137 = arith.constant 12 : index
    %417 = vector.load %arg5[%c0_136, %c12_137] : memref<4x36xf32, #tpu.memory_space<vmem>>, vector<4x1xf32>
    %418 = vector.extract_strided_slice %407 {offsets = [1, 0], sizes = [1, 256], strides = [1, 1]} : vector<4x256xf32> to vector<1x256xf32>
    %419 = vector.broadcast %417 : vector<4x1xf32> to vector<4x256xf32>
    %420 = vector.broadcast %418 : vector<1x256xf32> to vector<4x256xf32>
    %421 = arith.mulf %419, %420 : vector<4x256xf32>
    %422 = arith.addf %416, %421 : vector<4x256xf32>
    %c0_138 = arith.constant 0 : index
    %c21_139 = arith.constant 21 : index
    %423 = vector.load %arg5[%c0_138, %c21_139] : memref<4x36xf32, #tpu.memory_space<vmem>>, vector<4x1xf32>
    %424 = vector.extract_strided_slice %407 {offsets = [2, 0], sizes = [1, 256], strides = [1, 1]} : vector<4x256xf32> to vector<1x256xf32>
    %425 = vector.broadcast %423 : vector<4x1xf32> to vector<4x256xf32>
    %426 = vector.broadcast %424 : vector<1x256xf32> to vector<4x256xf32>
    %427 = arith.mulf %425, %426 : vector<4x256xf32>
    %428 = arith.addf %422, %427 : vector<4x256xf32>
    %c0_140 = arith.constant 0 : index
    %c30_141 = arith.constant 30 : index
    %429 = vector.load %arg5[%c0_140, %c30_141] : memref<4x36xf32, #tpu.memory_space<vmem>>, vector<4x1xf32>
    %430 = vector.extract_strided_slice %407 {offsets = [3, 0], sizes = [1, 256], strides = [1, 1]} : vector<4x256xf32> to vector<1x256xf32>
    %431 = vector.broadcast %429 : vector<4x1xf32> to vector<4x256xf32>
    %432 = vector.broadcast %430 : vector<1x256xf32> to vector<4x256xf32>
    %433 = arith.mulf %431, %432 : vector<4x256xf32>
    %434 = arith.addf %428, %433 : vector<4x256xf32>
    %c0_142 = arith.constant 0 : index
    %c4_143 = arith.constant 4 : index
    %435 = vector.load %arg5[%c0_142, %c4_143] : memref<4x36xf32, #tpu.memory_space<vmem>>, vector<4x1xf32>
    %436 = vector.extract_strided_slice %403 {offsets = [0, 0], sizes = [1, 256], strides = [1, 1]} : vector<4x256xf32> to vector<1x256xf32>
    %437 = vector.broadcast %435 : vector<4x1xf32> to vector<4x256xf32>
    %438 = vector.broadcast %436 : vector<1x256xf32> to vector<4x256xf32>
    %439 = arith.mulf %437, %438 : vector<4x256xf32>
    %440 = arith.addf %434, %439 : vector<4x256xf32>
    %c0_144 = arith.constant 0 : index
    %c13_145 = arith.constant 13 : index
    %441 = vector.load %arg5[%c0_144, %c13_145] : memref<4x36xf32, #tpu.memory_space<vmem>>, vector<4x1xf32>
    %442 = vector.extract_strided_slice %403 {offsets = [1, 0], sizes = [1, 256], strides = [1, 1]} : vector<4x256xf32> to vector<1x256xf32>
    %443 = vector.broadcast %441 : vector<4x1xf32> to vector<4x256xf32>
    %444 = vector.broadcast %442 : vector<1x256xf32> to vector<4x256xf32>
    %445 = arith.mulf %443, %444 : vector<4x256xf32>
    %446 = arith.addf %440, %445 : vector<4x256xf32>
    %c0_146 = arith.constant 0 : index
    %c22_147 = arith.constant 22 : index
    %447 = vector.load %arg5[%c0_146, %c22_147] : memref<4x36xf32, #tpu.memory_space<vmem>>, vector<4x1xf32>
    %448 = vector.extract_strided_slice %403 {offsets = [2, 0], sizes = [1, 256], strides = [1, 1]} : vector<4x256xf32> to vector<1x256xf32>
    %449 = vector.broadcast %447 : vector<4x1xf32> to vector<4x256xf32>
    %450 = vector.broadcast %448 : vector<1x256xf32> to vector<4x256xf32>
    %451 = arith.mulf %449, %450 : vector<4x256xf32>
    %452 = arith.addf %446, %451 : vector<4x256xf32>
    %c0_148 = arith.constant 0 : index
    %c31_149 = arith.constant 31 : index
    %453 = vector.load %arg5[%c0_148, %c31_149] : memref<4x36xf32, #tpu.memory_space<vmem>>, vector<4x1xf32>
    %454 = vector.extract_strided_slice %403 {offsets = [3, 0], sizes = [1, 256], strides = [1, 1]} : vector<4x256xf32> to vector<1x256xf32>
    %455 = vector.broadcast %453 : vector<4x1xf32> to vector<4x256xf32>
    %456 = vector.broadcast %454 : vector<1x256xf32> to vector<4x256xf32>
    %457 = arith.mulf %455, %456 : vector<4x256xf32>
    %458 = arith.addf %452, %457 : vector<4x256xf32>
    %c0_150 = arith.constant 0 : index
    %c5_151 = arith.constant 5 : index
    %459 = vector.load %arg5[%c0_150, %c5_151] : memref<4x36xf32, #tpu.memory_space<vmem>>, vector<4x1xf32>
    %460 = vector.extract_strided_slice %410 {offsets = [0, 0], sizes = [1, 256], strides = [1, 1]} : vector<4x256xf32> to vector<1x256xf32>
    %461 = vector.broadcast %459 : vector<4x1xf32> to vector<4x256xf32>
    %462 = vector.broadcast %460 : vector<1x256xf32> to vector<4x256xf32>
    %463 = arith.mulf %461, %462 : vector<4x256xf32>
    %464 = arith.addf %458, %463 : vector<4x256xf32>
    %c0_152 = arith.constant 0 : index
    %c14_153 = arith.constant 14 : index
    %465 = vector.load %arg5[%c0_152, %c14_153] : memref<4x36xf32, #tpu.memory_space<vmem>>, vector<4x1xf32>
    %466 = vector.extract_strided_slice %410 {offsets = [1, 0], sizes = [1, 256], strides = [1, 1]} : vector<4x256xf32> to vector<1x256xf32>
    %467 = vector.broadcast %465 : vector<4x1xf32> to vector<4x256xf32>
    %468 = vector.broadcast %466 : vector<1x256xf32> to vector<4x256xf32>
    %469 = arith.mulf %467, %468 : vector<4x256xf32>
    %470 = arith.addf %464, %469 : vector<4x256xf32>
    %c0_154 = arith.constant 0 : index
    %c23_155 = arith.constant 23 : index
    %471 = vector.load %arg5[%c0_154, %c23_155] : memref<4x36xf32, #tpu.memory_space<vmem>>, vector<4x1xf32>
    %472 = vector.extract_strided_slice %410 {offsets = [2, 0], sizes = [1, 256], strides = [1, 1]} : vector<4x256xf32> to vector<1x256xf32>
    %473 = vector.broadcast %471 : vector<4x1xf32> to vector<4x256xf32>
    %474 = vector.broadcast %472 : vector<1x256xf32> to vector<4x256xf32>
    %475 = arith.mulf %473, %474 : vector<4x256xf32>
    %476 = arith.addf %470, %475 : vector<4x256xf32>
    %c0_156 = arith.constant 0 : index
    %c32_157 = arith.constant 32 : index
    %477 = vector.load %arg5[%c0_156, %c32_157] : memref<4x36xf32, #tpu.memory_space<vmem>>, vector<4x1xf32>
    %478 = vector.extract_strided_slice %410 {offsets = [3, 0], sizes = [1, 256], strides = [1, 1]} : vector<4x256xf32> to vector<1x256xf32>
    %479 = vector.broadcast %477 : vector<4x1xf32> to vector<4x256xf32>
    %480 = vector.broadcast %478 : vector<1x256xf32> to vector<4x256xf32>
    %481 = arith.mulf %479, %480 : vector<4x256xf32>
    %482 = arith.addf %476, %481 : vector<4x256xf32>
    %c0_158 = arith.constant 0 : index
    %c0_159 = arith.constant 0 : index
    %483 = vector.load %arg8[%c0_158, %c0_159] : memref<4x290xf32, #tpu.memory_space<vmem>>, vector<4x256xf32>
    %c0_160 = arith.constant 0 : index
    %c32_161 = arith.constant 32 : index
    %484 = vector.load %arg8[%c0_160, %c32_161] : memref<4x290xf32, #tpu.memory_space<vmem>>, vector<4x256xf32>
    %485 = vector.shape_cast %7 : vector<1x256xi1> to vector<1x256xi1>
    %486 = vector.broadcast %485 : vector<1x256xi1> to vector<4x256xi1>
    %487 = arith.select %486, %483, %484 : vector<4x256xi1>, vector<4x256xf32>
    %c0_162 = arith.constant 0 : index
    %c1_163 = arith.constant 1 : index
    %488 = vector.load %arg8[%c0_162, %c1_163] : memref<4x290xf32, #tpu.memory_space<vmem>>, vector<4x256xf32>
    %c0_164 = arith.constant 0 : index
    %c33_165 = arith.constant 33 : index
    %489 = vector.load %arg8[%c0_164, %c33_165] : memref<4x290xf32, #tpu.memory_space<vmem>>, vector<4x256xf32>
    %490 = vector.shape_cast %7 : vector<1x256xi1> to vector<1x256xi1>
    %491 = vector.broadcast %490 : vector<1x256xi1> to vector<4x256xi1>
    %492 = arith.select %491, %488, %489 : vector<4x256xi1>, vector<4x256xf32>
    %c0_166 = arith.constant 0 : index
    %c2_167 = arith.constant 2 : index
    %493 = vector.load %arg8[%c0_166, %c2_167] : memref<4x290xf32, #tpu.memory_space<vmem>>, vector<4x256xf32>
    %c0_168 = arith.constant 0 : index
    %c34_169 = arith.constant 34 : index
    %494 = vector.load %arg8[%c0_168, %c34_169] : memref<4x290xf32, #tpu.memory_space<vmem>>, vector<4x256xf32>
    %495 = vector.shape_cast %7 : vector<1x256xi1> to vector<1x256xi1>
    %496 = vector.broadcast %495 : vector<1x256xi1> to vector<4x256xi1>
    %497 = arith.select %496, %493, %494 : vector<4x256xi1>, vector<4x256xf32>
    %498 = vector.shape_cast %9 : vector<1x256xi1> to vector<1x256xi1>
    %499 = vector.broadcast %498 : vector<1x256xi1> to vector<4x256xi1>
    %500 = arith.select %499, %497, %487 : vector<4x256xi1>, vector<4x256xf32>
    %501 = vector.shape_cast %11 : vector<1x256xi1> to vector<1x256xi1>
    %502 = vector.broadcast %501 : vector<1x256xi1> to vector<4x256xi1>
    %503 = arith.select %502, %487, %497 : vector<4x256xi1>, vector<4x256xf32>
    %c0_170 = arith.constant 0 : index
    %c6_171 = arith.constant 6 : index
    %504 = vector.load %arg5[%c0_170, %c6_171] : memref<4x36xf32, #tpu.memory_space<vmem>>, vector<4x1xf32>
    %505 = vector.extract_strided_slice %500 {offsets = [0, 0], sizes = [1, 256], strides = [1, 1]} : vector<4x256xf32> to vector<1x256xf32>
    %506 = vector.broadcast %504 : vector<4x1xf32> to vector<4x256xf32>
    %507 = vector.broadcast %505 : vector<1x256xf32> to vector<4x256xf32>
    %508 = arith.mulf %506, %507 : vector<4x256xf32>
    %509 = arith.addf %482, %508 : vector<4x256xf32>
    %c0_172 = arith.constant 0 : index
    %c15_173 = arith.constant 15 : index
    %510 = vector.load %arg5[%c0_172, %c15_173] : memref<4x36xf32, #tpu.memory_space<vmem>>, vector<4x1xf32>
    %511 = vector.extract_strided_slice %500 {offsets = [1, 0], sizes = [1, 256], strides = [1, 1]} : vector<4x256xf32> to vector<1x256xf32>
    %512 = vector.broadcast %510 : vector<4x1xf32> to vector<4x256xf32>
    %513 = vector.broadcast %511 : vector<1x256xf32> to vector<4x256xf32>
    %514 = arith.mulf %512, %513 : vector<4x256xf32>
    %515 = arith.addf %509, %514 : vector<4x256xf32>
    %c0_174 = arith.constant 0 : index
    %c24_175 = arith.constant 24 : index
    %516 = vector.load %arg5[%c0_174, %c24_175] : memref<4x36xf32, #tpu.memory_space<vmem>>, vector<4x1xf32>
    %517 = vector.extract_strided_slice %500 {offsets = [2, 0], sizes = [1, 256], strides = [1, 1]} : vector<4x256xf32> to vector<1x256xf32>
    %518 = vector.broadcast %516 : vector<4x1xf32> to vector<4x256xf32>
    %519 = vector.broadcast %517 : vector<1x256xf32> to vector<4x256xf32>
    %520 = arith.mulf %518, %519 : vector<4x256xf32>
    %521 = arith.addf %515, %520 : vector<4x256xf32>
    %c0_176 = arith.constant 0 : index
    %c33_177 = arith.constant 33 : index
    %522 = vector.load %arg5[%c0_176, %c33_177] : memref<4x36xf32, #tpu.memory_space<vmem>>, vector<4x1xf32>
    %523 = vector.extract_strided_slice %500 {offsets = [3, 0], sizes = [1, 256], strides = [1, 1]} : vector<4x256xf32> to vector<1x256xf32>
    %524 = vector.broadcast %522 : vector<4x1xf32> to vector<4x256xf32>
    %525 = vector.broadcast %523 : vector<1x256xf32> to vector<4x256xf32>
    %526 = arith.mulf %524, %525 : vector<4x256xf32>
    %527 = arith.addf %521, %526 : vector<4x256xf32>
    %c0_178 = arith.constant 0 : index
    %c7_179 = arith.constant 7 : index
    %528 = vector.load %arg5[%c0_178, %c7_179] : memref<4x36xf32, #tpu.memory_space<vmem>>, vector<4x1xf32>
    %529 = vector.extract_strided_slice %492 {offsets = [0, 0], sizes = [1, 256], strides = [1, 1]} : vector<4x256xf32> to vector<1x256xf32>
    %530 = vector.broadcast %528 : vector<4x1xf32> to vector<4x256xf32>
    %531 = vector.broadcast %529 : vector<1x256xf32> to vector<4x256xf32>
    %532 = arith.mulf %530, %531 : vector<4x256xf32>
    %533 = arith.addf %527, %532 : vector<4x256xf32>
    %c0_180 = arith.constant 0 : index
    %c16_181 = arith.constant 16 : index
    %534 = vector.load %arg5[%c0_180, %c16_181] : memref<4x36xf32, #tpu.memory_space<vmem>>, vector<4x1xf32>
    %535 = vector.extract_strided_slice %492 {offsets = [1, 0], sizes = [1, 256], strides = [1, 1]} : vector<4x256xf32> to vector<1x256xf32>
    %536 = vector.broadcast %534 : vector<4x1xf32> to vector<4x256xf32>
    %537 = vector.broadcast %535 : vector<1x256xf32> to vector<4x256xf32>
    %538 = arith.mulf %536, %537 : vector<4x256xf32>
    %539 = arith.addf %533, %538 : vector<4x256xf32>
    %c0_182 = arith.constant 0 : index
    %c25_183 = arith.constant 25 : index
    %540 = vector.load %arg5[%c0_182, %c25_183] : memref<4x36xf32, #tpu.memory_space<vmem>>, vector<4x1xf32>
    %541 = vector.extract_strided_slice %492 {offsets = [2, 0], sizes = [1, 256], strides = [1, 1]} : vector<4x256xf32> to vector<1x256xf32>
    %542 = vector.broadcast %540 : vector<4x1xf32> to vector<4x256xf32>
    %543 = vector.broadcast %541 : vector<1x256xf32> to vector<4x256xf32>
    %544 = arith.mulf %542, %543 : vector<4x256xf32>
    %545 = arith.addf %539, %544 : vector<4x256xf32>
    %c0_184 = arith.constant 0 : index
    %c34_185 = arith.constant 34 : index
    %546 = vector.load %arg5[%c0_184, %c34_185] : memref<4x36xf32, #tpu.memory_space<vmem>>, vector<4x1xf32>
    %547 = vector.extract_strided_slice %492 {offsets = [3, 0], sizes = [1, 256], strides = [1, 1]} : vector<4x256xf32> to vector<1x256xf32>
    %548 = vector.broadcast %546 : vector<4x1xf32> to vector<4x256xf32>
    %549 = vector.broadcast %547 : vector<1x256xf32> to vector<4x256xf32>
    %550 = arith.mulf %548, %549 : vector<4x256xf32>
    %551 = arith.addf %545, %550 : vector<4x256xf32>
    %c0_186 = arith.constant 0 : index
    %c8_187 = arith.constant 8 : index
    %552 = vector.load %arg5[%c0_186, %c8_187] : memref<4x36xf32, #tpu.memory_space<vmem>>, vector<4x1xf32>
    %553 = vector.extract_strided_slice %503 {offsets = [0, 0], sizes = [1, 256], strides = [1, 1]} : vector<4x256xf32> to vector<1x256xf32>
    %554 = vector.broadcast %552 : vector<4x1xf32> to vector<4x256xf32>
    %555 = vector.broadcast %553 : vector<1x256xf32> to vector<4x256xf32>
    %556 = arith.mulf %554, %555 : vector<4x256xf32>
    %557 = arith.addf %551, %556 : vector<4x256xf32>
    %c0_188 = arith.constant 0 : index
    %c17_189 = arith.constant 17 : index
    %558 = vector.load %arg5[%c0_188, %c17_189] : memref<4x36xf32, #tpu.memory_space<vmem>>, vector<4x1xf32>
    %559 = vector.extract_strided_slice %503 {offsets = [1, 0], sizes = [1, 256], strides = [1, 1]} : vector<4x256xf32> to vector<1x256xf32>
    %560 = vector.broadcast %558 : vector<4x1xf32> to vector<4x256xf32>
    %561 = vector.broadcast %559 : vector<1x256xf32> to vector<4x256xf32>
    %562 = arith.mulf %560, %561 : vector<4x256xf32>
    %563 = arith.addf %557, %562 : vector<4x256xf32>
    %c0_190 = arith.constant 0 : index
    %c26_191 = arith.constant 26 : index
    %564 = vector.load %arg5[%c0_190, %c26_191] : memref<4x36xf32, #tpu.memory_space<vmem>>, vector<4x1xf32>
    %565 = vector.extract_strided_slice %503 {offsets = [2, 0], sizes = [1, 256], strides = [1, 1]} : vector<4x256xf32> to vector<1x256xf32>
    %566 = vector.broadcast %564 : vector<4x1xf32> to vector<4x256xf32>
    %567 = vector.broadcast %565 : vector<1x256xf32> to vector<4x256xf32>
    %568 = arith.mulf %566, %567 : vector<4x256xf32>
    %569 = arith.addf %563, %568 : vector<4x256xf32>
    %c0_192 = arith.constant 0 : index
    %c35_193 = arith.constant 35 : index
    %570 = vector.load %arg5[%c0_192, %c35_193] : memref<4x36xf32, #tpu.memory_space<vmem>>, vector<4x1xf32>
    %571 = vector.extract_strided_slice %503 {offsets = [3, 0], sizes = [1, 256], strides = [1, 1]} : vector<4x256xf32> to vector<1x256xf32>
    %572 = vector.broadcast %570 : vector<4x1xf32> to vector<4x256xf32>
    %573 = vector.broadcast %571 : vector<1x256xf32> to vector<4x256xf32>
    %574 = arith.mulf %572, %573 : vector<4x256xf32>
    %575 = arith.addf %569, %574 : vector<4x256xf32>
    %c0_194 = arith.constant 0 : index
    %c0_195 = arith.constant 0 : index
    %576 = vector.load %arg6[%c0_194, %c0_195] : memref<4x1xf32, #tpu.memory_space<vmem>>, vector<4x1xf32>
    %577 = vector.broadcast %576 : vector<4x1xf32> to vector<4x256xf32>
    %578 = arith.addf %575, %577 : vector<4x256xf32>
    %cst_196 = arith.constant dense<0.000000e+00> : vector<4xf32>
    %579 = vector.multi_reduction <add>, %578, %cst_196 [1] : vector<4x256xf32> to vector<4xf32>
    %580 = vector.shape_cast %579 : vector<4xf32> to vector<4x1xf32>
    %cst_197 = arith.constant 3.906250e-03 : f32
    %581 = vector.broadcast %cst_197 : f32 to vector<4x1xf32>
    %582 = arith.mulf %580, %581 : vector<4x1xf32>
    %583 = arith.mulf %578, %578 : vector<4x256xf32>
    %cst_198 = arith.constant dense<0.000000e+00> : vector<4xf32>
    %584 = vector.multi_reduction <add>, %583, %cst_198 [1] : vector<4x256xf32> to vector<4xf32>
    %585 = vector.shape_cast %584 : vector<4xf32> to vector<4x1xf32>
    %cst_199 = arith.constant 3.906250e-03 : f32
    %586 = vector.broadcast %cst_199 : f32 to vector<4x1xf32>
    %587 = arith.mulf %585, %586 : vector<4x1xf32>
    %588 = arith.mulf %582, %582 : vector<4x1xf32>
    %589 = arith.subf %587, %588 : vector<4x1xf32>
    %590 = vector.broadcast %582 : vector<4x1xf32> to vector<4x256xf32>
    %591 = arith.subf %578, %590 : vector<4x256xf32>
    %cst_200 = arith.constant 9.99999974E-6 : f32
    %592 = vector.broadcast %cst_200 : f32 to vector<4x1xf32>
    %593 = arith.addf %589, %592 : vector<4x1xf32>
    %594 = math.rsqrt %593 : vector<4x1xf32>
    %595 = vector.broadcast %594 : vector<4x1xf32> to vector<4x256xf32>
    %596 = arith.mulf %591, %595 : vector<4x256xf32>
    %597 = arith.addf %596, %1 : vector<4x256xf32>
    %c0_201 = arith.constant 0 : index
    %c0_202 = arith.constant 0 : index
    %c0_203 = arith.constant 0 : index
    %598 = vector.load %arg7[%c0_201, %c0_202, %c0_203] : memref<1x4x256xf32, #tpu.memory_space<vmem>>, vector<1x4x256xf32>
    %599 = vector.shape_cast %598 : vector<1x4x256xf32> to vector<4x256xf32>
    %600 = vector.shape_cast %597 : vector<4x256xf32> to vector<1x4x256xf32>
    tpu.vector_store %arg7[%c0_201, %c0_202, %c0_203], %600 {strides = array<i32>} : memref<1x4x256xf32, #tpu.memory_space<vmem>>, vector<1x4x256xf32>,
    return
  }
  func.func @transform_0(%arg0: i32) -> (i32, i32, i32) {
    %c0_i32 = arith.constant 0 : i32
    %c0_i32_0 = arith.constant 0 : i32
    %c0_i32_1 = arith.constant 0 : i32
    return %arg0, %c0_i32, %c0_i32_0 : i32, i32, i32
  }
  func.func @transform_1(%arg0: i32) -> (i32, i32) {
    %c0_i32 = arith.constant 0 : i32
    %c0_i32_0 = arith.constant 0 : i32
    %c0_i32_1 = arith.constant 0 : i32
    return %c0_i32, %c0_i32_0 : i32, i32
  }
  func.func @transform_2(%arg0: i32) -> (i32, i32) {
    %c0_i32 = arith.constant 0 : i32
    %c0_i32_0 = arith.constant 0 : i32
    %c0_i32_1 = arith.constant 0 : i32
    return %c0_i32, %c0_i32_0 : i32, i32
  }
  func.func @transform_3(%arg0: i32) -> (i32, i32) {
    %c0_i32 = arith.constant 0 : i32
    %c0_i32_0 = arith.constant 0 : i32
    %c0_i32_1 = arith.constant 0 : i32
    return %c0_i32, %c0_i32_0 : i32, i32
  }
  func.func @transform_4(%arg0: i32) -> (i32, i32) {
    %c0_i32 = arith.constant 0 : i32
    %c0_i32_0 = arith.constant 0 : i32
    %c0_i32_1 = arith.constant 0 : i32
    return %c0_i32, %c0_i32_0 : i32, i32
  }
  func.func @transform_5(%arg0: i32) -> (i32, i32) {
    %c0_i32 = arith.constant 0 : i32
    %c0_i32_0 = arith.constant 0 : i32
    %c0_i32_1 = arith.constant 0 : i32
    return %c0_i32, %c0_i32_0 : i32, i32
  }
  func.func @transform_6(%arg0: i32) -> (i32, i32, i32) {
    %c0_i32 = arith.constant 0 : i32
    %c0_i32_0 = arith.constant 0 : i32
    %c0_i32_1 = arith.constant 0 : i32
    return %arg0, %c0_i32, %c0_i32_0 : i32, i32, i32
  }
}

</mosaic_0001>

<bundles_post_ra>
// kernel: tpu_custom_call.1
= control target key start
LH: loop header
LB: loop body
LE: loop exit
PB: predicated region body
PF: predicated region fallthrough
CT: control target
= control target key end

     0   :  { %11 = vsyncpa [#allocation4], 0  ;;  %s3803_s0 = inlined_call_operand.hbm [shape: f32[2,4,256], index: 0, kind: input, shape index: {}]   ;;  %s3804_s1 = inlined_call_operand.vmem [shape: s32[2,256], index: 1, kind: input, shape index: {}]   ;;  %s3805_s2 = inlined_call_operand.vmem [shape: f32[4,36], index: 2, kind: input, shape index: {}]   ;;  %s3806_s3 = inlined_call_operand.vmem [shape: f32[4,1], index: 3, kind: input, shape index: {}]   ;;  %s3807_s4 = inlined_call_operand.vmem [shape: f32[4,36], index: 4, kind: input, shape index: {}]   ;;  %s3808_s5 = inlined_call_operand.vmem [shape: f32[4,1], index: 5, kind: input, shape index: {}]   ;;  %s3809_s6 = inlined_call_operand.hbm [shape: f32[2,4,256], index: 6, kind: output, shape index: {}]  }
   0x1   :  { %13 = vsyncpa [#allocation4 + $0x1], 0 }
   0x2   :  { %14 = vsyncpa [#allocation5], 0 }
   0x3   :  { %16 = vsyncpa [#allocation5 + $0x1], 0  ;;  %s2523_s21 = smov 0   ;;  %s2525_s22 = smov 0  }
   0x4   :  { %s2527_s23 = smov 0   ;;  %s2529_s24 = smov 0  }
   0x5 LB: > { %s2544_s25 = sadd.s32 4294967295, %s2438_s24   ;;  %s2151_s26 = sadd.s32 4294967294, %s2438_s24   ;;  %s2438_s24 = sphi %s2529_s24, %s3984_s24   ;;  %s2434_s23 = sphi %s2527_s23, %s3983_s23   ;;  %s2430_s22 = sphi %s2525_s22, %s3982_s22   ;;  %s2426_s21 = sphi %s2523_s21, %s3981_s21  }
   0x6   : > { %s2548_s27 = sadd.s32 1, %s2438_s24   ;;  %s29_s28 = sadd.s32 1, %s2434_s23 }
   0x7   : > { %s26_s29 = ssub.s32 %s2438_s24, %s2548_s27  ;;  %p36_p0 = scmp.ne.s32.totalorder %s2434_s23, %s2430_s22 }
   0x8   : > { %p27_p1 = scmp.eq.s32.totalorder %s26_s29, 0  ;;  %p37_p2 = scmp.eq.s32.totalorder %s2438_s24, 0 }
   0x9   : > { %p42_p3 = scmp.ne.s32.totalorder %s2430_s22, %s2426_s21  ;;  %p43_p4 = scmp.eq.s32.totalorder %s2544_s25, 0 }
   0xa   : > { %s2560_s30 = scalar_select %p27_p1, %s2434_s23, %s29_s28  }
   0xb   : > { %p2562_p5 = por %p37_p2, %p36_p0  ;;  %p2566_p6 = por %p43_p4, %p42_p3 }
   0xc   : > { %p171_p7 = scmp.eq.s32.totalorder %s2544_s25, 1  ;;  %p177_p8 = scmp.eq.s32.totalorder %s2151_s26, 1 }
   0xd   : > { %p2180_p10 = scmp.lt.s32.totalorder %s2438_s24, 2  ;;  %s212_s11 = sand.u32 1, %s2434_s23  }
   0xe   : > { %p2573_p11 = por %p171_p7, %p36_p0  ;;  %p2577_p12 = por %p177_p8, %p42_p3 }
   0xf   : > { %s2166_s12 = sshll.u32 %s2438_s24, 7  ;;  %s2154_s13 = sshll.u32 %s212_s11, 3 }
  0x10   : > { %s3874_s9 = scalar_select %p2573_p11, 1, 0 }
  0x11   : > { %s3875_s10 = scalar_select %p2577_p12, 1, 0 }
  0x12   : > { %s2586_s16 = scalar_lea.hbm %s3803_s0, %s2166_s12  ;;  %s216_s17 = scalar_lea.vmem [#allocation3], %s2154_s13 }
  0x13   : > { %s224_s18 = sshll.u32 %s216_s17, 4  ;;  %p2590_p13 = pnand %p2180_p10, %p2562_p5  ;;  %s2594_s18 = int_to_ptr.vmem [resolvable:$true] %s224_s18 }
  0x14   : > { %s213_s20 = scalar_lea.sflag [#allocation4], %s212_s11  ;;  %s2342_s26 = scalar_lea.hbm %s2586_s16, 128 }
  0x15   : > { %p2343_p2 = scmp.ne.s32.totalorder %s2586_s16, %s2342_s26  ;;  %p2344_p3 = pneg %p2590_p13 }
  0x16   : > { %s2347_s7 = scalar_lea.hbm %s3803_s0, 256  ;;  %p2348_p5 = scmp.lt.u32.totalorder %s2586_s16, %s3803_s0 }
  0x17   : > { %p2345_p4 = pnand %p2344_p3, %p2343_p2  ;;  %p2349_p8 = scmp.lt.u32.totalorder %s2347_s7, %s2342_s26 }
  0x18   : > { %p2351_p9 = scmp.lt.u32.totalorder %s2342_s26, %s2586_s16 }
  0x19   : > { %p2346_p7 = pneg %p2345_p4  ;;  %p2350_p10 = por %p2349_p8, %p2348_p5 }
  0x1b   : > { %p2352_p0 = por %p2351_p9, %p2350_p10 }
  0x1d   : > { %p2353_p1 = pnand %p2352_p0, %p2346_p7 }
  0x1f   : > { %2356 = shalt.err (!%p2353_p1)
}
  0x20   : > { %s2357_s11 = scalar_lea.vmem %s2594_s18, 128  ;;  %s2440_s14 = smov [#allocation3]  }
  0x21   : > { %p2358_p2 = scmp.ne.s32.totalorder %s2594_s18, %s2357_s11  ;;  %s2362_s15 = sshll.u32 %s2440_s14, 4  ;;  %s2363_s15 = int_to_ptr.vmem [resolvable:$false] %s2362_s15 }
  0x22   : > { %s2364_s17 = scalar_lea.vmem %s2363_s15, 256  ;;  %p2365_p11 = scmp.lt.s32.totalorder %s2594_s18, %s2363_s15 }
  0x23   : > { %p2360_p4 = pnand %p2358_p2, %p2344_p3  ;;  %p2366_p5 = scmp.lt.s32.totalorder %s2364_s17, %s2357_s11 }
  0x25   : > { %p2361_p12 = pneg %p2360_p4  ;;  %p2367_p8 = por %p2366_p5, %p2365_p11 }
  0x27   : > { %p2368_p9 = pnand %p2367_p8, %p2361_p12 }
  0x29   : > { %2371 = shalt.err (!%p2368_p9)
}
  0x2a   : > { %2175 = dma.hbm_to_vmem [thread:$0]  (!%p2590_p13), %s2586_s16, 128, %s2594_s18, %s213_s20  }
  0x2b   : > { %p3877_p0 = scmp.lt.s32.totalorder %s2438_s24, 3  ;;  %p3878_p1 = scmp.ge.s32.totalorder %s2438_s24, 1 }
  0x2d   : > { %p230_p3 = pnand %p3878_p1, %p3877_p0 }
  0x2f   : > { %233 = sbr.rel (%p230_p3) target bundleno = 1162 (0x48a), region = 44 }
  0x36   : > { %s2628_s26 = sand.u32 1, %s2430_s22  }
  0x37   : > { %s3824_s28 = sshll.u32 %s2628_s26, 3  ;;  %s236_s29 = scalar_lea.sflag [#allocation4], %s2628_s26 }
  0x38   : > { %s2634_s19 = scalar_lea.vmem [#allocation3], %s3824_s28 }
  0x39   : > { %2417 = dma.done.wait (%p2566_p6), %s236_s29, 128  }
  0x3a   : > { %2419 = vsyncadd (%p2566_p6), %s236_s29, 4294967168  ;;  %v2441_v0 = vmov 13   ;;  %v2442_v1 = vmov 4   ;;  %vm276_vm0 = vcmask 134144   ;;  %v2443_v2 = vmov 0.0   ;;  %v268_v4 = vld [vmem:[%s2634_s19] sm:$0xff] }
  0x3b   : > { %2261 = vset.pattern.permute.xlu1 %v2441_v0  ;;  %2260 = vset.pattern.permute.xlu0 %v2442_v1  ;;  %277 = vst.msk [vmem:[#allocation2] sm:$0xf] %vm276_vm0, %v2443_v2  ;;  %vm278_vm1 = vcmask 273544   ;;  %v2646_v3 = vld [vmem:[%s3805_s2] sm:$0xf]  ;;  %s2444_s8 = smov 17   ;;  %v296_v36 = vlaneseq }
  0x3c   : > { %279 = vst.msk [vmem:[#allocation2 + $0x8] sm:$0xf] %vm278_vm1, %v2443_v2  ;;  %739 = vperm.xlu1 %2261, %v2646_v3   ;;  %281 = vrot.lane.b32.xlu0 %v268_v4, %s2444_s8  ;;  %v3848_v5 = vmov 22   ;;  %v397_v6 = vld [vmem:[%s3805_s2] sm:$0xf]  ;;  %v3856_v7 = vmov 0  }
  0x3d   : > { %v3847_v8 = vmov 31   ;;  %v3846_v9 = vmov 18   ;;  %v3844_v10 = vmov 9   ;;  %v3845_v11 = vmov 10   ;;  %s2467_s12 = smov 94   ;;  %s2468_s13 = smov 96  }
  0x3e   : > { %v3842_v12 = vmov 27   ;;  %v3843_v13 = vmov 19   ;;  %v3840_v14 = vmov 1   ;;  %v3841_v15 = vmov 11   ;;  %s2469_s11 = smov 95   ;;  %s2470_s14 = smov 126  }
  0x3f   : > { %v3838_v16 = vmov 28   ;;  %v3839_v17 = vmov 3   ;;  %v3836_v18 = vmov 2   ;;  %v3837_v19 = vmov 30   ;;  %s2471_s15 = smov 112   ;;  %s2472_s17 = smov 127  }
  0x40   : > { %2262 = vset.pattern.permute.xlu1 %v3848_v5  ;;  %689 = vperm.xlu0 %2260, %v2646_v3   ;;  %v3834_v20 = vmov 20   ;;  %v3835_v21 = vmov 6   ;;  %v3833_v22 = vmov 29   ;;  %v3832_v23 = vmov 12   ;;  %s2473_s29 = smov 110   ;;  %s2475_s20 = smov 111  }
  0x41   : > { %788 = vperm.xlu1 %2262, %v2646_v3   ;;  %v3831_v24 = vmov 21   ;;  %v3830_v25 = vmov 5   ;;  %v3829_v26 = vmov 14   ;;  %v3828_v27 = vmov 23   ;;  %v2732_v39 = vld [vmem:[%s3805_s2] sm:$0xf] }
  0x42   : > { %vm288_vm2 = vcmask 1043592   ;;  %vm289_vm3 = vcmask 1047556   ;;  %vm284_vm4 = vcmask 138240   ;;  %v3879_v29 = vmov 0  ;;  %p3978_p11 = scmp.ne.s32.totalorder %s3874_s9, 0 }
  0x43   : > { %vm2685_vm5 = vmor %vm289_vm3, %vm288_vm2  ;;  %v2720_v37 = vshrl.u32 %v296_v36, 7  ;;  %v3827_v47 = vmov 33   ;;  %v3826_v57 = vmov 32   ;;  %v3823_v2 = vmov 15  }
  0x44   : > { %2264 = vset.pattern.permute.xlu0 %v3856_v7  ;;  %v3880_v29 = vsel %vm2685_vm5, 4294967295, %v3879_v29  ;;  %vm353_vm8 = vcmask 769024   ;;  %vm315_vm9 = vcmask 785408   ;;  %vm364_vm10 = vcmask 1031168  }
  0x45   : > { %2263 = vset.pattern.permute.xlu1 %v3847_v8  ;;  %400 = vperm.xlu0 %2264, %v397_v6   ;;  %3881 = vst [vmem:[#allocation9_spill] sm:$0xff] %v3880_v29  ;;  %3883 = vst [vmem:[#allocation11_spill] sm:$0xff] %v2720_v37  ;;  %v2727_v38 = vsub.s32 0, %v2720_v37  ;;  %v2735_v40 = vsub.s32 1, %v2720_v37  ;;  %v2752_v46 = vsub.s32 2, %v2720_v37  ;;  %v2763_v52 = vsub.s32 3, %v2720_v37 }
  0x46   : > { %837 = vperm.xlu1 %2263, %v2646_v3   ;;  %v3821_v36 = vsub.s32 4, %v2720_v37  ;;  %vm340_vm1 = vcmask 1039360   ;;  %vm3864_vm2 = vcmask 777216  }
  0x49   : > { %2266 = vset.pattern.permute.xlu0 %v3846_v9 }
  0x4a   : > { %2265 = vset.pattern.permute.xlu1 %v3844_v10  ;;  %432 = vperm.xlu0 %2266, %v397_v6  }
  0x4b   : > { %416 = vperm.xlu1 %2265, %v397_v6  }
  0x4e   : > { %2269 = vset.pattern.permute.xlu0 %v3845_v11 }
  0x4f   : > { %2267 = vset.pattern.permute.xlu1 %v3842_v12  ;;  %480 = vperm.xlu0 %2269, %v397_v6  }
  0x50   : > { %448 = vperm.xlu1 %2267, %v397_v6  }
  0x53   : > { %2270 = vset.pattern.permute.xlu0 %v3843_v13 }
  0x54   : > { %2268 = vset.pattern.permute.xlu1 %v3840_v14  ;;  %496 = vperm.xlu0 %2270, %v397_v6  }
  0x55   : > { %464 = vperm.xlu1 %2268, %v397_v6  }
  0x58   : > { %2273 = vset.pattern.permute.xlu0 %v3841_v15 }
  0x59   : > { %2271 = vset.pattern.permute.xlu1 %v3838_v16  ;;  %544 = vperm.xlu0 %2273, %v397_v6   ;;  %v3889_v16 = vmov 0 }
  0x5a   : > { %512 = vperm.xlu1 %2271, %v397_v6  }
  0x5d   : > { %2276 = vset.pattern.permute.xlu0 %v3839_v17 }
  0x5e   : > { %2272 = vset.pattern.permute.xlu1 %v3836_v18  ;;  %625 = vperm.xlu0 %2276, %v2646_v3  }
  0x5f   : > { %528 = vperm.xlu1 %2272, %v397_v6  }
  0x62   : > { %2279 = vset.pattern.permute.xlu0 %v3837_v19  ;;  %v3886_v19 = vmov 0 }
  0x63   : > { %2274 = vset.pattern.permute.xlu1 %v3834_v20  ;;  %673 = vperm.xlu0 %2279, %v2646_v3  }
  0x64   : > { %560 = vperm.xlu1 %2274, %v397_v6  }
  0x67   : > { %2284 = vset.pattern.permute.xlu0 %v3835_v21 }
  0x68   : > { %2275 = vset.pattern.permute.xlu1 %v3833_v22 }
  0x69   : > { %576 = vperm.xlu1 %2275, %v397_v6  }
  0x6d   : > { %2277 = vset.pattern.permute.xlu1 %v3832_v23 }
  0x6e   : > { %641 = vperm.xlu1 %2277, %v2646_v3  }
  0x72   : > { %2278 = vset.pattern.permute.xlu1 %v3831_v24 }
  0x73   : > { %657 = vperm.xlu1 %2278, %v2646_v3  }
  0x77   : > { %2280 = vset.pattern.permute.xlu1 %v3830_v25 }
  0x78   : > { %886 = vperm.xlu1 %2280, %v2646_v3  }
  0x7c   : > { %2281 = vset.pattern.permute.xlu1 %v3829_v26 }
  0x7d   : > { %902 = vperm.xlu1 %2281, %v2646_v3  }
  0x81   : > { %2282 = vset.pattern.permute.xlu1 %v3828_v27 }
  0xae   : > { %v282_v28 = vpop.permute.xlu0 %281 }
  0xaf   : > { %v283_v30 = vrot.slane %v282_v28, 4 }
  0xb1   : > { %v285_v31 = vsel %vm284_vm4, %v283_v30, %v282_v28  ;;  %292 = vst.msk [vmem:[#allocation2 + $0x8] sm:$0xf] %vm276_vm0, %v283_v30 }
  0xb2   : > { %291 = vst.msk [vmem:[#allocation2] sm:$0xff] %vm2685_vm5, %v285_v31  ;;  %v3822_v31 = vmov 24  }
  0xb8   : > { %v294_v32 = vld [vmem:[#allocation2 + $0x8] sm:$0xf] }
  0xb9   : > { %351 = vrot.lane.b32.xlu0 %v294_v32, %s2467_s12  ;;  %313 = vrot.lane.b32.xlu1 %v294_v32, %s2468_s13  ;;  %v592_v33 = vld [vmem:[#allocation2 + $0x8] sm:$0xf]  ;;  %v2699_v34 = vld [vmem:[#allocation2] sm:$0xff] }
  0xba   : > { %v2710_v35 = vcombine.high %v2699_v34, %v2699_v34  ;;  %v703_v42 = vrot.slane %v592_v33, %v2727_v38  ;;  %v753_v43 = vrot.slane %v592_v33, %v2735_v40  ;;  %v802_v51 = vrot.slane %v592_v33, %v2752_v46 }
  0xbb   : > { %v2737_v41 = vpop.permute.xlu1 %739  ;;  %v851_v56 = vrot.slane %v592_v33, %v2763_v52  ;;  %v745_v59 = vrot.slane %v2699_v34, %v2735_v40  ;;  %v794_v4 = vrot.slane %v2699_v34, %v2752_v46  ;;  %v843_v30 = vrot.slane %v2699_v34, %v2763_v52 }
  0xbc   : > { %3882 = vst [vmem:[#allocation10_spill] sm:$0xff] %v2710_v35  ;;  %v718_v45 = vrot.slane %v703_v42, %v2727_v38  ;;  %v768_v50 = vrot.slane %v753_v43, %v2735_v40  ;;  %v817_v55 = vrot.slane %v802_v51, %v2752_v46  ;;  %v3817_v43 = vsub.s32 5, %v2720_v37 }
  0xbd   : > { %327 = vrot.lane.b32.xlu0 %v294_v32, %s2469_s11  ;;  %362 = vrot.lane.b32.xlu1 %v294_v32, %s2470_s14  ;;  %v866_v60 = vrot.slane %v851_v56, %v2763_v52  ;;  %v760_v63 = vrot.slane %v745_v59, %v2735_v40  ;;  %v809_v28 = vrot.slane %v794_v4, %v2752_v46  ;;  %v3816_v59 = vsub.s32 6, %v2720_v37 }
  0xbe   : > { %v771_v53 = vmul.f32 %v768_v50, %v2737_v41  ;;  %v858_v42 = vrot.slane %v843_v30, %v2763_v52  ;;  %v699_v51 = vrot.slane %v2699_v34, %v3821_v36  ;;  %v749_v56 = vrot.slane %v2699_v34, %v3817_v43 }
  0xbf   : > { %v2744_v44 = vpop.permute.xlu0 %689  ;;  %v798_v4 = vrot.slane %v2699_v34, %v3816_v59 }
  0xc0   : > { %v2755_v48 = vpop.permute.xlu1 %788  ;;  %v721_v49 = vmul.f32 %v718_v45, %v2744_v44 }
  0xc1   : > { %611 = vrot.lane.b32.xlu0 %v592_v33, %s2471_s15  ;;  %338 = vrot.lane.b32.xlu1 %v294_v32, %s2472_s17  ;;  %v820_v58 = vmul.f32 %v817_v55, %v2755_v48  ;;  %v818_v32 = vmul.f32 %v809_v28, %v2755_v48  ;;  %v3819_v28 = vmov 25  }
  0xc5   : > { %600 = vrot.lane.b32.xlu1 %v592_v33, %s2473_s29  ;;  %347 = vrot.lane.b32.xlu0 %v2699_v34, %s2467_s12  ;;  %v2766_v54 = vpop.permute.xlu1 %837  ;;  %v695_v33 = vrot.slane %v2699_v34, %v2727_v38 }
  0xc6   : > { %v869_v62 = vmul.f32 %v866_v60, %v2766_v54 }
  0xc7   : > { %v710_v50 = vrot.slane %v695_v33, %v2727_v38  ;;  %v2837_v33 = vpop.permute.xlu0 %400 }
  0xc9   : > { %607 = vrot.lane.b32.xlu0 %v2699_v34, %s2471_s15  ;;  %309 = vrot.lane.b32.xlu1 %v2699_v34, %s2468_s13  ;;  %v719_v55 = vmul.f32 %v710_v50, %v2744_v44  ;;  %v3815_v50 = vmov 17  }
  0xca   : > { %v2780_v61 = vpop.permute.xlu1 %416 }
  0xcd   : > { %358 = vrot.lane.b32.xlu1 %v2699_v34, %s2470_s14  ;;  %311 = vrot.lane.b32.xlu0 %v2710_v35, %s2468_s13 }
  0xcf   : > { %v2790_v6 = vpop.permute.xlu1 %448 }
  0xd1   : > { %323 = vrot.lane.b32.xlu1 %v2699_v34, %s2469_s11  ;;  %360 = vrot.lane.b32.xlu0 %v2710_v35, %s2470_s14 }
  0xd4   : > { %v2805_v45 = vpop.permute.xlu1 %464 }
  0xd5   : > { %334 = vrot.lane.b32.xlu1 %v2699_v34, %s2472_s17  ;;  %336 = vrot.lane.b32.xlu0 %v2710_v35, %s2472_s17 }
  0xd9   : > { %596 = vrot.lane.b32.xlu1 %v2699_v34, %s2473_s29  ;;  %973 = vperm.xlu0 %2284, %v2732_v39   ;;  %v2823_v60 = vpop.permute.xlu1 %512 }
  0xdd   : > { %349 = vrot.lane.b32.xlu1 %v2710_v35, %s2467_s12  ;;  %598 = vrot.lane.b32.xlu0 %v2710_v35, %s2473_s29 }
  0xde   : > { %2287 = vset.pattern.permute.xlu0 %v3827_v47 }
  0xe1   : > { %918 = vperm.xlu1 %2282, %v2646_v3   ;;  %729 = vrot.lane.b32.xlu0 %v721_v49, %s2475_s20  ;;  %v867_v49 = vmul.f32 %v858_v42, %v2766_v54 }
  0xe5   : > { %325 = vrot.lane.b32.xlu1 %v2710_v35, %s2469_s11  ;;  %779 = vrot.lane.b32.xlu0 %v771_v53, %s2475_s20  ;;  %v3820_v53 = vmov 7  }
  0xe6   : > { %2283 = vset.pattern.permute.xlu1 %v3826_v57 }
  0xe9   : > { %934 = vperm.xlu1 %2283, %v2646_v3   ;;  %828 = vrot.lane.b32.xlu0 %v820_v58, %s2475_s20  ;;  %v769_v3 = vmul.f32 %v760_v63, %v2737_v41  ;;  %v714_v58 = vrot.slane %v699_v51, %v2727_v38  ;;  %v764_v63 = vrot.slane %v749_v56, %v2735_v40 }
  0xeb   : > { %v770_v30 = vmul.f32 %v764_v63, %v2737_v41  ;;  %v3812_v63 = vmov 16  }
  0xed   : > { %2285 = vset.pattern.permute.xlu1 %v3823_v2  ;;  %877 = vrot.lane.b32.xlu0 %v869_v62, %s2475_s20  ;;  %v720_v62 = vmul.f32 %v714_v58, %v2744_v44  ;;  %v813_v44 = vrot.slane %v798_v4, %v2752_v46  ;;  %v1164_v58 = vld [vmem:[%s3806_s3] sm:$0xf] }
  0xee   : > { %989 = vperm.xlu1 %2285, %v2732_v39  }
  0xf1   : > { %775 = vrot.lane.b32.xlu0 %v769_v3, %s2475_s20  ;;  %v3814_v3 = vsub.s32 7, %v2720_v37 }
  0xf2   : > { %2286 = vset.pattern.permute.xlu1 %v3822_v31 }
  0xf3   : > { %1005 = vperm.xlu1 %2286, %v2732_v39   ;;  %v847_v42 = vrot.slane %v2699_v34, %v3814_v3 }
  0xf5   : > { %824 = vrot.lane.b32.xlu0 %v818_v32, %s2475_s20  ;;  %v2835_v32 = vpop.permute.xlu1 %528  ;;  %v862_v41 = vrot.slane %v847_v42, %v2763_v52 }
  0xf7   : > { %609 = vrot.lane.b32.xlu1 %v2710_v35, %s2471_s15  ;;  %v868_v56 = vmul.f32 %v862_v41, %v2766_v54 }
  0xf8   : > { %2288 = vset.pattern.permute.xlu1 %v3820_v53 }
  0xf9   : > { %873 = vrot.lane.b32.xlu0 %v867_v49, %s2475_s20  ;;  %v819_v49 = vmul.f32 %v813_v44, %v2755_v48  ;;  %v2850_v51 = vpop.permute.xlu1 %560 }
  0xfb   : > { %725 = vrot.lane.b32.xlu1 %v719_v55, %s2475_s20  ;;  %v2852_v55 = vpop.permute.xlu0 %432 }
  0xfd   : > { %1021 = vperm.xlu0 %2287, %v2732_v39   ;;  %v2860_v48 = vpop.permute.xlu1 %576 }
  0xff   : > { %727 = vrot.lane.b32.xlu1 %v720_v62, %s2475_s20  ;;  %v2862_v62 = vpop.permute.xlu0 %480 }
 0x101   : > { %2290 = vset.pattern.permute.xlu0 %v3819_v28  ;;  %v2867_v54 = vpop.permute.xlu1 %641 }
 0x102   : > { %1069 = vperm.xlu0 %2290, %v2732_v39  }
 0x103   : > { %777 = vrot.lane.b32.xlu1 %v770_v30, %s2475_s20  ;;  %v2869_v4 = vpop.permute.xlu0 %496  ;;  %v3811_v30 = vmov 34  }
 0x105   : > { %v2874_v44 = vpop.permute.xlu1 %657 }
 0x106   : > { %2293 = vset.pattern.permute.xlu0 %v3815_v50 }
 0x107   : > { %1117 = vperm.xlu0 %2293, %v2732_v39   ;;  %826 = vrot.lane.b32.xlu1 %v819_v49, %s2475_s20  ;;  %v2876_v42 = vpop.permute.xlu0 %544  ;;  %v3813_v49 = vmov 8  }
 0x10b   : > { %875 = vrot.lane.b32.xlu1 %v868_v56, %s2475_s20  ;;  %2296 = vset.pattern.permute.xlu0 %v3856_v7  ;;  %v2882_v41 = vpop.permute.xlu0 %625  ;;  %v3818_v56 = vmov 26  }
 0x10c   : > { %1167 = vperm.xlu0 %2296, %v1164_v58  }
 0x10f   : > { %1037 = vperm.xlu1 %2288, %v2732_v39  }
 0x110   : > { %2297 = vset.pattern.permute.xlu0 %v2442_v1  ;;  %v2880_v1 = vpop.permute.xlu1 %886 }
 0x111   : > { %3884 = vst [vmem:[#allocation12_spill] sm:$0xff] %v2880_v1 }
 0x113   : > { %2289 = vset.pattern.permute.xlu1 %v3812_v63  ;;  %v3825_v63 = vmov 35  }
 0x114   : > { %1053 = vperm.xlu1 %2289, %v2732_v39   ;;  %v2886_v58 = vpop.permute.xlu1 %902 }
 0x115   : > { %3885 = vst [vmem:[#allocation13_spill] sm:$0xff] %v2886_v58 }
 0x118   : > { %2291 = vset.pattern.permute.xlu1 %v3811_v30  ;;  %v2888_v30 = vpop.permute.xlu0 %673 }
 0x119   : > { %1085 = vperm.xlu1 %2291, %v2732_v39  }
 0x11d   : > { %2292 = vset.pattern.permute.xlu1 %v3813_v49 }
 0x11e   : > { %1101 = vperm.xlu1 %2292, %v2732_v39  }
 0x122   : > { %2294 = vset.pattern.permute.xlu1 %v3818_v56 }
 0x123   : > { %1133 = vperm.xlu1 %2294, %v2732_v39  }
 0x127   : > { %2295 = vset.pattern.permute.xlu1 %v3825_v63  ;;  %v2160_v63 = vld [vmem:[%s3804_s1 + $0x1] ss:$2 sm:$0x3] }
 0x128   : > { %1149 = vperm.xlu1 %2295, %v2732_v39   ;;  %v2906_v39 = vld [vmem:[%s3804_s1] ss:$2 sm:$0x3]  ;;  %vm274_vm7 = vcmp.eq.s32.totalorder %v2160_v63, 0  ;;  %vm275_vm15 = vcmp.eq.s32.totalorder %v2160_v63, 15 }
 0x129   : > { %vm272_vm6 = vcmp.eq.s32.totalorder %v2906_v39, 0  ;;  %v371_v25 = vsel %vm274_vm7, 1, %v3856_v7  ;;  %v384_v5 = vsel %vm275_vm15, 1, %v3856_v7  ;;  %vm3863_vm7 = vcmask 900096  }
 0x12a   : > { %v295_v27 = vsel %vm272_vm6, 1, %v3856_v7  ;;  %v375_v20 = vrot.slane %v371_v25, %v2727_v38  ;;  %v379_v21 = vrot.slane %v371_v25, %v2735_v40  ;;  %v388_v58 = vrot.slane %v384_v5, %v2727_v38 }
 0x12b   : > { %v314_v49 = vpop.permute.xlu1 %313  ;;  %v352_v3 = vpop.permute.xlu0 %351  ;;  %v299_v24 = vrot.slane %v295_v27, %v2727_v38  ;;  %v303_v23 = vrot.slane %v295_v27, %v2735_v40  ;;  %v392_v63 = vrot.slane %v384_v5, %v2735_v40  ;;  %vm3862_vm15 = vcmask 916480  }
 0x12c   : > { %2298 = vset.pattern.permute.xlu1 %v2441_v0  ;;  %vm2950_vm13 = vcmp.eq.s32.totalorder %v375_v20, 1  ;;  %vm2954_vm14 = vcmp.eq.s32.totalorder %v379_v21, 1  ;;  %vm3001_vm3 = vcmp.eq.s32.totalorder %v388_v58, 1 }
 0x12d   : > { %vm2924_vm11 = vcmp.eq.s32.totalorder %v299_v24, 1  ;;  %vm2928_vm12 = vcmp.eq.s32.totalorder %v303_v23, 1  ;;  %vm3005_vm6 = vcmp.eq.s32.totalorder %v392_v63, 1 }
 0x12e   : > { %v3887_v19 = vsel %vm2924_vm11, 4294967295, %v3886_v19  ;;  %v3890_v16 = vsel %vm2928_vm12, 4294967295, %v3889_v16 }
 0x12f   : > { %v363_v50 = vpop.permute.xlu1 %362  ;;  %v2893_v59 = vpop.permute.xlu0 %327  ;;  %3888 = vst [vmem:[#allocation14_spill] sm:$0xff] %v3887_v19  ;;  %3891 = vst [vmem:[#allocation15_spill] sm:$0xff] %v3890_v16 }
 0x133   : > { %v2895_v43 = vpop.permute.xlu1 %338  ;;  %v2897_v56 = vpop.permute.xlu0 %611 }
 0x137   : > { %v2899_v28 = vpop.permute.xlu1 %600  ;;  %v348_v36 = vpop.permute.xlu0 %347 }
 0x13b   : > { %v310_v53 = vpop.permute.xlu1 %309  ;;  %v2901_v2 = vpop.permute.xlu0 %607 }
 0x13f   : > { %v359_v31 = vpop.permute.xlu1 %358  ;;  %v312_v47 = vpop.permute.xlu0 %311 }
 0x140   : > { %v2939_v14 = vsel %vm315_vm9, %v310_v53, %v312_v47  ;;  %v2942_v25 = vsel %vm315_vm9, %v312_v47, %v314_v49 }
 0x141   : > { %v321_v20 = vsel %vm2924_vm11, %v2939_v14, %v2699_v34  ;;  %v322_v21 = vsel %vm2928_vm12, %v2942_v25, %v2710_v35 }
 0x143   : > { %v2908_v0 = vpop.permute.xlu1 %323  ;;  %v361_v22 = vpop.permute.xlu0 %360 }
 0x144   : > { %v2945_v24 = vsel %vm364_vm10, %v359_v31, %v361_v22  ;;  %v2948_v23 = vsel %vm364_vm10, %v361_v22, %v363_v50 }
 0x147   : > { %v2914_v57 = vpop.permute.xlu1 %334  ;;  %v337_v53 = vpop.permute.xlu0 %336 }
 0x14b   : > { %v2917_v26 = vpop.permute.xlu1 %596 }
 0x14f   : > { %v350_v18 = vpop.permute.xlu1 %349 }
 0x150   : > { %v2933_v17 = vsel %vm353_vm8, %v348_v36, %v350_v18  ;;  %v2936_v27 = vsel %vm353_vm8, %v350_v18, %v352_v3 }
 0x151   : > { %v369_v18 = vsel %vm2924_vm11, %v2933_v17, %v2945_v24  ;;  %v370_v47 = vsel %vm2928_vm12, %v2936_v27, %v2948_v23 }
 0x152   : > { %v382_v22 = vsel %vm2950_vm13, %v369_v18, %v321_v20  ;;  %v383_v31 = vsel %vm2954_vm14, %v370_v47, %v322_v21 }
 0x153   : > { %v406_v3 = vrot.slane %v382_v22, %v2727_v38  ;;  %v410_v50 = vrot.slane %v383_v31, %v2727_v38  ;;  %v422_v49 = vrot.slane %v382_v22, %v2735_v40  ;;  %v426_v12 = vrot.slane %v383_v31, %v2735_v40 }
 0x154   : > { %v438_v37 = vrot.slane %v382_v22, %v2752_v46  ;;  %v442_v29 = vrot.slane %v383_v31, %v2752_v46 }
 0x155   : > { %v411_v10 = vmul.f32 %v406_v3, %v2837_v33  ;;  %v412_v11 = vmul.f32 %v410_v50, %v2837_v33  ;;  %v427_v9 = vmul.f32 %v422_v49, %v2780_v61  ;;  %v428_v8 = vmul.f32 %v426_v12, %v2780_v61 }
 0x156   : > { %v443_v12 = vmul.f32 %v438_v37, %v2852_v55  ;;  %v444_v61 = vmul.f32 %v442_v29, %v2852_v55  ;;  %v454_v33 = vrot.slane %v382_v22, %v2763_v52  ;;  %v458_v50 = vrot.slane %v383_v31, %v2763_v52 }
 0x157   : > { %v429_v1 = vadd.f32 %v427_v9, %v411_v10  ;;  %v3015_v29 = vsel %vm340_vm1, %v337_v53, %v2895_v43  ;;  %v3043_v31 = vsel %vm3001_vm3, %v321_v20, %v369_v18 }
 0x158   : > { %v2982_v13 = vpop.permute.xlu0 %973 }
 0x159   : > { %3896 = vst [vmem:[#allocation16_spill] sm:$0xff] %v2982_v13  ;;  %v430_v13 = vadd.f32 %v428_v8, %v412_v11  ;;  %v445_v8 = vadd.f32 %v443_v12, %v429_v1  ;;  %v3011_v11 = vsel %vm340_vm1, %v2914_v57, %v337_v53  ;;  %v459_v1 = vmul.f32 %v454_v33, %v2790_v6 }
 0x15a   : > { %v3047_v53 = vsel %vm3005_vm6, %v322_v21, %v370_v47 }
 0x15b   : > { %v446_v9 = vadd.f32 %v444_v61, %v430_v13  ;;  %v460_v13 = vmul.f32 %v458_v50, %v2790_v6  ;;  %v461_v63 = vadd.f32 %v459_v1, %v445_v8  ;;  %v534_v8 = vrot.slane %v3043_v31, %v2727_v38 }
 0x15c   : > { %v2993_v35 = vpop.permute.xlu0 %598 }
 0x15d   : > { %v462_v12 = vadd.f32 %v460_v13, %v446_v9 }
 0x160   : > { %v2995_v3 = vpop.permute.xlu1 %918  ;;  %v3027_v58 = vpop.permute.xlu0 %729 }
 0x164   : > { %v326_v10 = vpop.permute.xlu1 %325  ;;  %v3063_v9 = vpop.permute.xlu0 %779 }
 0x165   : > { %v3019_v37 = vsel %vm3864_vm2, %v2908_v0, %v326_v10  ;;  %v3023_v55 = vsel %vm3864_vm2, %v326_v10, %v2893_v59 }
 0x166   : > { %v345_v57 = vsel %vm2924_vm11, %v3019_v37, %v3011_v11  ;;  %v346_v43 = vsel %vm2928_vm12, %v3023_v55, %v3015_v29 }
 0x167   : > { %v470_v0 = vrot.slane %v345_v57, %v2727_v38  ;;  %v474_v59 = vrot.slane %v346_v43, %v2727_v38  ;;  %v486_v22 = vrot.slane %v345_v57, %v2735_v40  ;;  %v490_v6 = vrot.slane %v346_v43, %v2735_v40 }
 0x168   : > { %v3049_v61 = vpop.permute.xlu1 %934  ;;  %v502_v10 = vrot.slane %v345_v57, %v2752_v46  ;;  %v506_v7 = vrot.slane %v346_v43, %v2752_v46  ;;  %v518_v16 = vrot.slane %v345_v57, %v2763_v52  ;;  %v522_v18 = vrot.slane %v346_v43, %v2763_v52 }
 0x169   : > { %v475_v33 = vmul.f32 %v470_v0, %v2805_v45  ;;  %v476_v50 = vmul.f32 %v474_v59, %v2805_v45  ;;  %v491_v47 = vmul.f32 %v486_v22, %v2862_v62  ;;  %v492_v21 = vmul.f32 %v490_v6, %v2862_v62 }
 0x16a   : > { %v538_v45 = vrot.slane %v3047_v53, %v2727_v38  ;;  %v507_v57 = vmul.f32 %v502_v10, %v2869_v4  ;;  %v508_v43 = vmul.f32 %v506_v7, %v2869_v4  ;;  %v523_v62 = vmul.f32 %v518_v16, %v2823_v60  ;;  %v3077_v4 = vpop.permute.xlu0 %828 }
 0x16b   : > { %v477_v20 = vadd.f32 %v475_v33, %v461_v63  ;;  %v478_v19 = vadd.f32 %v476_v50, %v462_v12  ;;  %v524_v6 = vmul.f32 %v522_v18, %v2823_v60  ;;  %v550_v63 = vrot.slane %v3043_v31, %v2735_v40 }
 0x16c   : > { %v554_v12 = vrot.slane %v3047_v53, %v2735_v40  ;;  %v540_v33 = vmul.f32 %v538_v45, %v2835_v32 }
 0x16d   : > { %v493_v1 = vadd.f32 %v491_v47, %v477_v20  ;;  %v494_v13 = vadd.f32 %v492_v21, %v478_v19  ;;  %v3067_v0 = vpop.permute.xlu1 %989  ;;  %v539_v19 = vmul.f32 %v534_v8, %v2835_v32  ;;  %v555_v60 = vmul.f32 %v550_v63, %v2876_v42 }
 0x16e   : > { %v556_v18 = vmul.f32 %v554_v12, %v2876_v42  ;;  %v566_v47 = vrot.slane %v3043_v31, %v2752_v46  ;;  %v570_v32 = vrot.slane %v3047_v53, %v2752_v46  ;;  %v582_v21 = vrot.slane %v3043_v31, %v2763_v52 }
 0x16f   : > { %v509_v59 = vadd.f32 %v507_v57, %v493_v1  ;;  %v510_v22 = vadd.f32 %v508_v43, %v494_v13  ;;  %v586_v8 = vrot.slane %v3047_v53, %v2763_v52  ;;  %v603_v57 = vsel %vm3863_vm7, %v2917_v26, %v2993_v35 }
 0x170   : > { %v604_v42 = vsel %vm3863_vm7, %v2993_v35, %v2899_v28  ;;  %v572_v53 = vmul.f32 %v570_v32, %v2850_v51 }
 0x171   : > { %v525_v50 = vadd.f32 %v523_v62, %v509_v59  ;;  %v526_v7 = vadd.f32 %v524_v6, %v510_v22  ;;  %v571_v59 = vmul.f32 %v566_v47, %v2850_v51  ;;  %v3103_v22 = vpop.permute.xlu0 %877  ;;  %v588_v51 = vmul.f32 %v586_v8, %v2860_v48 }
 0x172   : > { %v3079_v10 = vpop.permute.xlu1 %1005  ;;  %v3901_v47 = vmov 0  }
 0x173   : > { %v541_v16 = vadd.f32 %v539_v19, %v525_v50  ;;  %v542_v20 = vadd.f32 %v540_v33, %v526_v7 }
 0x175   : > { %v557_v45 = vadd.f32 %v555_v60, %v541_v16  ;;  %v558_v1 = vadd.f32 %v556_v18, %v542_v20  ;;  %v776_v7 = vpop.permute.xlu0 %775 }
 0x176   : > { %v610_v13 = vpop.permute.xlu1 %609 }
 0x177   : > { %v614_v43 = vsel %vm3862_vm15, %v2901_v2, %v610_v13  ;;  %v615_v31 = vsel %vm3862_vm15, %v610_v13, %v2897_v56  ;;  %v573_v6 = vadd.f32 %v571_v59, %v557_v45  ;;  %v574_v63 = vadd.f32 %v572_v53, %v558_v1 }
 0x178   : > { %v618_v62 = vsel %vm2950_vm13, %v603_v57, %v614_v43  ;;  %v619_v26 = vsel %vm2954_vm14, %v604_v42, %v615_v31  ;;  %vm273_vm15 = vcmp.eq.s32.totalorder %v2906_v39, 15  ;;  %v587_v56 = vmul.f32 %v582_v21, %v2860_v48 }
 0x179   : > { %v631_v35 = vrot.slane %v618_v62, %v2727_v38  ;;  %v635_v28 = vrot.slane %v619_v26, %v2727_v38  ;;  %v647_v33 = vrot.slane %v618_v62, %v2735_v40  ;;  %v651_v50 = vrot.slane %v619_v26, %v2735_v40 }
 0x17a   : > { %v726_v2 = vpop.permute.xlu1 %725  ;;  %v663_v16 = vrot.slane %v618_v62, %v2752_v46  ;;  %v667_v20 = vrot.slane %v619_v26, %v2752_v46  ;;  %v589_v18 = vadd.f32 %v587_v56, %v573_v6  ;;  %v590_v39 = vadd.f32 %v588_v51, %v574_v63 }
 0x17b   : > { %v636_v12 = vmul.f32 %v631_v35, %v2882_v41  ;;  %v637_v19 = vmul.f32 %v635_v28, %v2882_v41  ;;  %v949_v32 = vsel %vm273_vm15, 1, %v3901_v47  ;;  %v679_v48 = vrot.slane %v618_v62, %v2763_v52  ;;  %v825_v62 = vpop.permute.xlu0 %824 }
 0x17c   : > { %v683_v21 = vrot.slane %v619_v26, %v2763_v52  ;;  %v652_v41 = vmul.f32 %v647_v33, %v2867_v54  ;;  %v653_v8 = vmul.f32 %v651_v50, %v2867_v54  ;;  %v668_v53 = vmul.f32 %v663_v16, %v2874_v44 }
 0x17d   : > { %v638_v45 = vadd.f32 %v636_v12, %v589_v18  ;;  %v639_v1 = vadd.f32 %v637_v19, %v590_v39  ;;  %v669_v35 = vmul.f32 %v667_v20, %v2874_v44  ;;  %v953_v6 = vrot.slane %v949_v32, %v2727_v38 }
 0x17e   : > { %v728_v60 = vpop.permute.xlu1 %727  ;;  %v957_v63 = vrot.slane %v949_v32, %v2735_v40  ;;  %vm3865_vm15 = vcmask 908288   ;;  %v684_v51 = vmul.f32 %v679_v48, %v2888_v30  ;;  %v685_v54 = vmul.f32 %v683_v21, %v2888_v30 }
 0x17f   : > { %v654_v13 = vadd.f32 %v652_v41, %v638_v45  ;;  %v655_v59 = vadd.f32 %v653_v8, %v639_v1  ;;  %v620_v50 = vsel %vm3001_vm3, %v614_v43, %v603_v57  ;;  %v621_v44 = vsel %vm3005_vm6, %v615_v31, %v604_v42 }
 0x180   : > { %v732_v16 = vsel %vm3865_vm15, %v726_v2, %v728_v60  ;;  %v733_v20 = vsel %vm3865_vm15, %v728_v60, %v3027_v58  ;;  %vm3138_vm7 = vcmp.eq.s32.totalorder %v953_v6, 1  ;;  %vm3142_vm2 = vcmp.eq.s32.totalorder %v957_v63, 1  ;;  %v874_v60 = vpop.permute.xlu0 %873 }
 0x181   : > { %v670_v26 = vadd.f32 %v668_v53, %v654_v13  ;;  %v671_v56 = vadd.f32 %v669_v35, %v655_v59  ;;  %v892_v31 = vrot.slane %v620_v50, %v2727_v38  ;;  %v896_v2 = vrot.slane %v621_v44, %v2727_v38 }
 0x182   : > { %v778_v28 = vpop.permute.xlu1 %777  ;;  %v908_v45 = vrot.slane %v620_v50, %v2735_v40  ;;  %v912_v1 = vrot.slane %v621_v44, %v2735_v40 }
 0x183   : > { %v686_v12 = vadd.f32 %v684_v51, %v670_v26  ;;  %v687_v19 = vadd.f32 %v685_v54, %v671_v56  ;;  %v781_v57 = vsel %vm3865_vm15, %v776_v7, %v778_v28  ;;  %v782_v42 = vsel %vm3865_vm15, %v778_v28, %v3063_v9  ;;  %v3907_v28 = vld [vmem:[#allocation12_spill] sm:$0xff]  ;;  %v3908_v54 = vld [vmem:[#allocation13_spill] sm:$0xff] }
 0x184   : > { %v3158_v7 = vsel %vm3138_vm7, %v2945_v24, %v2933_v17  ;;  %v3164_v9 = vsel %vm3142_vm2, %v2948_v23, %v2936_v27  ;;  %v3175_v17 = vsel %vm3138_vm7, %v2699_v34, %v2939_v14  ;;  %v3906_v27 = vld [vmem:[#allocation10_spill] sm:$0xff]  ;;  %v924_v23 = vrot.slane %v620_v50, %v2752_v46 }
 0x185   : > { %v736_v39 = vadd.f32 %v732_v16, %v686_v12  ;;  %v737_v32 = vadd.f32 %v733_v20, %v687_v19  ;;  %v3181_v24 = vsel %vm3142_vm2, %v3906_v27, %v2942_v25  ;;  %v897_v6 = vmul.f32 %v892_v31, %v3907_v28  ;;  %v3909_v31 = vld [vmem:[#allocation16_spill] sm:$0xff] }
 0x186   : > { %v827_v33 = vpop.permute.xlu1 %826  ;;  %v898_v63 = vmul.f32 %v896_v2, %v3907_v28  ;;  %v966_v14 = vsel %vm2950_vm13, %v3158_v7, %v3175_v17  ;;  %v967_v34 = vsel %vm2954_vm14, %v3164_v9, %v3181_v24  ;;  %v940_v25 = vrot.slane %v620_v50, %v2763_v52 }
 0x187   : > { %v830_v43 = vsel %vm3865_vm15, %v825_v62, %v827_v33  ;;  %v831_v58 = vsel %vm3865_vm15, %v827_v33, %v3077_v4  ;;  %v785_v48 = vadd.f32 %v781_v57, %v736_v39  ;;  %v786_v21 = vadd.f32 %v782_v42, %v737_v32 }
 0x188   : > { %v944_v26 = vrot.slane %v621_v44, %v2763_v52  ;;  %v913_v12 = vmul.f32 %v908_v45, %v3908_v54  ;;  %v914_v19 = vmul.f32 %v912_v1, %v3908_v54  ;;  %v929_v33 = vmul.f32 %v924_v23, %v2995_v3 }
 0x189   : > { %v834_v13 = vadd.f32 %v830_v43, %v785_v48  ;;  %v835_v59 = vadd.f32 %v831_v58, %v786_v21  ;;  %v979_v32 = vrot.slane %v966_v14, %v2727_v38  ;;  %v983_v57 = vrot.slane %v967_v34, %v2727_v38 }
 0x18a   : > { %v876_v41 = vpop.permute.xlu1 %875  ;;  %v945_v50 = vmul.f32 %v940_v25, %v3049_v61  ;;  %v995_v48 = vrot.slane %v966_v14, %v2735_v40  ;;  %v1015_v45 = vrot.slane %v967_v34, %v2752_v46 }
 0x18b   : > { %v879_v4 = vsel %vm3865_vm15, %v874_v60, %v876_v41  ;;  %v880_v8 = vsel %vm3865_vm15, %v876_v41, %v3103_v22  ;;  %v928_v22 = vrot.slane %v621_v44, %v2752_v46  ;;  %v946_v44 = vmul.f32 %v944_v26, %v3049_v61 }
 0x18c   : > { %v883_v53 = vadd.f32 %v879_v4, %v834_v13  ;;  %v884_v35 = vadd.f32 %v880_v8, %v835_v59  ;;  %v984_v2 = vmul.f32 %v979_v32, %v3909_v31  ;;  %v985_v60 = vmul.f32 %v983_v57, %v3909_v31 }
 0x18d   : > { %v930_v16 = vmul.f32 %v928_v22, %v2995_v3  ;;  %v999_v3 = vrot.slane %v967_v34, %v2735_v40  ;;  %v962_v4 = vsel %vm3138_vm7, %v3011_v11, %v3019_v37  ;;  %v963_v61 = vsel %vm3142_vm2, %v3015_v29, %v3023_v55  ;;  %v1022_v37 = vpop.permute.xlu0 %1021 }
 0x18e   : > { %v1038_v62 = vpop.permute.xlu1 %1037  ;;  %v899_v56 = vadd.f32 %v897_v6, %v883_v53  ;;  %v900_v51 = vadd.f32 %v898_v63, %v884_v35  ;;  %v1011_v8 = vrot.slane %v966_v14, %v2752_v46  ;;  %v1000_v1 = vmul.f32 %v995_v48, %v3067_v0 }
 0x18f   : > { %v1001_v13 = vmul.f32 %v999_v3, %v3067_v0  ;;  %v1027_v22 = vrot.slane %v966_v14, %v2763_v52  ;;  %v1031_v11 = vrot.slane %v967_v34, %v2763_v52  ;;  %v1017_v29 = vmul.f32 %v1015_v45, %v3079_v10 }
 0x190   : > { %v915_v20 = vadd.f32 %v913_v12, %v899_v56  ;;  %v916_v39 = vadd.f32 %v914_v19, %v900_v51  ;;  %v1016_v53 = vmul.f32 %v1011_v8, %v3079_v10  ;;  %v1043_v28 = vrot.slane %v962_v4, %v2727_v38 }
 0x191   : > { %v1047_v6 = vrot.slane %v963_v61, %v2727_v38  ;;  %v1032_v63 = vmul.f32 %v1027_v22, %v1022_v37  ;;  %v1033_v0 = vmul.f32 %v1031_v11, %v1022_v37  ;;  %v1059_v56 = vrot.slane %v962_v4, %v2735_v40 }
 0x192   : > { %v931_v43 = vadd.f32 %v929_v33, %v915_v20  ;;  %v932_v58 = vadd.f32 %v930_v16, %v916_v39  ;;  %v1063_v14 = vrot.slane %v963_v61, %v2735_v40  ;;  %v1048_v12 = vmul.f32 %v1043_v28, %v1038_v62  ;;  %v1070_v16 = vpop.permute.xlu0 %1069 }
 0x193   : > { %v1054_v42 = vpop.permute.xlu1 %1053  ;;  %v1049_v19 = vmul.f32 %v1047_v6, %v1038_v62  ;;  %v1075_v10 = vrot.slane %v962_v4, %v2752_v46  ;;  %v1079_v33 = vrot.slane %v963_v61, %v2752_v46  ;;  %v968_v20 = vsel %vm3001_vm3, %v3175_v17, %v3158_v7 }
 0x194   : > { %v947_v21 = vadd.f32 %v945_v50, %v931_v43  ;;  %v948_v41 = vadd.f32 %v946_v44, %v932_v58  ;;  %v969_v39 = vsel %vm3005_vm6, %v3181_v24, %v3164_v9  ;;  %v1064_v50 = vmul.f32 %v1059_v56, %v1054_v42 }
 0x195   : > { %v1065_v44 = vmul.f32 %v1063_v14, %v1054_v42  ;;  %v1091_v62 = vrot.slane %v962_v4, %v2763_v52  ;;  %v1095_v43 = vrot.slane %v963_v61, %v2763_v52  ;;  %v1080_v58 = vmul.f32 %v1075_v10, %v1070_v16 }
 0x196   : > { %v986_v59 = vadd.f32 %v984_v2, %v947_v21  ;;  %v987_v27 = vadd.f32 %v985_v60, %v948_v41  ;;  %v1081_v31 = vmul.f32 %v1079_v33, %v1070_v16  ;;  %v1107_v48 = vrot.slane %v968_v20, %v2727_v38  ;;  %v1118_v4 = vpop.permute.xlu0 %1117 }
 0x197   : > { %v1111_v7 = vrot.slane %v969_v39, %v2727_v38  ;;  %v1123_v41 = vrot.slane %v968_v20, %v2735_v40  ;;  %v1127_v42 = vrot.slane %v969_v39, %v2735_v40  ;;  %vm1172_vm15 = vcmask 1043456  }
 0x198   : > { %v1086_v23 = vpop.permute.xlu1 %1085  ;;  %v1002_v55 = vadd.f32 %v1000_v1, %v986_v59  ;;  %v1003_v35 = vadd.f32 %v1001_v13, %v987_v27  ;;  %v1139_v13 = vrot.slane %v968_v20, %v2752_v46  ;;  %v1143_v59 = vrot.slane %v969_v39, %v2752_v46 }
 0x199   : > { %v1096_v9 = vmul.f32 %v1091_v62, %v1086_v23  ;;  %v1097_v24 = vmul.f32 %v1095_v43, %v1086_v23  ;;  %v1128_v27 = vmul.f32 %v1123_v41, %v1118_v4  ;;  %v1129_v22 = vmul.f32 %v1127_v42, %v1118_v4  ;;  %v1274_v62 = vld [vmem:[%s3807_s4] sm:$0xf] }
 0x19a   : > { %v1018_v25 = vadd.f32 %v1016_v53, %v1002_v55  ;;  %v1019_v26 = vadd.f32 %v1017_v29, %v1003_v35  ;;  %v1155_v23 = vrot.slane %v968_v20, %v2763_v52  ;;  %v1159_v29 = vrot.slane %v969_v39, %v2763_v52  ;;  %v1168_v56 = vpop.permute.xlu0 %1167 }
 0x19b   : > { %v3912_v43 = vmov 18  }
 0x19c   : > { %v1034_v51 = vadd.f32 %v1032_v63, %v1018_v25  ;;  %v1035_v54 = vadd.f32 %v1033_v0, %v1019_v26 }
 0x19d   : > { %v1102_v34 = vpop.permute.xlu1 %1101 }
 0x19e   : > { %v1050_v32 = vadd.f32 %v1048_v12, %v1034_v51  ;;  %v1051_v57 = vadd.f32 %v1049_v19, %v1035_v54  ;;  %v1112_v45 = vmul.f32 %v1107_v48, %v1102_v34  ;;  %v1113_v1 = vmul.f32 %v1111_v7, %v1102_v34 }
 0x19f   : > { %v3917_v48 = vmov 11   ;;  %v3918_v7 = vmov 1  }
 0x1a0   : > { %v1066_v2 = vadd.f32 %v1064_v50, %v1050_v32  ;;  %v1067_v60 = vadd.f32 %v1065_v44, %v1051_v57  ;;  %v3256_v57 = vld [vmem:[%s3807_s4] sm:$0xf]  ;;  %v3910_v50 = vmov 22   ;;  %v3911_v44 = vmov 31  }
 0x1a2   : > { %v1134_v17 = vpop.permute.xlu1 %1133  ;;  %v1082_v3 = vadd.f32 %v1080_v58, %v1066_v2  ;;  %v1083_v21 = vadd.f32 %v1081_v31, %v1067_v60  ;;  %v3913_v58 = vmov 10   ;;  %v3914_v31 = vmov 9  }
 0x1a3   : > { %v1144_v28 = vmul.f32 %v1139_v13, %v1134_v17  ;;  %v1145_v6 = vmul.f32 %v1143_v59, %v1134_v17  ;;  %v3915_v2 = vmov 19   ;;  %v3916_v60 = vmov 27  }
 0x1a4   : > { %v1098_v8 = vadd.f32 %v1096_v9, %v1082_v3  ;;  %v1099_v61 = vadd.f32 %v1097_v24, %v1083_v21  ;;  %v3919_v17 = vmov 3   ;;  %v3920_v3 = vmov 28  }
 0x1a5   : > { %v3921_v21 = vmov 30   ;;  %v3922_v9 = vmov 2   ;;  %v3923_v24 = vmov 6  }
 0x1a6   : > { %v1114_v11 = vadd.f32 %v1112_v45, %v1098_v8  ;;  %v1115_v37 = vadd.f32 %v1113_v1, %v1099_v61 }
 0x1a7   : > { %v1150_v53 = vpop.permute.xlu1 %1149 }
 0x1a8   : > { %v1130_v55 = vadd.f32 %v1128_v27, %v1114_v11  ;;  %v1131_v35 = vadd.f32 %v1129_v22, %v1115_v37  ;;  %v1160_v25 = vmul.f32 %v1155_v23, %v1150_v53  ;;  %v1161_v26 = vmul.f32 %v1159_v29, %v1150_v53 }
 0x1a9   : > { %v3924_v29 = vmov 20  }
 0x1aa   : > { %v1146_v63 = vadd.f32 %v1144_v28, %v1130_v55  ;;  %v1147_v0 = vadd.f32 %v1145_v6, %v1131_v35  ;;  %v3925_v55 = vmov 29   ;;  %v3926_v35 = vmov 12  }
 0x1ab   : > { %v3927_v28 = vmov 21   ;;  %v3928_v6 = vmov 5  }
 0x1ac   : > { %v1162_v14 = vadd.f32 %v1160_v25, %v1146_v63  ;;  %v1163_v34 = vadd.f32 %v1161_v26, %v1147_v0  ;;  %v3929_v63 = vmov 14   ;;  %v3930_v0 = vmov 23  }
 0x1ae   : > { %v1170_v51 = vadd.f32 %v1168_v56, %v1162_v14  ;;  %v1171_v54 = vadd.f32 %v1168_v56, %v1163_v34 }
 0x1b0   : > { %v1173_v12 = vsel %vm1172_vm15, %v1170_v51, 0.0  ;;  %v1174_v19 = vsel %vm1172_vm15, %v1171_v54, 0.0  ;;  %v1179_v10 = vmul.f32 %v1170_v51, %v1170_v51  ;;  %v1180_v33 = vmul.f32 %v1171_v54, %v1171_v54 }
 0x1b1   : > { %v1175_v16 = vadd.f32 %v1174_v19, %v1173_v12 }
 0x1b2   : > { %v1181_v20 = vsel %vm1172_vm15, %v1179_v10, 0.0  ;;  %v1182_v39 = vsel %vm1172_vm15, %v1180_v33, 0.0 }
 0x1b3   : > { %1176 = vadd.xlane.f32.xlu1 %v1175_v16  ;;  %v1183_v32 = vadd.f32 %v1182_v39, %v1181_v20 }
 0x1b5   : > { %1184 = vadd.xlane.f32.xlu0 %v1183_v32 }
 0x1c4   : > { %1613 = vperm.xlu1 %2298, %v3256_v57  }
 0x1c8   : > { %2299 = vset.pattern.permute.xlu1 %v3910_v50 }
 0x1c9   : > { %1662 = vperm.xlu1 %2299, %v3256_v57  }
 0x1cb   : > { %1564 = vperm.xlu0 %2297, %v3256_v57  }
 0x1cd   : > { %2300 = vset.pattern.permute.xlu1 %v3911_v44  ;;  %v3344_v44 = vld [vmem:[%s3807_s4] sm:$0xf] }
 0x1ce   : > { %1711 = vperm.xlu1 %2300, %v3256_v57  }
 0x1cf   : > { %2303 = vset.pattern.permute.xlu0 %v3912_v43 }
 0x1d0   : > { %1309 = vperm.xlu0 %2303, %v1274_v62  }
 0x1d2   : > { %2301 = vset.pattern.permute.xlu1 %v3901_v47 }
 0x1d3   : > { %1277 = vperm.xlu1 %2301, %v1274_v62  }
 0x1d4   : > { %2306 = vset.pattern.permute.xlu0 %v3913_v58 }
 0x1d5   : > { %1357 = vperm.xlu0 %2306, %v1274_v62  }
 0x1d7   : > { %2302 = vset.pattern.permute.xlu1 %v3914_v31 }
 0x1d8   : > { %1293 = vperm.xlu1 %2302, %v1274_v62  }
 0x1d9   : > { %2307 = vset.pattern.permute.xlu0 %v3915_v2  ;;  %v3934_v2 = vmov 33  }
 0x1da   : > { %1373 = vperm.xlu0 %2307, %v1274_v62  }
 0x1dc   : > { %2304 = vset.pattern.permute.xlu1 %v3916_v60 }
 0x1dd   : > { %1325 = vperm.xlu1 %2304, %v1274_v62  }
 0x1de   : > { %2310 = vset.pattern.permute.xlu0 %v3917_v48 }
 0x1df   : > { %1421 = vperm.xlu0 %2310, %v1274_v62  }
 0x1e1   : > { %2305 = vset.pattern.permute.xlu1 %v3918_v7 }
 0x1e2   : > { %1341 = vperm.xlu1 %2305, %v1274_v62  }
 0x1e3   : > { %2313 = vset.pattern.permute.xlu0 %v3919_v17 }
 0x1e4   : > { %1500 = vperm.xlu0 %2313, %v3256_v57  }
 0x1e6   : > { %2308 = vset.pattern.permute.xlu1 %v3920_v3 }
 0x1e7   : > { %1389 = vperm.xlu1 %2308, %v1274_v62  }
 0x1e8   : > { %2316 = vset.pattern.permute.xlu0 %v3921_v21 }
 0x1e9   : > { %1548 = vperm.xlu0 %2316, %v3256_v57  }
 0x1eb   : > { %2309 = vset.pattern.permute.xlu1 %v3922_v9 }
 0x1ed   : > { %2321 = vset.pattern.permute.xlu0 %v3923_v24 }
 0x240   : > { %v1177_v41 = vpop.xlane.xlu1 %1176 }
 0x241   : > { %v1178_v42 = vmul.f32 0.00390625, %v1177_v41 }
 0x242   : > { %v1185_v4 = vpop.xlane.xlu0 %1184 }
 0x243   : > { %v1186_v8 = vmul.f32 0.00390625, %v1185_v4  ;;  %v1187_v61 = vmul.f32 %v1178_v42, %v1178_v42  ;;  %v1189_v13 = vsub.f32 %v1170_v51, %v1178_v42  ;;  %v1190_v59 = vsub.f32 %v1171_v54, %v1178_v42 }
 0x244   : > { %v3294_v25 = vpop.permute.xlu1 %1613 }
 0x245   : > { %v1188_v45 = vsub.f32 %v1186_v8, %v1187_v61  ;;  %v3935_v61 = vmov 32  }
 0x247   : > { %v1191_v1 = vadd.f32 1e-05, %v1188_v45 }
 0x248   : > { %v3296_v26 = vpop.permute.xlu1 %1662 }
 0x249   : > { %2337 = vrsqrt.f32 %v1191_v1 }
 0x24a   : > { %v1565_v31 = vpop.permute.xlu0 %1564 }
 0x24d   : > { %v3298_v56 = vpop.permute.xlu1 %1711 }
 0x252   : > { %v3300_v14 = vpop.permute.xlu1 %1277 }
 0x253   : > { %v2338_v27 = vpop.eup %2337 }
 0x254   : > { %v1193_v22 = vmul.f32 %v2338_v27, %v1189_v13  ;;  %v1194_v11 = vmul.f32 %v2338_v27, %v1190_v59 }
 0x256   : > { %v1195_v37 = vmax.f32 %v1193_v22, 0.0  ;;  %v1196_v53 = vmax.f32 %v1194_v11, 0.0  ;;  %v3936_v22 = vmov 15  }
 0x257   : > { %v3302_v34 = vpop.permute.xlu1 %1293 }
 0x258   : > { %v1199_v23 = vcombine.low %v1195_v37, %v1196_v53  ;;  %v3937_v53 = vmov 24  }
 0x25a   : > { %1200 = vrot.lane.b32.xlu1 %v1199_v23, %s2444_s8 }
 0x25c   : > { %v3304_v51 = vpop.permute.xlu1 %1325 }
 0x25e   : > { %1405 = vperm.xlu1 %2309, %v1274_v62  }
 0x261   : > { %v3306_v54 = vpop.permute.xlu1 %1341 }
 0x262   : > { %2311 = vset.pattern.permute.xlu1 %v3924_v29 }
 0x263   : > { %1437 = vperm.xlu1 %2311, %v1274_v62  }
 0x266   : > { %v3308_v12 = vpop.permute.xlu1 %1389 }
 0x267   : > { %2312 = vset.pattern.permute.xlu1 %v3925_v55 }
 0x268   : > { %1453 = vperm.xlu1 %2312, %v1274_v62  }
 0x26c   : > { %2314 = vset.pattern.permute.xlu1 %v3926_v35  ;;  %v3940_v35 = vmov 7  }
 0x26d   : > { %1516 = vperm.xlu1 %2314, %v3256_v57  }
 0x271   : > { %2315 = vset.pattern.permute.xlu1 %v3927_v28 }
 0x272   : > { %1532 = vperm.xlu1 %2315, %v3256_v57  }
 0x276   : > { %2317 = vset.pattern.permute.xlu1 %v3928_v6 }
 0x277   : > { %1760 = vperm.xlu1 %2317, %v3256_v57  }
 0x27b   : > { %2318 = vset.pattern.permute.xlu1 %v3929_v63  ;;  %v3941_v63 = vmov 25  }
 0x27c   : > { %1776 = vperm.xlu1 %2318, %v3256_v57  }
 0x280   : > { %2319 = vset.pattern.permute.xlu1 %v3930_v0 }
 0x2cc   : > { %v1201_v19 = vpop.permute.xlu1 %1200 }
 0x2cd   : > { %v1202_v10 = vrot.slane %v1201_v19, 4 }
 0x2cf   : > { %v1203_v33 = vsel %vm284_vm4, %v1202_v10, %v1201_v19  ;;  %1207 = vst.msk [vmem:[#allocation2 + $0x8] sm:$0xf] %vm276_vm0, %v1202_v10  ;;  %vm3957_vm0 = vcmask 777216  }
 0x2d0   : > { %1206 = vst.msk [vmem:[#allocation2] sm:$0xff] %vm2685_vm5, %v1203_v33  ;;  %vm3958_vm4 = vmmov %vm3957_vm0  ;;  %vm3959_vm5 = vcmask 900096  }
 0x2d6   : > { %v1209_v20 = vld [vmem:[#allocation2 + $0x8] sm:$0xf] }
 0x2d7   : > { %1252 = vrot.lane.b32.xlu0 %v1209_v20, %s2467_s12  ;;  %1217 = vrot.lane.b32.xlu1 %v1209_v20, %s2468_s13  ;;  %v1469_v39 = vld [vmem:[#allocation2 + $0x8] sm:$0xf]  ;;  %v3320_v32 = vld [vmem:[#allocation2] sm:$0xff] }
 0x2d8   : > { %3932 = vst [vmem:[#allocation10_spill] sm:$0xff] %v3320_v32  ;;  %v3331_v50 = vcombine.high %v3320_v32, %v3320_v32  ;;  %v1578_v62 = vrot.slane %v1469_v39, %v2727_v38  ;;  %v1627_v58 = vrot.slane %v1469_v39, %v2735_v40  ;;  %v1676_v7 = vrot.slane %v1469_v39, %v2752_v46 }
 0x2d9   : > { %v1725_v21 = vrot.slane %v1469_v39, %v2763_v52  ;;  %v1619_v41 = vrot.slane %v3320_v32, %v2735_v40  ;;  %v1668_v8 = vrot.slane %v3320_v32, %v2752_v46  ;;  %v1717_v13 = vrot.slane %v3320_v32, %v2763_v52 }
 0x2da   : > { %3933 = vst [vmem:[#allocation12_spill] sm:$0xff] %v3331_v50  ;;  %v1593_v43 = vrot.slane %v1578_v62, %v2727_v38  ;;  %v1642_v48 = vrot.slane %v1627_v58, %v2735_v40  ;;  %v1691_v3 = vrot.slane %v1676_v7, %v2752_v46  ;;  %v1570_v37 = vrot.slane %v3320_v32, %v2727_v38 }
 0x2db   : > { %1230 = vrot.lane.b32.xlu0 %v1209_v20, %s2469_s11  ;;  %1262 = vrot.lane.b32.xlu1 %v1209_v20, %s2470_s14  ;;  %v1740_v24 = vrot.slane %v1725_v21, %v2763_v52  ;;  %v1634_v4 = vrot.slane %v1619_v41, %v2735_v40  ;;  %v1683_v1 = vrot.slane %v1668_v8, %v2752_v46  ;;  %v3944_v62 = vmov 17   ;;  %v3442_v21 = vpop.permute.xlu0 %1309 }
 0x2dc   : > { %v1596_v60 = vmul.f32 %v1593_v43, %v1565_v31  ;;  %v1645_v17 = vmul.f32 %v1642_v48, %v3294_v25  ;;  %v1694_v9 = vmul.f32 %v1691_v3, %v3296_v26  ;;  %v1732_v27 = vrot.slane %v1717_v13, %v2763_v52 }
 0x2dd   : > { %v1743_v42 = vmul.f32 %v1740_v24, %v3298_v56  ;;  %v1643_v45 = vmul.f32 %v1634_v4, %v3294_v25  ;;  %v1692_v59 = vmul.f32 %v1683_v1, %v3296_v26  ;;  %v1585_v55 = vrot.slane %v1570_v37, %v2727_v38 }
 0x2de   : > { %v1741_v11 = vmul.f32 %v1732_v27, %v3298_v56  ;;  %v3946_v24 = vmov 16   ;;  %v3949_v4 = vmov 8   ;;  %v3952_v13 = vmov 35  }
 0x2df   : > { %1487 = vrot.lane.b32.xlu0 %v1469_v39, %s2471_s15  ;;  %1240 = vrot.lane.b32.xlu1 %v1209_v20, %s2472_s17  ;;  %v1594_v6 = vmul.f32 %v1585_v55, %v1565_v31 }
 0x2e3   : > { %1477 = vrot.lane.b32.xlu1 %v1469_v39, %s2473_s29  ;;  %1248 = vrot.lane.b32.xlu0 %v3320_v32, %s2467_s12  ;;  %v3418_v39 = vpop.permute.xlu1 %1405 }
 0x2e7   : > { %1483 = vrot.lane.b32.xlu0 %v3320_v32, %s2471_s15  ;;  %1213 = vrot.lane.b32.xlu1 %v3320_v32, %s2468_s13  ;;  %v3432_v48 = vpop.permute.xlu1 %1437 }
 0x2eb   : > { %1258 = vrot.lane.b32.xlu1 %v3320_v32, %s2470_s14  ;;  %1260 = vrot.lane.b32.xlu0 %v3331_v50, %s2470_s14  ;;  %v3439_v3 = vpop.permute.xlu1 %1453  ;;  %s3977_s14 = sshll.u32 %s2628_s26, 3 }
 0x2ef   : > { %1226 = vrot.lane.b32.xlu1 %v3320_v32, %s2469_s11  ;;  %1238 = vrot.lane.b32.xlu0 %v3331_v50, %s2472_s17 }
 0x2f3   : > { %1236 = vrot.lane.b32.xlu1 %v3320_v32, %s2472_s17  ;;  %1836 = vperm.xlu0 %2321, %v3344_v44  }
 0x2f7   : > { %1473 = vrot.lane.b32.xlu1 %v3320_v32, %s2473_s29  ;;  %1475 = vrot.lane.b32.xlu0 %v3331_v50, %s2473_s29 }
 0x2f8   : > { %2324 = vset.pattern.permute.xlu0 %v3934_v2 }
 0x2fb   : > { %1604 = vrot.lane.b32.xlu0 %v1596_v60, %s2475_s20  ;;  %1215 = vrot.lane.b32.xlu1 %v3331_v50, %s2468_s13  ;;  %v2027_v60 = vld [vmem:[%s3808_s5] sm:$0xf] }
 0x2ff   : > { %1653 = vrot.lane.b32.xlu0 %v1645_v17, %s2475_s20  ;;  %1250 = vrot.lane.b32.xlu1 %v3331_v50, %s2467_s12 }
 0x303   : > { %1702 = vrot.lane.b32.xlu0 %v1694_v9, %s2475_s20  ;;  %1792 = vperm.xlu1 %2319, %v3256_v57   ;;  %v3445_v9 = vpop.permute.xlu1 %1516 }
 0x307   : > { %1751 = vrot.lane.b32.xlu0 %v1743_v42, %s2475_s20  ;;  %1228 = vrot.lane.b32.xlu1 %v3331_v50, %s2469_s11  ;;  %s2167_s11 = sshll.u32 %s2544_s25, 7  ;;  %s2487_s25 = smov [#allocation6]  }
 0x308   : > { %2320 = vset.pattern.permute.xlu1 %v3935_v61  ;;  %s3759_s18 = scalar_lea.hbm %s3809_s6, %s2167_s11  ;;  %s2376_s16 = sshll.u32 %s2487_s25, 4  ;;  %s2377_s16 = int_to_ptr.vmem [resolvable:$false] %s2376_s16 }
 0x309   : > { %s2378_s8 = scalar_lea.vmem %s2377_s16, 256 }
 0x30b   : > { %1649 = vrot.lane.b32.xlu0 %v1643_v45, %s2475_s20  ;;  %1808 = vperm.xlu1 %2320, %v3256_v57   ;;  %v3938_v57 = vld [vmem:[#allocation11_spill] sm:$0xff]  ;;  %v3951_v45 = vmov 26  }
 0x30c   : > { %v3939_v23 = vsub.s32 4, %v3938_v57  ;;  %v3942_v0 = vsub.s32 5, %v3938_v57  ;;  %v3943_v16 = vsub.s32 6, %v3938_v57 }
 0x30e   : > { %v1574_v29 = vrot.slane %v3320_v32, %v3939_v23  ;;  %v1623_v19 = vrot.slane %v3320_v32, %v3942_v0  ;;  %v1672_v20 = vrot.slane %v3320_v32, %v3943_v16 }
 0x30f   : > { %1698 = vrot.lane.b32.xlu0 %v1692_v59, %s2475_s20  ;;  %2322 = vset.pattern.permute.xlu1 %v3936_v22 }
 0x310   : > { %1852 = vperm.xlu1 %2322, %v3344_v44   ;;  %v1589_v28 = vrot.slane %v1574_v29, %v2727_v38  ;;  %v1638_v33 = vrot.slane %v1623_v19, %v2735_v40  ;;  %v1687_v58 = vrot.slane %v1672_v20, %v2752_v46 }
 0x312   : > { %v1595_v10 = vmul.f32 %v1589_v28, %v1565_v31  ;;  %v1644_v43 = vmul.f32 %v1638_v33, %v3294_v25  ;;  %v3945_v31 = vsub.s32 7, %v3938_v57  ;;  %v1693_v7 = vmul.f32 %v1687_v58, %v3296_v26  ;;  %v3451_v26 = vpop.permute.xlu1 %1532 }
 0x313   : > { %1747 = vrot.lane.b32.xlu0 %v1741_v11, %s2475_s20 }
 0x314   : > { %2323 = vset.pattern.permute.xlu1 %v3937_v53  ;;  %v1721_v2 = vrot.slane %v3320_v32, %v3945_v31 }
 0x315   : > { %1868 = vperm.xlu1 %2323, %v3344_v44  }
 0x316   : > { %v1736_v25 = vrot.slane %v1721_v2, %v2763_v52  ;;  %v3457_v42 = vpop.permute.xlu1 %1760 }
 0x317   : > { %1884 = vperm.xlu0 %2324, %v3344_v44   ;;  %3948 = vst [vmem:[#allocation13_spill] sm:$0xff] %v3457_v42 }
 0x318   : > { %v1742_v17 = vmul.f32 %v1736_v25, %v3298_v56  ;;  %v3947_v56 = vmov 34  }
 0x319   : > { %1485 = vrot.lane.b32.xlu1 %v3331_v50, %s2471_s15  ;;  %s267_s15 = scalar_lea.vmem [#allocation6], %s3977_s14 }
 0x31a   : > { %2325 = vset.pattern.permute.xlu1 %v3940_v35  ;;  %v3463_v61 = vpop.permute.xlu1 %1776  ;;  %s2081_s17 = sshll.u32 %s267_s15, 4  ;;  %s3761_s17 = int_to_ptr.vmem [resolvable:$true] %s2081_s17 }
 0x31b   : > { %2327 = vset.pattern.permute.xlu0 %v3941_v63  ;;  %3950 = vst [vmem:[#allocation16_spill] sm:$0xff] %v3463_v61  ;;  %s2372_s7 = scalar_lea.vmem %s3761_s17, 128  ;;  %p2379_p7 = scmp.lt.s32.totalorder %s3761_s17, %s2377_s16 }
 0x31c   : > { %1932 = vperm.xlu0 %2327, %v3344_v44   ;;  %p2373_p6 = scmp.ne.s32.totalorder %s3761_s17, %s2372_s7  ;;  %p2380_p10 = scmp.lt.s32.totalorder %s2378_s8, %s2372_s7 }
 0x31d   : > { %1600 = vrot.lane.b32.xlu1 %v1594_v6, %s2475_s20 }
 0x31e   : > { %p2374_p12 = pnand %p2373_p6, %p3978_p11  ;;  %p2381_p2 = por %p2380_p10, %p2379_p7 }
 0x320   : > { %2330 = vset.pattern.permute.xlu0 %v3944_v62  ;;  %p2375_p13 = pneg %p2374_p12 }
 0x321   : > { %1980 = vperm.xlu0 %2330, %v3344_v44   ;;  %1602 = vrot.lane.b32.xlu1 %v1595_v10, %s2475_s20 }
 0x322   : > { %p2382_p4 = pnand %p2381_p2, %p2375_p13 }
 0x325   : > { %1651 = vrot.lane.b32.xlu1 %v1644_v43, %s2475_s20  ;;  %2333 = vset.pattern.permute.xlu0 %v3901_v47  ;;  %v3447_v47 = vpop.permute.xlu0 %1357 }
 0x326   : > { %2030 = vperm.xlu0 %2333, %v2027_v60  }
 0x329   : > { %1700 = vrot.lane.b32.xlu1 %v1693_v7, %s2475_s20  ;;  %v3453_v41 = vpop.permute.xlu0 %1373 }
 0x32d   : > { %1749 = vrot.lane.b32.xlu1 %v1742_v17, %s2475_s20  ;;  %v3460_v8 = vpop.permute.xlu0 %1421 }
 0x331   : > { %1900 = vperm.xlu1 %2325, %v3344_v44   ;;  %v3467_v1 = vpop.permute.xlu0 %1500 }
 0x335   : > { %2326 = vset.pattern.permute.xlu1 %v3946_v24  ;;  %v3471_v27 = vpop.permute.xlu0 %1548 }
 0x336   : > { %1916 = vperm.xlu1 %2326, %v3344_v44  }
 0x33a   : > { %2328 = vset.pattern.permute.xlu1 %v3947_v56 }
 0x33b   : > { %1948 = vperm.xlu1 %2328, %v3344_v44  }
 0x33f   : > { %2329 = vset.pattern.permute.xlu1 %v3949_v4 }
 0x340   : > { %1964 = vperm.xlu1 %2329, %v3344_v44  }
 0x344   : > { %2331 = vset.pattern.permute.xlu1 %v3951_v45 }
 0x345   : > { %1996 = vperm.xlu1 %2331, %v3344_v44  }
 0x349   : > { %2332 = vset.pattern.permute.xlu1 %v3952_v13  ;;  %v1218_v59 = vpop.permute.xlu1 %1217  ;;  %v1253_v37 = vpop.permute.xlu0 %1252 }
 0x34a   : > { %2012 = vperm.xlu1 %2332, %v3344_v44  }
 0x34d   : > { %v1263_v22 = vpop.permute.xlu1 %1262  ;;  %v1231_v57 = vpop.permute.xlu0 %1230 }
 0x351   : > { %v1241_v11 = vpop.permute.xlu1 %1240  ;;  %v3475_v55 = vpop.permute.xlu0 %1487 }
 0x355   : > { %v3473_v53 = vpop.permute.xlu1 %1477  ;;  %v1249_v28 = vpop.permute.xlu0 %1248 }
 0x359   : > { %v1214_v23 = vpop.permute.xlu1 %1213  ;;  %v3479_v0 = vpop.permute.xlu0 %1483 }
 0x35d   : > { %v1259_v29 = vpop.permute.xlu1 %1258  ;;  %v1261_v19 = vpop.permute.xlu0 %1260 }
 0x35e   : > { %v3488_v20 = vsel %vm364_vm10, %v1261_v19, %v1263_v22  ;;  %v3491_v62 = vsel %vm364_vm10, %v1259_v29, %v1261_v19 }
 0x361   : > { %v1227_v35 = vpop.permute.xlu1 %1226  ;;  %v1239_v4 = vpop.permute.xlu0 %1238 }
 0x365   : > { %v1237_v6 = vpop.permute.xlu1 %1236 }
 0x369   : > { %v3477_v63 = vpop.permute.xlu1 %1473 }
 0x36d   : > { %v1216_v44 = vpop.permute.xlu1 %1215 }
 0x36e   : > { %v3494_v43 = vsel %vm315_vm9, %v1214_v23, %v1216_v44  ;;  %v3497_v58 = vsel %vm315_vm9, %v1216_v44, %v1218_v59  ;;  %vm3961_vm9 = vcmask 916480  }
 0x36f   : > { %3953 = vst [vmem:[#allocation9_spill] sm:$0xff] %v3497_v58  ;;  %v1224_v25 = vsel %vm2924_vm11, %v3494_v43, %v3320_v32  ;;  %v1225_v17 = vsel %vm2928_vm12, %v3497_v58, %v3331_v50  ;;  %v3540_v32 = vsel %vm340_vm1, %v1239_v4, %v1241_v11  ;;  %vm3962_vm10 = vmmov %vm3961_vm9 }
 0x371   : > { %v1251_v10 = vpop.permute.xlu1 %1250 }
 0x372   : > { %v3482_v33 = vsel %vm353_vm8, %v1249_v28, %v1251_v10  ;;  %v3485_v16 = vsel %vm353_vm8, %v1251_v10, %v1253_v37  ;;  %v3523_v37 = vpop.permute.xlu0 %1836  ;;  %vm3960_vm8 = vmmov %vm3959_vm5 }
 0x373   : > { %v1268_v2 = vsel %vm2924_vm11, %v3482_v33, %v3491_v62  ;;  %v1269_v7 = vsel %vm2928_vm12, %v3485_v16, %v3488_v20  ;;  %3956 = vst [vmem:[#allocation11_spill] sm:$0xff] %v3523_v37 }
 0x374   : > { %v1270_v24 = vsel %vm2950_vm13, %v1268_v2, %v1224_v25  ;;  %v1271_v56 = vsel %vm2954_vm14, %v1269_v7, %v1225_v17  ;;  %v1273_v31 = vsel %vm3005_vm6, %v1225_v17, %v1269_v7 }
 0x375   : > { %v1283_v45 = vrot.slane %v1270_v24, %v2727_v38  ;;  %v1287_v13 = vrot.slane %v1271_v56, %v2727_v38  ;;  %v1299_v59 = vrot.slane %v1270_v24, %v2735_v40  ;;  %v1303_v22 = vrot.slane %v1271_v56, %v2735_v40 }
 0x376   : > { %v1315_v19 = vrot.slane %v1270_v24, %v2752_v46  ;;  %v1319_v10 = vrot.slane %v1271_v56, %v2752_v46  ;;  %v3531_v50 = vpop.permute.xlu0 %1475 }
 0x377   : > { %v1288_v23 = vmul.f32 %v1283_v45, %v3300_v14  ;;  %v1289_v29 = vmul.f32 %v1287_v13, %v3300_v14  ;;  %v1304_v28 = vmul.f32 %v1299_v59, %v3302_v34  ;;  %v1305_v44 = vmul.f32 %v1303_v22, %v3302_v34 }
 0x378   : > { %v1320_v37 = vmul.f32 %v1315_v19, %v3442_v21  ;;  %v1321_v45 = vmul.f32 %v1319_v10, %v3442_v21  ;;  %v1331_v14 = vrot.slane %v1270_v24, %v2763_v52  ;;  %v1335_v13 = vrot.slane %v1271_v56, %v2763_v52 }
 0x379   : > { %v1306_v61 = vadd.f32 %v1304_v28, %v1288_v23  ;;  %v1307_v42 = vadd.f32 %v1305_v44, %v1289_v29  ;;  %v3543_v23 = vsel %vm340_vm1, %v1237_v6, %v1239_v4  ;;  %v1272_v6 = vsel %vm3001_vm3, %v1224_v25, %v1268_v2 }
 0x37a   : > { %v1336_v21 = vmul.f32 %v1331_v14, %v3304_v51  ;;  %v1337_v24 = vmul.f32 %v1335_v13, %v3304_v51  ;;  %v3553_v56 = vpop.permute.xlu0 %1604 }
 0x37b   : > { %v1322_v59 = vadd.f32 %v1320_v37, %v1306_v61  ;;  %v1323_v34 = vadd.f32 %v1321_v45, %v1307_v42 }
 0x37d   : > { %v1338_v4 = vadd.f32 %v1336_v21, %v1322_v59  ;;  %v1339_v37 = vadd.f32 %v1337_v24, %v1323_v34  ;;  %v1411_v59 = vrot.slane %v1272_v6, %v2727_v38  ;;  %v1415_v34 = vrot.slane %v1273_v31, %v2727_v38 }
 0x382   : > { %v3533_v58 = vpop.permute.xlu1 %1792 }
 0x386   : > { %v1229_v22 = vpop.permute.xlu1 %1228 }
 0x387   : > { %v3546_v29 = vsel %vm3957_vm0, %v1227_v35, %v1229_v22  ;;  %v3549_v28 = vsel %vm3958_vm4, %v1229_v22, %v1231_v57  ;;  %v3583_v22 = vpop.permute.xlu0 %1653 }
 0x388   : > { %v1246_v42 = vsel %vm2924_vm11, %v3546_v29, %v3543_v23  ;;  %v1247_v61 = vsel %vm2928_vm12, %v3549_v28, %v3540_v32  ;;  %vm3963_vm11 = vcmask 908288  }
 0x389   : > { %v1347_v11 = vrot.slane %v1246_v42, %v2727_v38  ;;  %v1351_v57 = vrot.slane %v1247_v61, %v2727_v38  ;;  %v1363_v35 = vrot.slane %v1246_v42, %v2735_v40  ;;  %v1367_v51 = vrot.slane %v1247_v61, %v2735_v40  ;;  %vm3964_vm12 = vmmov %vm3963_vm11 }
 0x38a   : > { %v3571_v44 = vpop.permute.xlu1 %1808  ;;  %v1379_v10 = vrot.slane %v1246_v42, %v2752_v46  ;;  %v1383_v45 = vrot.slane %v1247_v61, %v2752_v46  ;;  %v1395_v14 = vrot.slane %v1246_v42, %v2763_v52  ;;  %v1399_v13 = vrot.slane %v1247_v61, %v2763_v52  ;;  %vm3965_vm1 = vmmov %vm3963_vm11 }
 0x38b   : > { %v1352_v60 = vmul.f32 %v1347_v11, %v3306_v54  ;;  %v1353_v19 = vmul.f32 %v1351_v57, %v3306_v54  ;;  %v1368_v7 = vmul.f32 %v1363_v35, %v3447_v47  ;;  %v1369_v17 = vmul.f32 %v1367_v51, %v3447_v47  ;;  %vm3966_vm0 = vmmov %vm3965_vm1 }
 0x38c   : > { %v1384_v24 = vmul.f32 %v1379_v10, %v3453_v41  ;;  %v1385_v42 = vmul.f32 %v1383_v45, %v3453_v41  ;;  %v1400_v35 = vmul.f32 %v1395_v14, %v3308_v12  ;;  %v1401_v47 = vmul.f32 %v1399_v13, %v3308_v12  ;;  %vm3967_vm4 = vmmov %vm3966_vm0 }
 0x38d   : > { %v1354_v2 = vadd.f32 %v1352_v60, %v1338_v4  ;;  %v1355_v25 = vadd.f32 %v1353_v19, %v1339_v37  ;;  %v1427_v51 = vrot.slane %v1272_v6, %v2735_v40  ;;  %v1431_v4 = vrot.slane %v1273_v31, %v2735_v40 }
 0x38e   : > { %v1416_v37 = vmul.f32 %v1411_v59, %v3418_v39  ;;  %v1417_v60 = vmul.f32 %v1415_v34, %v3418_v39  ;;  %v1443_v13 = vrot.slane %v1272_v6, %v2752_v46  ;;  %v1463_v39 = vrot.slane %v1273_v31, %v2763_v52 }
 0x38f   : > { %v1370_v54 = vadd.f32 %v1368_v7, %v1354_v2  ;;  %v1371_v21 = vadd.f32 %v1369_v17, %v1355_v25  ;;  %v3587_v11 = vpop.permute.xlu1 %1852  ;;  %v3595_v2 = vpop.permute.xlu0 %1702  ;;  %v1432_v14 = vmul.f32 %v1427_v51, %v3460_v8  ;;  %v1433_v12 = vmul.f32 %v1431_v4, %v3460_v8 }
 0x390   : > { %v1447_v7 = vrot.slane %v1273_v31, %v2752_v46  ;;  %v1459_v17 = vrot.slane %v1272_v6, %v2763_v52  ;;  %v1448_v6 = vmul.f32 %v1443_v13, %v3432_v48  ;;  %v1465_v51 = vmul.f32 %v1463_v39, %v3439_v3 }
 0x391   : > { %v1386_v61 = vadd.f32 %v1384_v24, %v1370_v54  ;;  %v1387_v57 = vadd.f32 %v1385_v42, %v1371_v21  ;;  %v1479_v21 = vsel %vm3959_vm5, %v3477_v63, %v3531_v50  ;;  %v1480_v24 = vsel %vm3960_vm8, %v3531_v50, %v3473_v53  ;;  %vm3968_vm5 = vmmov %vm3966_vm0 }
 0x392   : > { %v1449_v31 = vmul.f32 %v1447_v7, %v3432_v48  ;;  %vm3972_vm8 = vmmov %vm3966_vm0 }
 0x393   : > { %v1402_v19 = vadd.f32 %v1400_v35, %v1386_v61  ;;  %v1403_v10 = vadd.f32 %v1401_v47, %v1387_v57  ;;  %v1752_v61 = vpop.permute.xlu0 %1751 }
 0x394   : > { %v3597_v41 = vpop.permute.xlu1 %1868 }
 0x395   : > { %v1418_v45 = vadd.f32 %v1416_v37, %v1402_v19  ;;  %v1419_v25 = vadd.f32 %v1417_v60, %v1403_v10 }
 0x397   : > { %v1434_v59 = vadd.f32 %v1432_v14, %v1418_v45  ;;  %v1435_v34 = vadd.f32 %v1433_v12, %v1419_v25  ;;  %v1650_v19 = vpop.permute.xlu0 %1649 }
 0x398   : > { %v1486_v54 = vpop.permute.xlu1 %1485 }
 0x399   : > { %v1489_v8 = vsel %vm3961_vm9, %v3479_v0, %v1486_v54  ;;  %v1490_v42 = vsel %vm3962_vm10, %v1486_v54, %v3475_v55  ;;  %v1450_v0 = vadd.f32 %v1448_v6, %v1434_v59  ;;  %v1451_v47 = vadd.f32 %v1449_v31, %v1435_v34  ;;  %vm3973_vm9 = vmmov %vm3966_vm0 }
 0x39a   : > { %v1493_v57 = vsel %vm2950_vm13, %v1479_v21, %v1489_v8  ;;  %v1494_v63 = vsel %vm2954_vm14, %v1480_v24, %v1490_v42  ;;  %v1464_v55 = vmul.f32 %v1459_v17, %v3439_v3 }
 0x39b   : > { %v1506_v35 = vrot.slane %v1493_v57, %v2727_v38  ;;  %v1510_v50 = vrot.slane %v1494_v63, %v2727_v38  ;;  %v1522_v37 = vrot.slane %v1493_v57, %v2735_v40  ;;  %v1526_v60 = vrot.slane %v1494_v63, %v2735_v40 }
 0x39c   : > { %v1601_v53 = vpop.permute.xlu1 %1600  ;;  %v1538_v10 = vrot.slane %v1493_v57, %v2752_v46  ;;  %v1542_v45 = vrot.slane %v1494_v63, %v2752_v46  ;;  %v1466_v25 = vadd.f32 %v1464_v55, %v1450_v0  ;;  %v1467_v14 = vadd.f32 %v1465_v51, %v1451_v47 }
 0x39d   : > { %v1511_v48 = vmul.f32 %v1506_v35, %v3467_v1  ;;  %v1512_v4 = vmul.f32 %v1510_v50, %v3467_v1  ;;  %v1554_v13 = vrot.slane %v1493_v57, %v2763_v52  ;;  %v1558_v3 = vrot.slane %v1494_v63, %v2763_v52  ;;  %v1699_v35 = vpop.permute.xlu0 %1698 }
 0x39e   : > { %v1527_v7 = vmul.f32 %v1522_v37, %v3445_v9  ;;  %v1528_v1 = vmul.f32 %v1526_v60, %v3445_v9  ;;  %v1543_v54 = vmul.f32 %v1538_v10, %v3451_v26  ;;  %v1544_v6 = vmul.f32 %v1542_v45, %v3451_v26  ;;  %v3969_v45 = vld [vmem:[#allocation10_spill] sm:$0xff] }
 0x39f   : > { %v1513_v17 = vadd.f32 %v1511_v48, %v1466_v25  ;;  %v1514_v39 = vadd.f32 %v1512_v4, %v1467_v14  ;;  %v1559_v57 = vmul.f32 %v1554_v13, %v3471_v27  ;;  %v1560_v63 = vmul.f32 %v1558_v3, %v3471_v27  ;;  %v3971_v25 = vld [vmem:[#allocation12_spill] sm:$0xff] }
 0x3a0   : > { %v1603_v12 = vpop.permute.xlu1 %1602  ;;  %v1495_v9 = vsel %vm3001_vm3, %v1489_v8, %v1479_v21  ;;  %v1496_v48 = vsel %vm3005_vm6, %v1490_v42, %v1480_v24  ;;  %v3650_v37 = vsel %vm3138_vm7, %v3491_v62, %v3482_v33  ;;  %v3656_v27 = vsel %vm3142_vm2, %v3488_v20, %v3485_v16 }
 0x3a1   : > { %v1529_v59 = vadd.f32 %v1527_v7, %v1513_v17  ;;  %v1530_v34 = vadd.f32 %v1528_v1, %v1514_v39  ;;  %v1606_v4 = vsel %vm3963_vm11, %v1601_v53, %v1603_v12  ;;  %v1607_v26 = vsel %vm3964_vm12, %v1603_v12, %v3553_v56  ;;  %v1748_v33 = vpop.permute.xlu0 %1747 }
 0x3a2   : > { %v1766_v62 = vrot.slane %v1495_v9, %v2727_v38  ;;  %v1770_v60 = vrot.slane %v1496_v48, %v2727_v38  ;;  %v1782_v13 = vrot.slane %v1495_v9, %v2735_v40  ;;  %v1786_v3 = vrot.slane %v1496_v48, %v2735_v40 }
 0x3a3   : > { %v1545_v50 = vadd.f32 %v1543_v54, %v1529_v59  ;;  %v1546_v0 = vadd.f32 %v1544_v6, %v1530_v34  ;;  %v1798_v39 = vrot.slane %v1495_v9, %v2752_v46  ;;  %v3974_v59 = vld [vmem:[#allocation13_spill] sm:$0xff]  ;;  %v1818_v15 = vrot.slane %v1496_v48, %v2763_v52 }
 0x3a4   : > { %v1652_v31 = vpop.permute.xlu1 %1651  ;;  %v1771_v34 = vmul.f32 %v1766_v62, %v3974_v59  ;;  %v1772_v54 = vmul.f32 %v1770_v60, %v3974_v59 }
 0x3a5   : > { %v1561_v47 = vadd.f32 %v1559_v57, %v1545_v50  ;;  %v1562_v55 = vadd.f32 %v1560_v63, %v1546_v0  ;;  %v1655_v24 = vsel %vm3965_vm1, %v1650_v19, %v1652_v31  ;;  %v1656_v42 = vsel %vm3966_vm0, %v1652_v31, %v3583_v22  ;;  %v3970_v22 = vld [vmem:[#allocation9_spill] sm:$0xff]  ;;  %v3975_v0 = vld [vmem:[#allocation16_spill] sm:$0xff] }
 0x3a6   : > { %v3670_v19 = vsel %vm3138_vm7, %v3969_v45, %v3494_v43  ;;  %v3676_v14 = vsel %vm3142_vm2, %v3971_v25, %v3970_v22  ;;  %v1814_v50 = vrot.slane %v1495_v9, %v2763_v52  ;;  %v1787_v57 = vmul.f32 %v1782_v13, %v3975_v0 }
 0x3a7   : > { %v1610_v21 = vadd.f32 %v1606_v4, %v1561_v47  ;;  %v1611_v8 = vadd.f32 %v1607_v26, %v1562_v55  ;;  %v1829_v43 = vsel %vm2950_vm13, %v3650_v37, %v3670_v19  ;;  %v1830_v17 = vsel %vm2954_vm14, %v3656_v27, %v3676_v14 }
 0x3a8   : > { %v1701_v51 = vpop.permute.xlu1 %1700  ;;  %v1788_v36 = vmul.f32 %v1786_v3, %v3975_v0  ;;  %v1842_v55 = vrot.slane %v1829_v43, %v2727_v38  ;;  %v1803_v4 = vmul.f32 %v1798_v39, %v3533_v58  ;;  %v1819_v9 = vmul.f32 %v1814_v50, %v3571_v44 }
 0x3a9   : > { %v1704_v56 = vsel %vm3967_vm4, %v1699_v35, %v1701_v51  ;;  %v1705_v53 = vsel %vm3968_vm5, %v1701_v51, %v3595_v2  ;;  %v1659_v10 = vadd.f32 %v1655_v24, %v1610_v21  ;;  %v1660_v16 = vadd.f32 %v1656_v42, %v1611_v8 }
 0x3aa   : > { %v1846_v51 = vrot.slane %v1830_v17, %v2727_v38  ;;  %v1858_v60 = vrot.slane %v1829_v43, %v2735_v40  ;;  %v1874_v45 = vrot.slane %v1829_v43, %v2752_v46  ;;  %v1878_v22 = vrot.slane %v1830_v17, %v2752_v46 }
 0x3ab   : > { %v1708_v7 = vadd.f32 %v1704_v56, %v1659_v10  ;;  %v1709_v1 = vadd.f32 %v1705_v53, %v1660_v16  ;;  %v3976_v53 = vld [vmem:[#allocation11_spill] sm:$0xff]  ;;  %v1862_v10 = vrot.slane %v1830_v17, %v2735_v40  ;;  %v1890_v18 = vrot.slane %v1829_v43, %v2763_v52 }
 0x3ac   : > { %v1750_v20 = vpop.permute.xlu1 %1749  ;;  %v1848_v62 = vmul.f32 %v1846_v51, %v3976_v53  ;;  %v1863_v25 = vmul.f32 %v1858_v60, %v3587_v11  ;;  %v1880_v30 = vmul.f32 %v1878_v22, %v3597_v41  ;;  %v1832_v0 = vsel %vm3005_vm6, %v3676_v14, %v3656_v27 }
 0x3ad   : > { %v1753_v2 = vsel %vm3972_vm8, %v1748_v33, %v1750_v20  ;;  %v1754_v12 = vsel %vm3973_vm9, %v1750_v20, %v1752_v61  ;;  %v1802_v61 = vrot.slane %v1496_v48, %v2752_v46  ;;  %v1820_v48 = vmul.f32 %v1818_v15, %v3571_v44 }
 0x3ae   : > { %v1757_v6 = vadd.f32 %v1753_v2, %v1708_v7  ;;  %v1758_v31 = vadd.f32 %v1754_v12, %v1709_v1  ;;  %v1847_v33 = vmul.f32 %v1842_v55, %v3976_v53  ;;  %v1826_v44 = vsel %vm3142_vm2, %v3540_v32, %v3549_v28  ;;  %v1885_v7 = vpop.permute.xlu0 %1884 }
 0x3af   : > { %v1804_v26 = vmul.f32 %v1802_v61, %v3533_v58  ;;  %v1825_v58 = vsel %vm3138_vm7, %v3543_v23, %v3546_v29  ;;  %v1864_v2 = vmul.f32 %v1862_v10, %v3587_v11  ;;  %v1894_v23 = vrot.slane %v1830_v17, %v2763_v52 }
 0x3b0   : > { %v1901_v35 = vpop.permute.xlu1 %1900  ;;  %v1773_v63 = vadd.f32 %v1771_v34, %v1757_v6  ;;  %v1774_v47 = vadd.f32 %v1772_v54, %v1758_v31  ;;  %v1879_v29 = vmul.f32 %v1874_v45, %v3597_v41  ;;  %v1906_v1 = vrot.slane %v1825_v58, %v2727_v38 }
 0x3b1   : > { %v1910_v39 = vrot.slane %v1826_v44, %v2727_v38  ;;  %v1895_v61 = vmul.f32 %v1890_v18, %v1885_v7  ;;  %v1896_v11 = vmul.f32 %v1894_v23, %v1885_v7  ;;  %v1922_v54 = vrot.slane %v1825_v58, %v2735_v40 }
 0x3b2   : > { %v1789_v21 = vadd.f32 %v1787_v57, %v1773_v63  ;;  %v1790_v8 = vadd.f32 %v1788_v36, %v1774_v47  ;;  %v1926_v43 = vrot.slane %v1826_v44, %v2735_v40  ;;  %v1911_v50 = vmul.f32 %v1906_v1, %v1901_v35  ;;  %v1933_v57 = vpop.permute.xlu0 %1932 }
 0x3b3   : > { %v1912_v15 = vmul.f32 %v1910_v39, %v1901_v35  ;;  %v1831_v41 = vsel %vm3001_vm3, %v3670_v19, %v3650_v37  ;;  %v1938_v36 = vrot.slane %v1825_v58, %v2752_v46  ;;  %v1942_v63 = vrot.slane %v1826_v44, %v2752_v46 }
 0x3b4   : > { %v1805_v42 = vadd.f32 %v1803_v4, %v1789_v21  ;;  %v1806_v56 = vadd.f32 %v1804_v26, %v1790_v8  ;;  %v1954_v35 = vrot.slane %v1825_v58, %v2763_v52  ;;  %v1958_v26 = vrot.slane %v1826_v44, %v2763_v52 }
 0x3b5   : > { %v1917_v24 = vpop.permute.xlu1 %1916  ;;  %v1943_v49 = vmul.f32 %v1938_v36, %v1933_v57  ;;  %v1944_v37 = vmul.f32 %v1942_v63, %v1933_v57  ;;  %v1970_v5 = vrot.slane %v1831_v41, %v2727_v38  ;;  %v1974_v27 = vrot.slane %v1832_v0, %v2727_v38  ;;  %v2341_v57 = vld [vmem:[%s2634_s19] sm:$0xff]  ;;  %s2067_s19 = scalar_lea.sflag [#allocation5], %s2628_s26 }
 0x3b6   : > { %v1821_v16 = vadd.f32 %v1819_v9, %v1805_v42  ;;  %v1822_v20 = vadd.f32 %v1820_v48, %v1806_v56  ;;  %v1927_v51 = vmul.f32 %v1922_v54, %v1917_v24  ;;  %v1928_v4 = vmul.f32 %v1926_v43, %v1917_v24  ;;  %v1981_v56 = vpop.permute.xlu0 %1980 }
 0x3b7   : > { %v1986_v24 = vrot.slane %v1831_v41, %v2735_v40  ;;  %v1990_v53 = vrot.slane %v1832_v0, %v2735_v40  ;;  %v2018_v22 = vrot.slane %v1831_v41, %v2763_v52  ;;  %v2057_v36 = vcombine.high %v2341_v57, %v2341_v57 }
 0x3b8   : > { %v1849_v12 = vadd.f32 %v1847_v33, %v1821_v16  ;;  %v1850_v13 = vadd.f32 %v1848_v62, %v1822_v20  ;;  %v2002_v16 = vrot.slane %v1831_v41, %v2752_v46  ;;  %v2006_v20 = vrot.slane %v1832_v0, %v2752_v46 }
 0x3b9   : > { %v1991_v58 = vmul.f32 %v1986_v24, %v1981_v56  ;;  %v1992_v38 = vmul.f32 %v1990_v53, %v1981_v56 }
 0x3ba   : > { %v1949_v3 = vpop.permute.xlu1 %1948  ;;  %v1865_v32 = vadd.f32 %v1863_v25, %v1849_v12  ;;  %v1866_v28 = vadd.f32 %v1864_v2, %v1850_v13  ;;  %v2022_v25 = vrot.slane %v1832_v0, %v2763_v52 }
 0x3bb   : > { %v1959_v48 = vmul.f32 %v1954_v35, %v1949_v3  ;;  %v1960_v42 = vmul.f32 %v1958_v26, %v1949_v3 }
 0x3bc   : > { %v1881_v59 = vadd.f32 %v1879_v29, %v1865_v32  ;;  %v1882_v34 = vadd.f32 %v1880_v30, %v1866_v28  ;;  %v2031_v30 = vpop.permute.xlu0 %2030 }
 0x3be   : > { %v1897_v17 = vadd.f32 %v1895_v61, %v1881_v59  ;;  %v1898_v31 = vadd.f32 %v1896_v11, %v1882_v34 }
 0x3bf   : > { %v1965_v6 = vpop.permute.xlu1 %1964 }
 0x3c0   : > { %v1913_v47 = vadd.f32 %v1911_v50, %v1897_v17  ;;  %v1914_v55 = vadd.f32 %v1912_v15, %v1898_v31  ;;  %v1975_v60 = vmul.f32 %v1970_v5, %v1965_v6  ;;  %v1976_v10 = vmul.f32 %v1974_v27, %v1965_v6 }
 0x3c2   : > { %v1929_v19 = vadd.f32 %v1927_v51, %v1913_v47  ;;  %v1930_v21 = vadd.f32 %v1928_v4, %v1914_v55 }
 0x3c4   : > { %v1997_v14 = vpop.permute.xlu1 %1996  ;;  %v1945_v8 = vadd.f32 %v1943_v49, %v1929_v19  ;;  %v1946_v9 = vadd.f32 %v1944_v37, %v1930_v21 }
 0x3c5   : > { %v2007_v40 = vmul.f32 %v2002_v16, %v1997_v14  ;;  %v2008_v3 = vmul.f32 %v2006_v20, %v1997_v14 }
 0x3c6   : > { %v1961_v33 = vadd.f32 %v1959_v48, %v1945_v8  ;;  %v1962_v62 = vadd.f32 %v1960_v42, %v1946_v9 }
 0x3c8   : > { %v1977_v44 = vadd.f32 %v1975_v60, %v1961_v33  ;;  %v1978_v45 = vadd.f32 %v1976_v10, %v1962_v62 }
 0x3c9   : > { %v2013_v2 = vpop.permute.xlu1 %2012 }
 0x3ca   : > { %v1993_v12 = vadd.f32 %v1991_v58, %v1977_v44  ;;  %v1994_v13 = vadd.f32 %v1992_v38, %v1978_v45  ;;  %v2023_v23 = vmul.f32 %v2018_v22, %v2013_v2  ;;  %v2024_v29 = vmul.f32 %v2022_v25, %v2013_v2 }
 0x3cc   : > { %v2009_v7 = vadd.f32 %v2007_v40, %v1993_v12  ;;  %v2010_v18 = vadd.f32 %v2008_v3, %v1994_v13 }
 0x3ce   : > { %v2025_v32 = vadd.f32 %v2023_v23, %v2009_v7  ;;  %v2026_v46 = vadd.f32 %v2024_v29, %v2010_v18 }
 0x3d0   : > { %v2033_v28 = vadd.f32 %v2031_v30, %v2025_v32  ;;  %v2034_v1 = vadd.f32 %v2031_v30, %v2026_v46 }
 0x3d2   : > { %v2041_v39 = vmul.f32 %v2033_v28, %v2033_v28  ;;  %v2042_v61 = vmul.f32 %v2034_v1, %v2034_v1  ;;  %v2035_v11 = vsel %vm1172_vm15, %v2033_v28, 0.0  ;;  %v2036_v52 = vsel %vm1172_vm15, %v2034_v1, 0.0 }
 0x3d3   : > { %v2037_v59 = vadd.f32 %v2036_v52, %v2035_v11 }
 0x3d4   : > { %v2043_v34 = vsel %vm1172_vm15, %v2041_v39, 0.0  ;;  %v2044_v54 = vsel %vm1172_vm15, %v2042_v61, 0.0 }
 0x3d5   : > { %2038 = vadd.xlane.f32.xlu1 %v2037_v59  ;;  %v2045_v43 = vadd.f32 %v2044_v54, %v2043_v34 }
 0x3d7   : > { %2046 = vadd.xlane.f32.xlu0 %v2045_v43 }
 0x462   : > { %v2039_v6 = vpop.xlane.xlu1 %2038 }
 0x463   : > { %v2040_v17 = vmul.f32 0.00390625, %v2039_v6 }
 0x464   : > { %v2047_v31 = vpop.xlane.xlu0 %2046 }
 0x465   : > { %v2048_v50 = vmul.f32 0.00390625, %v2047_v31  ;;  %v2049_v15 = vmul.f32 %v2040_v17, %v2040_v17  ;;  %v2051_v63 = vsub.f32 %v2033_v28, %v2040_v17  ;;  %v2052_v47 = vsub.f32 %v2034_v1, %v2040_v17 }
 0x467   : > { %v2050_v41 = vsub.f32 %v2048_v50, %v2049_v15 }
 0x469   : > { %v2053_v0 = vadd.f32 1e-05, %v2050_v41 }
 0x46b   : > { %2339 = vrsqrt.f32 %v2053_v0 }
 0x475   : > { %v2340_v55 = vpop.eup %2339 }
 0x476   : > { %v2055_v51 = vmul.f32 %v2340_v55, %v2051_v63  ;;  %v2056_v4 = vmul.f32 %v2340_v55, %v2052_v47 }
 0x478   : > { %v2059_v35 = vadd.f32 %v2341_v57, %v2055_v51  ;;  %v2060_v26 = vadd.f32 %v2057_v36, %v2056_v4 }
 0x47a   : > { %v2063_v49 = vcombine.low %v2059_v35, %v2060_v26 }
 0x47c   : > { %2065 = vst [vmem:[%s267_s15] sm:$0xff] %v2063_v49 }
 0x47d   : > { %2385 = shalt.err (!%p2382_p4)
}
 0x47e   : > { %s2386_s26 = scalar_lea.hbm %s3759_s18, 128  ;;  %s2390_s13 = scalar_lea.hbm %s3809_s6, 256 }
 0x47f   : > { %p2387_p5 = scmp.ne.s32.totalorder %s3759_s18, %s2386_s26  ;;  %p2391_p0 = scmp.lt.u32.totalorder %s3759_s18, %s3809_s6 }
 0x480   : > { %p2392_p1 = scmp.lt.u32.totalorder %s2390_s13, %s2386_s26  ;;  %p2394_p6 = scmp.lt.u32.totalorder %s2386_s26, %s3759_s18 }
 0x481   : > { %p2388_p8 = pnand %p2387_p5, %p3978_p11 }
 0x482   : > { %p2393_p3 = por %p2392_p1, %p2391_p0 }
 0x483   : > { %p2389_p9 = pneg %p2388_p8 }
 0x484   : > { %p2395_p12 = por %p2394_p6, %p2393_p3 }
 0x486   : > { %p2396_p13 = pnand %p2395_p12, %p2389_p9 }
 0x488   : > { %2399 = shalt.err (!%p2396_p13)
}
 0x489   : > { %2170 = dma.vmem_to_hbm [thread:$0]  (%p3978_p11), %s3761_s17, 128, %s3759_s18, %s2067_s19  }
 0x48a PF: > { %s2093_s15 = sand.u32 1, %s2426_s21   ;;  %p3979_p7 = scmp.ne.s32.totalorder %s3875_s10, 0 }
 0x48b   : > { %p3980_p10 = scmp.ge.s32.totalorder %s2438_s24, 2  ;;  %s2094_s29 = scalar_lea.sflag [#allocation5], %s2093_s15 }
 0x48d   : > { %p2177_p2 = pnand %p3980_p10, %p3979_p7 }
 0x48f   : > { %2421 = dma.done.wait (!%p2177_p2), %s2094_s29, 128  }
 0x490   : > { %2423 = vsyncadd (!%p2177_p2), %s2094_s29, 4294967168  ;;  %p19_p4 = scmp.ge.s32.totalorder %s2548_s27, 4   ;;  %s3981_s21 = smov %s2430_s22 }
 0x491   : > { %s3982_s22 = smov %s2434_s23  ;;  %s3983_s23 = smov %s2560_s30 }
 0x492   : > { %s3984_s24 = smov %s2548_s27  ;;  %21 = sbr.rel (!%p19_p4) target bundleno = 5 (0x5), region = 90 }
 0x499   :  { %2099 = vsyncpa [#allocation4], 1 }
 0x49a   :  { %2101 = vsyncpa [#allocation4 + $0x1], 1 }
 0x49b   :  { %2102 = vsyncpa [#allocation5], 1 }
 0x49c   :  { %2104 = vsyncpa [#allocation5 + $0x1], 1 }

</bundles_post_ra>
